<compile_context>
chip_gen: v7x
topology: tpu7x:2x2x1
jax: 0.10.0
libtpu: 0.0.40
codegen_flags: <defaults>
</compile_context>

<pallas_src>
import numpy as np
import jax
import jax.numpy as jnp
from jax import lax
from jax.experimental import pallas as pl
from jax.experimental.pallas import tpu as pltpu

# ---- module-level constants referenced by the PyTorch code -------------------
BOS_TOKEN = 1
MAX_LEN = 8

# ---- small, deterministic hyper-parameters -----------------------------------
VOCAB = 32        # vocab_size
EMB = 16          # embedding_dim
HIDDEN = 32       # hidden_size
NUM_LAYERS = 2    # num_layers
LATENT = 16       # latent_dim
N = 8             # batch size

# Matmul precision for the kernel + weight packing.  HIGHEST keeps argmax
# parity with the fp32 reference (exact-token test below).  If bitwise/argmax
# parity is not a hard requirement, lax.Precision.DEFAULT (single-pass bf16
# MXU) removes the multi-pass fp32 emulation and is the next latency lever.
_PREC = lax.Precision.HIGHEST


def generator_kernel(z_ref, w0_ref, wz0_ref, b0_ref, w1_ref, b1_ref,
                     fcw_ref, fcb_ref, preds_ref):
    n = z_ref.shape[0]
    hidden = w1_ref.shape[0] // 2          # W1 is (2H, 4H)
    vocab = fcw_ref.shape[1]

    # ---- hoisted, time-invariant work (off the 7-step serial chain) ---------
    w0 = w0_ref[...]                        # (VOCAB+H, 4H) fused layer-0 gates (emb folded)
    w1 = w1_ref[...]                        # (2H, 4H)      fused layer-1 gates
    fcw = fcw_ref[...]                      # (H, VOCAB)
    # z never changes -> its gate contribution (+ fused layer-0 biases) once:
    zc0 = jnp.dot(z_ref[...], wz0_ref[...], precision=_PREC,
                  preferred_element_type=jnp.float32) + b0_ref[...]          # (N, 4H)
    b1b = jnp.broadcast_to(b1_ref[...], (n, 4 * hidden))                     # (N, 4H)
    fcb = jnp.broadcast_to(fcb_ref[...], (n, vocab))                         # (N, V)
    lane_ids = lax.broadcasted_iota(jnp.int32, (n, vocab), 1)                # (N, V)
    col_ids = lax.broadcasted_iota(jnp.int32, (n, MAX_LEN), 1)               # (N, MAX_LEN)

    def fused_gru(x_cat, h, w, const):
        # One MXU push producing [i_r+h_r | i_z+h_z | i_n | h_n] = (N, 4H=128).
        g = jnp.dot(x_cat, w, precision=_PREC,
                    preferred_element_type=jnp.float32) + const
        r = jax.nn.sigmoid(g[:, :hidden])
        u = jax.nn.sigmoid(g[:, hidden:2 * hidden])
        c = jnp.tanh(g[:, 2 * hidden:3 * hidden] + r * g[:, 3 * hidden:])
        return (1.0 - u) * c + u * h

    # ---- autoregressive decode: state in vregs, fully unrolled --------------
    h0 = jnp.zeros((n, hidden), jnp.float32)
    h1 = jnp.zeros((n, hidden), jnp.float32)
    onehot = (lane_ids == BOS_TOKEN).astype(jnp.float32)                     # (N, V)
    preds = jnp.full((n, MAX_LEN), BOS_TOKEN, jnp.int32)

    for t in range(MAX_LEN - 1):            # 7 fixed iterations -> unrolled
        h0 = fused_gru(jnp.concatenate([onehot, h0], axis=1), h0, w0, zc0)
        h1 = fused_gru(jnp.concatenate([h0, h1], axis=1), h1, w1, b1b)
        logits = jnp.dot(h1, fcw, precision=_PREC,
                         preferred_element_type=jnp.float32) + fcb           # (N, V)
        # argmax (first maximal index, matching torch) via max + iota + min
        maxv = jnp.max(logits, axis=-1, keepdims=True)
        cand = jnp.where(logits == maxv, lane_ids, vocab)
        tok = jnp.min(cand, axis=-1, keepdims=True)                          # (N, 1) int32
        preds = jnp.where(col_ids == (t + 1), tok, preds)
        onehot = (lane_ids == tok).astype(jnp.float32)

    preds_ref[...] = preds                  # single final store, batch-major


def _fuse_gru_layer(w_ih, w_hh, b_ih, b_hh):
    """Pack a PyTorch GRU layer into the fused [r | z | i_n | h_n] layout."""
    h = HIDDEN
    wi = w_ih.T            # (in, 3H), gate order r, z, n
    wh = w_hh.T            # (H, 3H)
    in_dim = wi.shape[0]
    w_x = jnp.concatenate(
        [wi[:, :2 * h], wi[:, 2 * h:], jnp.zeros((in_dim, h), jnp.float32)], axis=1)
    w_h = jnp.concatenate(
        [wh[:, :2 * h], jnp.zeros((h, h), jnp.float32), wh[:, 2 * h:]], axis=1)
    b = jnp.concatenate([b_ih[:2 * h] + b_hh[:2 * h], b_ih[2 * h:], b_hh[2 * h:]])
    return w_x, w_h, b      # (in, 4H), (H, 4H), (4H,)


def generator_forward(z, params):
    """Pallas wrapper. z: (N, LATENT) f32. Returns preds: (N, MAX_LEN) int32."""
    (emb, w_ih0, w_hh0, b_ih0, b_hh0,
     w_ih1, w_hh1, b_ih1, b_hh1, fc_w, fc_b) = params

    # ---- one-time weight packing (outside the serial kernel) ----------------
    wx0, wh0, b0 = _fuse_gru_layer(w_ih0, w_hh0, b_ih0, b_hh0)   # wx0: (E+L, 4H)
    wx1, wh1, b1 = _fuse_gru_layer(w_ih1, w_hh1, b_ih1, b_hh1)   # wx1: (H, 4H)

    # Fold the embedding table into the layer-0 input weights:
    #   embed(tok) @ Wx0_emb == onehot(tok) @ (emb @ Wx0_emb)
    t0 = jnp.dot(emb, wx0[:EMB], precision=_PREC)                # (VOCAB, 4H)
    w0 = jnp.concatenate([t0, wh0], axis=0)                      # (VOCAB+H, 4H)
    wz0 = wx0[EMB:]                                              # (LATENT, 4H)
    w1 = jnp.concatenate([wx1, wh1], axis=0)                     # (2H, 4H)

    inputs = (z, w0, wz0, b0[None, :], w1, b1[None, :], fc_w.T, fc_b[None, :])

    def full_spec(x):
        nd = x.ndim
        return pl.BlockSpec(x.shape, lambda i, nd=nd: (0,) * nd)

    n = z.shape[0]
    grid_spec = pltpu.PrefetchScalarGridSpec(
        num_scalar_prefetch=0,
        grid=(1,),
        in_specs=[full_spec(x) for x in inputs],
        out_specs=pl.BlockSpec((n, MAX_LEN), lambda i: (0, 0)),
        scratch_shapes=[],
    )

    return pl.pallas_call(
        generator_kernel,
        out_shape=jax.ShapeDtypeStruct((n, MAX_LEN), jnp.int32),
        grid_spec=grid_spec,
        compiler_params=pltpu.CompilerParams(dimension_semantics=("arbitrary",)),
    )(*inputs)


def reference_forward(z, params):
    """Pure-JAX f32 reference of the PyTorch forward (for verification)."""
    (emb, w_ih0, w_hh0, b_ih0, b_hh0,
     w_ih1, w_hh1, b_ih1, b_hh1, fc_w, fc_b) = params
    n = z.shape[0]
    tok = jnp.full((n,), BOS_TOKEN, jnp.int32)
    h0 = jnp.zeros((n, HIDDEN), jnp.float32)
    h1 = jnp.zeros((n, HIDDEN), jnp.float32)
    preds = [tok]
    hi = lax.Precision.HIGHEST

    def cell(x, h, w_ih, w_hh, b_ih, b_hh):
        gi = jnp.dot(x, w_ih.T, precision=hi) + b_ih
        gh = jnp.dot(h, w_hh.T, precision=hi) + b_hh
        i_r, i_z, i_n = jnp.split(gi, 3, axis=1)
        h_r, h_z, h_n = jnp.split(gh, 3, axis=1)
        r = jax.nn.sigmoid(i_r + h_r)
        u = jax.nn.sigmoid(i_z + h_z)
        c = jnp.tanh(i_n + r * h_n)
        return (1.0 - u) * c + u * h

    for _ in range(MAX_LEN - 1):
        x = jnp.concatenate([emb[tok], z], axis=1)
        h0 = cell(x, h0, w_ih0, w_hh0, b_ih0, b_hh0)
        h1 = cell(h0, h1, w_ih1, w_hh1, b_ih1, b_hh1)
        logits = jnp.dot(h1, fc_w.T, precision=hi) + fc_b
        tok = jnp.argmax(logits, axis=-1).astype(jnp.int32)
        preds.append(tok)
    return jnp.stack(preds, axis=1)


def make_params(key):
    ks = jax.random.split(key, 11)
    bound = 1.0 / np.sqrt(HIDDEN)

    def u(k, shape):
        return jax.random.uniform(k, shape, jnp.float32, minval=-bound, maxval=bound)

    emb = jax.random.normal(ks[0], (VOCAB, EMB), jnp.float32)
    w_ih0 = u(ks[1], (3 * HIDDEN, EMB + LATENT))
    w_hh0 = u(ks[2], (3 * HIDDEN, HIDDEN))
    b_ih0 = u(ks[3], (3 * HIDDEN,))
    b_hh0 = u(ks[4], (3 * HIDDEN,))
    w_ih1 = u(ks[5], (3 * HIDDEN, HIDDEN))
    w_hh1 = u(ks[6], (3 * HIDDEN, HIDDEN))
    b_ih1 = u(ks[7], (3 * HIDDEN,))
    b_hh1 = u(ks[8], (3 * HIDDEN,))
    fc_w = u(ks[9], (VOCAB, HIDDEN))
    fc_b = u(ks[10], (VOCAB,))
    return (emb, w_ih0, w_hh0, b_ih0, b_hh0,
            w_ih1, w_hh1, b_ih1, b_hh1, fc_w, fc_b)


if __name__ == "__main__":
    key = jax.random.PRNGKey(0)
    k_params, k_z = jax.random.split(key)
    params = make_params(k_params)
    z = jax.random.normal(k_z, (N, LATENT), jnp.float32)

    preds = generator_forward(z, params)
    preds = jax.block_until_ready(preds)

    assert preds.shape == (N, MAX_LEN), preds.shape
    assert preds.dtype == jnp.int32, preds.dtype
    preds_np = np.asarray(preds)
    assert np.all(preds_np[:, 0] == BOS_TOKEN)
    assert np.all((preds_np >= 0) & (preds_np < VOCAB))

    ref = np.asarray(jax.block_until_ready(reference_forward(z, params)))
    np.testing.assert_array_equal(preds_np, ref)

    print("KERNEL_OK")
</pallas_src>

<mosaic_0001>
module attributes {stable_mosaic.version = 11 : i64} {
  func.func @generator_kernel(%arg0: i32, %arg1: memref<8x16xf32, #tpu.memory_space<vmem>>, %arg2: memref<64x128xf32, #tpu.memory_space<vmem>>, %arg3: memref<16x128xf32, #tpu.memory_space<vmem>>, %arg4: memref<1x128xf32, #tpu.memory_space<vmem>>, %arg5: memref<64x128xf32, #tpu.memory_space<vmem>>, %arg6: memref<1x128xf32, #tpu.memory_space<vmem>>, %arg7: memref<32x32xf32, #tpu.memory_space<vmem>>, %arg8: memref<1x32xf32, #tpu.memory_space<vmem>>, %arg9: memref<8x8xi32, #tpu.memory_space<vmem>>) attributes {dimension_semantics = [#tpu.dimension_semantics<arbitrary>], iteration_bounds = array<i64: 1>, scalar_prefetch = 0 : i64, scratch_operands = 0 : i64, tpu.core_type = #tpu.core_type<tc>, window_params = [{pipeline_mode = #tpu.pipeline_mode<synchronous>, transform_indices = @transform_0, window_bounds = array<i64: 8, 16>}, {pipeline_mode = #tpu.pipeline_mode<synchronous>, transform_indices = @transform_1, window_bounds = array<i64: 64, 128>}, {pipeline_mode = #tpu.pipeline_mode<synchronous>, transform_indices = @transform_2, window_bounds = array<i64: 16, 128>}, {pipeline_mode = #tpu.pipeline_mode<synchronous>, transform_indices = @transform_3, window_bounds = array<i64: 1, 128>}, {pipeline_mode = #tpu.pipeline_mode<synchronous>, transform_indices = @transform_4, window_bounds = array<i64: 64, 128>}, {pipeline_mode = #tpu.pipeline_mode<synchronous>, transform_indices = @transform_5, window_bounds = array<i64: 1, 128>}, {pipeline_mode = #tpu.pipeline_mode<synchronous>, transform_indices = @transform_6, window_bounds = array<i64: 32, 32>}, {pipeline_mode = #tpu.pipeline_mode<synchronous>, transform_indices = @transform_7, window_bounds = array<i64: 1, 32>}, {pipeline_mode = #tpu.pipeline_mode<synchronous>, transform_indices = @transform_8, window_bounds = array<i64: 8, 8>}]} {
    %c0 = arith.constant 0 : index
    %c0_0 = arith.constant 0 : index
    %0 = vector.load %arg2[%c0, %c0_0] : memref<64x128xf32, #tpu.memory_space<vmem>>, vector<64x128xf32>
    %c0_1 = arith.constant 0 : index
    %c0_2 = arith.constant 0 : index
    %1 = vector.load %arg5[%c0_1, %c0_2] : memref<64x128xf32, #tpu.memory_space<vmem>>, vector<64x128xf32>
    %c0_3 = arith.constant 0 : index
    %c0_4 = arith.constant 0 : index
    %2 = vector.load %arg7[%c0_3, %c0_4] : memref<32x32xf32, #tpu.memory_space<vmem>>, vector<32x32xf32>
    %c0_5 = arith.constant 0 : index
    %c0_6 = arith.constant 0 : index
    %3 = vector.load %arg1[%c0_5, %c0_6] : memref<8x16xf32, #tpu.memory_space<vmem>>, vector<8x16xf32>
    %c0_7 = arith.constant 0 : index
    %c0_8 = arith.constant 0 : index
    %4 = vector.load %arg3[%c0_7, %c0_8] : memref<16x128xf32, #tpu.memory_space<vmem>>, vector<16x128xf32>
    %cst = arith.constant dense<0.000000e+00> : vector<8x128xf32>
    %5 = tpu.matmul %3, %4, %cst {dimension_numbers = #tpu.dot_dimension_numbers<[1], [0], [0], [1], [0, 0, 1, 1], [], []>, precision = #tpu.contract_precision<fp32>} : vector<8x16xf32>, vector<16x128xf32>, vector<8x128xf32> -> vector<8x128xf32>
    %c0_9 = arith.constant 0 : index
    %c0_10 = arith.constant 0 : index
    %6 = vector.load %arg4[%c0_9, %c0_10] : memref<1x128xf32, #tpu.memory_space<vmem>>, vector<1x128xf32>
    %7 = vector.broadcast %6 : vector<1x128xf32> to vector<8x128xf32>
    %8 = arith.addf %5, %7 : vector<8x128xf32>
    %c0_11 = arith.constant 0 : index
    %c0_12 = arith.constant 0 : index
    %9 = vector.load %arg6[%c0_11, %c0_12] : memref<1x128xf32, #tpu.memory_space<vmem>>, vector<1x128xf32>
    %10 = vector.shape_cast %9 : vector<1x128xf32> to vector<1x128xf32>
    %11 = vector.broadcast %10 : vector<1x128xf32> to vector<8x128xf32>
    %c0_13 = arith.constant 0 : index
    %c0_14 = arith.constant 0 : index
    %12 = vector.load %arg8[%c0_13, %c0_14] : memref<1x32xf32, #tpu.memory_space<vmem>>, vector<1x32xf32>
    %13 = vector.shape_cast %12 : vector<1x32xf32> to vector<1x32xf32>
    %14 = vector.broadcast %13 : vector<1x32xf32> to vector<8x32xf32>
    %15 = tpu.iota {dimensions = array<i32: 1>} : vector<8x32xi32>
    %16 = tpu.iota {dimensions = array<i32: 1>} : vector<8x8xi32>
    %cst_15 = arith.constant 0.000000e+00 : f32
    %17 = vector.broadcast %cst_15 : f32 to vector<8x32xf32>
    %cst_16 = arith.constant 0.000000e+00 : f32
    %18 = vector.broadcast %cst_16 : f32 to vector<8x32xf32>
    %c1_i32 = arith.constant 1 : i32
    %19 = vector.broadcast %c1_i32 : i32 to vector<8x32xi32>
    %20 = arith.cmpi eq, %15, %19 : vector<8x32xi32>
    %21 = arith.extui %20 : vector<8x32xi1> to vector<8x32xi32>
    %22 = arith.sitofp %21 : vector<8x32xi32> to vector<8x32xf32>
    %c1_i32_17 = arith.constant 1 : i32
    %23 = vector.broadcast %c1_i32_17 : i32 to vector<8x8xi32>
    %24 = tpu.concatenate %22, %17 in 1 : vector<8x32xf32>, vector<8x32xf32> -> vector<8x64xf32>
    %cst_18 = arith.constant dense<0.000000e+00> : vector<8x128xf32>
    %25 = tpu.matmul %24, %0, %cst_18 {dimension_numbers = #tpu.dot_dimension_numbers<[1], [0], [0], [1], [0, 0, 1, 1], [], []>, precision = #tpu.contract_precision<fp32>} : vector<8x64xf32>, vector<64x128xf32>, vector<8x128xf32> -> vector<8x128xf32>
    %26 = arith.addf %25, %8 : vector<8x128xf32>
    %27 = vector.extract_strided_slice %26 {offsets = [0, 0], sizes = [8, 32], strides = [1, 1]} : vector<8x128xf32> to vector<8x32xf32>
    %28 = arith.negf %27 : vector<8x32xf32>
    %29 = math.exp %28 : vector<8x32xf32>
    %cst_19 = arith.constant 1.000000e+00 : f32
    %30 = vector.broadcast %cst_19 : f32 to vector<8x32xf32>
    %31 = arith.addf %30, %29 : vector<8x32xf32>
    %32 = arith.divf %30, %31 : vector<8x32xf32>
    %33 = vector.extract_strided_slice %26 {offsets = [0, 32], sizes = [8, 32], strides = [1, 1]} : vector<8x128xf32> to vector<8x32xf32>
    %34 = arith.negf %33 : vector<8x32xf32>
    %35 = math.exp %34 : vector<8x32xf32>
    %cst_20 = arith.constant 1.000000e+00 : f32
    %36 = vector.broadcast %cst_20 : f32 to vector<8x32xf32>
    %37 = arith.addf %36, %35 : vector<8x32xf32>
    %38 = arith.divf %36, %37 : vector<8x32xf32>
    %39 = vector.extract_strided_slice %26 {offsets = [0, 64], sizes = [8, 32], strides = [1, 1]} : vector<8x128xf32> to vector<8x32xf32>
    %40 = vector.extract_strided_slice %26 {offsets = [0, 96], sizes = [8, 32], strides = [1, 1]} : vector<8x128xf32> to vector<8x32xf32>
    %41 = arith.mulf %32, %40 : vector<8x32xf32>
    %42 = arith.addf %39, %41 : vector<8x32xf32>
    %43 = math.tanh %42 : vector<8x32xf32>
    %cst_21 = arith.constant 1.000000e+00 : f32
    %44 = vector.broadcast %cst_21 : f32 to vector<8x32xf32>
    %45 = arith.subf %44, %38 : vector<8x32xf32>
    %46 = arith.mulf %45, %43 : vector<8x32xf32>
    %47 = arith.mulf %38, %17 : vector<8x32xf32>
    %48 = arith.addf %46, %47 : vector<8x32xf32>
    %49 = tpu.concatenate %48, %18 in 1 : vector<8x32xf32>, vector<8x32xf32> -> vector<8x64xf32>
    %cst_22 = arith.constant dense<0.000000e+00> : vector<8x128xf32>
    %50 = tpu.matmul %49, %1, %cst_22 {dimension_numbers = #tpu.dot_dimension_numbers<[1], [0], [0], [1], [0, 0, 1, 1], [], []>, precision = #tpu.contract_precision<fp32>} : vector<8x64xf32>, vector<64x128xf32>, vector<8x128xf32> -> vector<8x128xf32>
    %51 = arith.addf %50, %11 : vector<8x128xf32>
    %52 = vector.extract_strided_slice %51 {offsets = [0, 0], sizes = [8, 32], strides = [1, 1]} : vector<8x128xf32> to vector<8x32xf32>
    %53 = arith.negf %52 : vector<8x32xf32>
    %54 = math.exp %53 : vector<8x32xf32>
    %cst_23 = arith.constant 1.000000e+00 : f32
    %55 = vector.broadcast %cst_23 : f32 to vector<8x32xf32>
    %56 = arith.addf %55, %54 : vector<8x32xf32>
    %57 = arith.divf %55, %56 : vector<8x32xf32>
    %58 = vector.extract_strided_slice %51 {offsets = [0, 32], sizes = [8, 32], strides = [1, 1]} : vector<8x128xf32> to vector<8x32xf32>
    %59 = arith.negf %58 : vector<8x32xf32>
    %60 = math.exp %59 : vector<8x32xf32>
    %cst_24 = arith.constant 1.000000e+00 : f32
    %61 = vector.broadcast %cst_24 : f32 to vector<8x32xf32>
    %62 = arith.addf %61, %60 : vector<8x32xf32>
    %63 = arith.divf %61, %62 : vector<8x32xf32>
    %64 = vector.extract_strided_slice %51 {offsets = [0, 64], sizes = [8, 32], strides = [1, 1]} : vector<8x128xf32> to vector<8x32xf32>
    %65 = vector.extract_strided_slice %51 {offsets = [0, 96], sizes = [8, 32], strides = [1, 1]} : vector<8x128xf32> to vector<8x32xf32>
    %66 = arith.mulf %57, %65 : vector<8x32xf32>
    %67 = arith.addf %64, %66 : vector<8x32xf32>
    %68 = math.tanh %67 : vector<8x32xf32>
    %cst_25 = arith.constant 1.000000e+00 : f32
    %69 = vector.broadcast %cst_25 : f32 to vector<8x32xf32>
    %70 = arith.subf %69, %63 : vector<8x32xf32>
    %71 = arith.mulf %70, %68 : vector<8x32xf32>
    %72 = arith.mulf %63, %18 : vector<8x32xf32>
    %73 = arith.addf %71, %72 : vector<8x32xf32>
    %cst_26 = arith.constant dense<0.000000e+00> : vector<8x32xf32>
    %74 = tpu.matmul %73, %2, %cst_26 {dimension_numbers = #tpu.dot_dimension_numbers<[1], [0], [0], [1], [0, 0, 1, 1], [], []>, precision = #tpu.contract_precision<fp32>} : vector<8x32xf32>, vector<32x32xf32>, vector<8x32xf32> -> vector<8x32xf32>
    %75 = arith.addf %74, %14 : vector<8x32xf32>
    %cst_27 = arith.constant dense<0xFF800000> : vector<8xf32>
    %76 = vector.multi_reduction <maximumf>, %75, %cst_27 [1] : vector<8x32xf32> to vector<8xf32>
    %77 = vector.shape_cast %76 : vector<8xf32> to vector<8x1xf32>
    %78 = vector.broadcast %77 : vector<8x1xf32> to vector<8x32xf32>
    %79 = arith.cmpf oeq, %75, %78 : vector<8x32xf32>
    %c32_i32 = arith.constant 32 : i32
    %80 = vector.broadcast %c32_i32 : i32 to vector<8x32xi32>
    %81 = arith.select %79, %15, %80 : vector<8x32xi1>, vector<8x32xi32>
    %cst_28 = arith.constant dense<2147483647> : vector<8xi32>
    %82 = vector.multi_reduction <minsi>, %81, %cst_28 [1] : vector<8x32xi32> to vector<8xi32>
    %83 = vector.shape_cast %82 : vector<8xi32> to vector<8x1xi32>
    %c1_i32_29 = arith.constant 1 : i32
    %84 = vector.broadcast %c1_i32_29 : i32 to vector<8x8xi32>
    %85 = arith.cmpi eq, %16, %84 : vector<8x8xi32>
    %86 = vector.shape_cast %83 : vector<8x1xi32> to vector<8x1xi32>
    %87 = vector.broadcast %86 : vector<8x1xi32> to vector<8x8xi32>
    %88 = arith.select %85, %87, %23 : vector<8x8xi1>, vector<8x8xi32>
    %89 = vector.broadcast %83 : vector<8x1xi32> to vector<8x32xi32>
    %90 = arith.cmpi eq, %15, %89 : vector<8x32xi32>
    %91 = arith.extui %90 : vector<8x32xi1> to vector<8x32xi32>
    %92 = arith.sitofp %91 : vector<8x32xi32> to vector<8x32xf32>
    %93 = tpu.concatenate %92, %48 in 1 : vector<8x32xf32>, vector<8x32xf32> -> vector<8x64xf32>
    %cst_30 = arith.constant dense<0.000000e+00> : vector<8x128xf32>
    %94 = tpu.matmul %93, %0, %cst_30 {dimension_numbers = #tpu.dot_dimension_numbers<[1], [0], [0], [1], [0, 0, 1, 1], [], []>, precision = #tpu.contract_precision<fp32>} : vector<8x64xf32>, vector<64x128xf32>, vector<8x128xf32> -> vector<8x128xf32>
    %95 = arith.addf %94, %8 : vector<8x128xf32>
    %96 = vector.extract_strided_slice %95 {offsets = [0, 0], sizes = [8, 32], strides = [1, 1]} : vector<8x128xf32> to vector<8x32xf32>
    %97 = arith.negf %96 : vector<8x32xf32>
    %98 = math.exp %97 : vector<8x32xf32>
    %cst_31 = arith.constant 1.000000e+00 : f32
    %99 = vector.broadcast %cst_31 : f32 to vector<8x32xf32>
    %100 = arith.addf %99, %98 : vector<8x32xf32>
    %101 = arith.divf %99, %100 : vector<8x32xf32>
    %102 = vector.extract_strided_slice %95 {offsets = [0, 32], sizes = [8, 32], strides = [1, 1]} : vector<8x128xf32> to vector<8x32xf32>
    %103 = arith.negf %102 : vector<8x32xf32>
    %104 = math.exp %103 : vector<8x32xf32>
    %cst_32 = arith.constant 1.000000e+00 : f32
    %105 = vector.broadcast %cst_32 : f32 to vector<8x32xf32>
    %106 = arith.addf %105, %104 : vector<8x32xf32>
    %107 = arith.divf %105, %106 : vector<8x32xf32>
    %108 = vector.extract_strided_slice %95 {offsets = [0, 64], sizes = [8, 32], strides = [1, 1]} : vector<8x128xf32> to vector<8x32xf32>
    %109 = vector.extract_strided_slice %95 {offsets = [0, 96], sizes = [8, 32], strides = [1, 1]} : vector<8x128xf32> to vector<8x32xf32>
    %110 = arith.mulf %101, %109 : vector<8x32xf32>
    %111 = arith.addf %108, %110 : vector<8x32xf32>
    %112 = math.tanh %111 : vector<8x32xf32>
    %cst_33 = arith.constant 1.000000e+00 : f32
    %113 = vector.broadcast %cst_33 : f32 to vector<8x32xf32>
    %114 = arith.subf %113, %107 : vector<8x32xf32>
    %115 = arith.mulf %114, %112 : vector<8x32xf32>
    %116 = arith.mulf %107, %48 : vector<8x32xf32>
    %117 = arith.addf %115, %116 : vector<8x32xf32>
    %118 = tpu.concatenate %117, %73 in 1 : vector<8x32xf32>, vector<8x32xf32> -> vector<8x64xf32>
    %cst_34 = arith.constant dense<0.000000e+00> : vector<8x128xf32>
    %119 = tpu.matmul %118, %1, %cst_34 {dimension_numbers = #tpu.dot_dimension_numbers<[1], [0], [0], [1], [0, 0, 1, 1], [], []>, precision = #tpu.contract_precision<fp32>} : vector<8x64xf32>, vector<64x128xf32>, vector<8x128xf32> -> vector<8x128xf32>
    %120 = arith.addf %119, %11 : vector<8x128xf32>
    %121 = vector.extract_strided_slice %120 {offsets = [0, 0], sizes = [8, 32], strides = [1, 1]} : vector<8x128xf32> to vector<8x32xf32>
    %122 = arith.negf %121 : vector<8x32xf32>
    %123 = math.exp %122 : vector<8x32xf32>
    %cst_35 = arith.constant 1.000000e+00 : f32
    %124 = vector.broadcast %cst_35 : f32 to vector<8x32xf32>
    %125 = arith.addf %124, %123 : vector<8x32xf32>
    %126 = arith.divf %124, %125 : vector<8x32xf32>
    %127 = vector.extract_strided_slice %120 {offsets = [0, 32], sizes = [8, 32], strides = [1, 1]} : vector<8x128xf32> to vector<8x32xf32>
    %128 = arith.negf %127 : vector<8x32xf32>
    %129 = math.exp %128 : vector<8x32xf32>
    %cst_36 = arith.constant 1.000000e+00 : f32
    %130 = vector.broadcast %cst_36 : f32 to vector<8x32xf32>
    %131 = arith.addf %130, %129 : vector<8x32xf32>
    %132 = arith.divf %130, %131 : vector<8x32xf32>
    %133 = vector.extract_strided_slice %120 {offsets = [0, 64], sizes = [8, 32], strides = [1, 1]} : vector<8x128xf32> to vector<8x32xf32>
    %134 = vector.extract_strided_slice %120 {offsets = [0, 96], sizes = [8, 32], strides = [1, 1]} : vector<8x128xf32> to vector<8x32xf32>
    %135 = arith.mulf %126, %134 : vector<8x32xf32>
    %136 = arith.addf %133, %135 : vector<8x32xf32>
    %137 = math.tanh %136 : vector<8x32xf32>
    %cst_37 = arith.constant 1.000000e+00 : f32
    %138 = vector.broadcast %cst_37 : f32 to vector<8x32xf32>
    %139 = arith.subf %138, %132 : vector<8x32xf32>
    %140 = arith.mulf %139, %137 : vector<8x32xf32>
    %141 = arith.mulf %132, %73 : vector<8x32xf32>
    %142 = arith.addf %140, %141 : vector<8x32xf32>
    %cst_38 = arith.constant dense<0.000000e+00> : vector<8x32xf32>
    %143 = tpu.matmul %142, %2, %cst_38 {dimension_numbers = #tpu.dot_dimension_numbers<[1], [0], [0], [1], [0, 0, 1, 1], [], []>, precision = #tpu.contract_precision<fp32>} : vector<8x32xf32>, vector<32x32xf32>, vector<8x32xf32> -> vector<8x32xf32>
    %144 = arith.addf %143, %14 : vector<8x32xf32>
    %cst_39 = arith.constant dense<0xFF800000> : vector<8xf32>
    %145 = vector.multi_reduction <maximumf>, %144, %cst_39 [1] : vector<8x32xf32> to vector<8xf32>
    %146 = vector.shape_cast %145 : vector<8xf32> to vector<8x1xf32>
    %147 = vector.broadcast %146 : vector<8x1xf32> to vector<8x32xf32>
    %148 = arith.cmpf oeq, %144, %147 : vector<8x32xf32>
    %c32_i32_40 = arith.constant 32 : i32
    %149 = vector.broadcast %c32_i32_40 : i32 to vector<8x32xi32>
    %150 = arith.select %148, %15, %149 : vector<8x32xi1>, vector<8x32xi32>
    %cst_41 = arith.constant dense<2147483647> : vector<8xi32>
    %151 = vector.multi_reduction <minsi>, %150, %cst_41 [1] : vector<8x32xi32> to vector<8xi32>
    %152 = vector.shape_cast %151 : vector<8xi32> to vector<8x1xi32>
    %c2_i32 = arith.constant 2 : i32
    %153 = vector.broadcast %c2_i32 : i32 to vector<8x8xi32>
    %154 = arith.cmpi eq, %16, %153 : vector<8x8xi32>
    %155 = vector.shape_cast %152 : vector<8x1xi32> to vector<8x1xi32>
    %156 = vector.broadcast %155 : vector<8x1xi32> to vector<8x8xi32>
    %157 = arith.select %154, %156, %88 : vector<8x8xi1>, vector<8x8xi32>
    %158 = vector.broadcast %152 : vector<8x1xi32> to vector<8x32xi32>
    %159 = arith.cmpi eq, %15, %158 : vector<8x32xi32>
    %160 = arith.extui %159 : vector<8x32xi1> to vector<8x32xi32>
    %161 = arith.sitofp %160 : vector<8x32xi32> to vector<8x32xf32>
    %162 = tpu.concatenate %161, %117 in 1 : vector<8x32xf32>, vector<8x32xf32> -> vector<8x64xf32>
    %cst_42 = arith.constant dense<0.000000e+00> : vector<8x128xf32>
    %163 = tpu.matmul %162, %0, %cst_42 {dimension_numbers = #tpu.dot_dimension_numbers<[1], [0], [0], [1], [0, 0, 1, 1], [], []>, precision = #tpu.contract_precision<fp32>} : vector<8x64xf32>, vector<64x128xf32>, vector<8x128xf32> -> vector<8x128xf32>
    %164 = arith.addf %163, %8 : vector<8x128xf32>
    %165 = vector.extract_strided_slice %164 {offsets = [0, 0], sizes = [8, 32], strides = [1, 1]} : vector<8x128xf32> to vector<8x32xf32>
    %166 = arith.negf %165 : vector<8x32xf32>
    %167 = math.exp %166 : vector<8x32xf32>
    %cst_43 = arith.constant 1.000000e+00 : f32
    %168 = vector.broadcast %cst_43 : f32 to vector<8x32xf32>
    %169 = arith.addf %168, %167 : vector<8x32xf32>
    %170 = arith.divf %168, %169 : vector<8x32xf32>
    %171 = vector.extract_strided_slice %164 {offsets = [0, 32], sizes = [8, 32], strides = [1, 1]} : vector<8x128xf32> to vector<8x32xf32>
    %172 = arith.negf %171 : vector<8x32xf32>
    %173 = math.exp %172 : vector<8x32xf32>
    %cst_44 = arith.constant 1.000000e+00 : f32
    %174 = vector.broadcast %cst_44 : f32 to vector<8x32xf32>
    %175 = arith.addf %174, %173 : vector<8x32xf32>
    %176 = arith.divf %174, %175 : vector<8x32xf32>
    %177 = vector.extract_strided_slice %164 {offsets = [0, 64], sizes = [8, 32], strides = [1, 1]} : vector<8x128xf32> to vector<8x32xf32>
    %178 = vector.extract_strided_slice %164 {offsets = [0, 96], sizes = [8, 32], strides = [1, 1]} : vector<8x128xf32> to vector<8x32xf32>
    %179 = arith.mulf %170, %178 : vector<8x32xf32>
    %180 = arith.addf %177, %179 : vector<8x32xf32>
    %181 = math.tanh %180 : vector<8x32xf32>
    %cst_45 = arith.constant 1.000000e+00 : f32
    %182 = vector.broadcast %cst_45 : f32 to vector<8x32xf32>
    %183 = arith.subf %182, %176 : vector<8x32xf32>
    %184 = arith.mulf %183, %181 : vector<8x32xf32>
    %185 = arith.mulf %176, %117 : vector<8x32xf32>
    %186 = arith.addf %184, %185 : vector<8x32xf32>
    %187 = tpu.concatenate %186, %142 in 1 : vector<8x32xf32>, vector<8x32xf32> -> vector<8x64xf32>
    %cst_46 = arith.constant dense<0.000000e+00> : vector<8x128xf32>
    %188 = tpu.matmul %187, %1, %cst_46 {dimension_numbers = #tpu.dot_dimension_numbers<[1], [0], [0], [1], [0, 0, 1, 1], [], []>, precision = #tpu.contract_precision<fp32>} : vector<8x64xf32>, vector<64x128xf32>, vector<8x128xf32> -> vector<8x128xf32>
    %189 = arith.addf %188, %11 : vector<8x128xf32>
    %190 = vector.extract_strided_slice %189 {offsets = [0, 0], sizes = [8, 32], strides = [1, 1]} : vector<8x128xf32> to vector<8x32xf32>
    %191 = arith.negf %190 : vector<8x32xf32>
    %192 = math.exp %191 : vector<8x32xf32>
    %cst_47 = arith.constant 1.000000e+00 : f32
    %193 = vector.broadcast %cst_47 : f32 to vector<8x32xf32>
    %194 = arith.addf %193, %192 : vector<8x32xf32>
    %195 = arith.divf %193, %194 : vector<8x32xf32>
    %196 = vector.extract_strided_slice %189 {offsets = [0, 32], sizes = [8, 32], strides = [1, 1]} : vector<8x128xf32> to vector<8x32xf32>
    %197 = arith.negf %196 : vector<8x32xf32>
    %198 = math.exp %197 : vector<8x32xf32>
    %cst_48 = arith.constant 1.000000e+00 : f32
    %199 = vector.broadcast %cst_48 : f32 to vector<8x32xf32>
    %200 = arith.addf %199, %198 : vector<8x32xf32>
    %201 = arith.divf %199, %200 : vector<8x32xf32>
    %202 = vector.extract_strided_slice %189 {offsets = [0, 64], sizes = [8, 32], strides = [1, 1]} : vector<8x128xf32> to vector<8x32xf32>
    %203 = vector.extract_strided_slice %189 {offsets = [0, 96], sizes = [8, 32], strides = [1, 1]} : vector<8x128xf32> to vector<8x32xf32>
    %204 = arith.mulf %195, %203 : vector<8x32xf32>
    %205 = arith.addf %202, %204 : vector<8x32xf32>
    %206 = math.tanh %205 : vector<8x32xf32>
    %cst_49 = arith.constant 1.000000e+00 : f32
    %207 = vector.broadcast %cst_49 : f32 to vector<8x32xf32>
    %208 = arith.subf %207, %201 : vector<8x32xf32>
    %209 = arith.mulf %208, %206 : vector<8x32xf32>
    %210 = arith.mulf %201, %142 : vector<8x32xf32>
    %211 = arith.addf %209, %210 : vector<8x32xf32>
    %cst_50 = arith.constant dense<0.000000e+00> : vector<8x32xf32>
    %212 = tpu.matmul %211, %2, %cst_50 {dimension_numbers = #tpu.dot_dimension_numbers<[1], [0], [0], [1], [0, 0, 1, 1], [], []>, precision = #tpu.contract_precision<fp32>} : vector<8x32xf32>, vector<32x32xf32>, vector<8x32xf32> -> vector<8x32xf32>
    %213 = arith.addf %212, %14 : vector<8x32xf32>
    %cst_51 = arith.constant dense<0xFF800000> : vector<8xf32>
    %214 = vector.multi_reduction <maximumf>, %213, %cst_51 [1] : vector<8x32xf32> to vector<8xf32>
    %215 = vector.shape_cast %214 : vector<8xf32> to vector<8x1xf32>
    %216 = vector.broadcast %215 : vector<8x1xf32> to vector<8x32xf32>
    %217 = arith.cmpf oeq, %213, %216 : vector<8x32xf32>
    %c32_i32_52 = arith.constant 32 : i32
    %218 = vector.broadcast %c32_i32_52 : i32 to vector<8x32xi32>
    %219 = arith.select %217, %15, %218 : vector<8x32xi1>, vector<8x32xi32>
    %cst_53 = arith.constant dense<2147483647> : vector<8xi32>
    %220 = vector.multi_reduction <minsi>, %219, %cst_53 [1] : vector<8x32xi32> to vector<8xi32>
    %221 = vector.shape_cast %220 : vector<8xi32> to vector<8x1xi32>
    %c3_i32 = arith.constant 3 : i32
    %222 = vector.broadcast %c3_i32 : i32 to vector<8x8xi32>
    %223 = arith.cmpi eq, %16, %222 : vector<8x8xi32>
    %224 = vector.shape_cast %221 : vector<8x1xi32> to vector<8x1xi32>
    %225 = vector.broadcast %224 : vector<8x1xi32> to vector<8x8xi32>
    %226 = arith.select %223, %225, %157 : vector<8x8xi1>, vector<8x8xi32>
    %227 = vector.broadcast %221 : vector<8x1xi32> to vector<8x32xi32>
    %228 = arith.cmpi eq, %15, %227 : vector<8x32xi32>
    %229 = arith.extui %228 : vector<8x32xi1> to vector<8x32xi32>
    %230 = arith.sitofp %229 : vector<8x32xi32> to vector<8x32xf32>
    %231 = tpu.concatenate %230, %186 in 1 : vector<8x32xf32>, vector<8x32xf32> -> vector<8x64xf32>
    %cst_54 = arith.constant dense<0.000000e+00> : vector<8x128xf32>
    %232 = tpu.matmul %231, %0, %cst_54 {dimension_numbers = #tpu.dot_dimension_numbers<[1], [0], [0], [1], [0, 0, 1, 1], [], []>, precision = #tpu.contract_precision<fp32>} : vector<8x64xf32>, vector<64x128xf32>, vector<8x128xf32> -> vector<8x128xf32>
    %233 = arith.addf %232, %8 : vector<8x128xf32>
    %234 = vector.extract_strided_slice %233 {offsets = [0, 0], sizes = [8, 32], strides = [1, 1]} : vector<8x128xf32> to vector<8x32xf32>
    %235 = arith.negf %234 : vector<8x32xf32>
    %236 = math.exp %235 : vector<8x32xf32>
    %cst_55 = arith.constant 1.000000e+00 : f32
    %237 = vector.broadcast %cst_55 : f32 to vector<8x32xf32>
    %238 = arith.addf %237, %236 : vector<8x32xf32>
    %239 = arith.divf %237, %238 : vector<8x32xf32>
    %240 = vector.extract_strided_slice %233 {offsets = [0, 32], sizes = [8, 32], strides = [1, 1]} : vector<8x128xf32> to vector<8x32xf32>
    %241 = arith.negf %240 : vector<8x32xf32>
    %242 = math.exp %241 : vector<8x32xf32>
    %cst_56 = arith.constant 1.000000e+00 : f32
    %243 = vector.broadcast %cst_56 : f32 to vector<8x32xf32>
    %244 = arith.addf %243, %242 : vector<8x32xf32>
    %245 = arith.divf %243, %244 : vector<8x32xf32>
    %246 = vector.extract_strided_slice %233 {offsets = [0, 64], sizes = [8, 32], strides = [1, 1]} : vector<8x128xf32> to vector<8x32xf32>
    %247 = vector.extract_strided_slice %233 {offsets = [0, 96], sizes = [8, 32], strides = [1, 1]} : vector<8x128xf32> to vector<8x32xf32>
    %248 = arith.mulf %239, %247 : vector<8x32xf32>
    %249 = arith.addf %246, %248 : vector<8x32xf32>
    %250 = math.tanh %249 : vector<8x32xf32>
    %cst_57 = arith.constant 1.000000e+00 : f32
    %251 = vector.broadcast %cst_57 : f32 to vector<8x32xf32>
    %252 = arith.subf %251, %245 : vector<8x32xf32>
    %253 = arith.mulf %252, %250 : vector<8x32xf32>
    %254 = arith.mulf %245, %186 : vector<8x32xf32>
    %255 = arith.addf %253, %254 : vector<8x32xf32>
    %256 = tpu.concatenate %255, %211 in 1 : vector<8x32xf32>, vector<8x32xf32> -> vector<8x64xf32>
    %cst_58 = arith.constant dense<0.000000e+00> : vector<8x128xf32>
    %257 = tpu.matmul %256, %1, %cst_58 {dimension_numbers = #tpu.dot_dimension_numbers<[1], [0], [0], [1], [0, 0, 1, 1], [], []>, precision = #tpu.contract_precision<fp32>} : vector<8x64xf32>, vector<64x128xf32>, vector<8x128xf32> -> vector<8x128xf32>
    %258 = arith.addf %257, %11 : vector<8x128xf32>
    %259 = vector.extract_strided_slice %258 {offsets = [0, 0], sizes = [8, 32], strides = [1, 1]} : vector<8x128xf32> to vector<8x32xf32>
    %260 = arith.negf %259 : vector<8x32xf32>
    %261 = math.exp %260 : vector<8x32xf32>
    %cst_59 = arith.constant 1.000000e+00 : f32
    %262 = vector.broadcast %cst_59 : f32 to vector<8x32xf32>
    %263 = arith.addf %262, %261 : vector<8x32xf32>
    %264 = arith.divf %262, %263 : vector<8x32xf32>
    %265 = vector.extract_strided_slice %258 {offsets = [0, 32], sizes = [8, 32], strides = [1, 1]} : vector<8x128xf32> to vector<8x32xf32>
    %266 = arith.negf %265 : vector<8x32xf32>
    %267 = math.exp %266 : vector<8x32xf32>
    %cst_60 = arith.constant 1.000000e+00 : f32
    %268 = vector.broadcast %cst_60 : f32 to vector<8x32xf32>
    %269 = arith.addf %268, %267 : vector<8x32xf32>
    %270 = arith.divf %268, %269 : vector<8x32xf32>
    %271 = vector.extract_strided_slice %258 {offsets = [0, 64], sizes = [8, 32], strides = [1, 1]} : vector<8x128xf32> to vector<8x32xf32>
    %272 = vector.extract_strided_slice %258 {offsets = [0, 96], sizes = [8, 32], strides = [1, 1]} : vector<8x128xf32> to vector<8x32xf32>
    %273 = arith.mulf %264, %272 : vector<8x32xf32>
    %274 = arith.addf %271, %273 : vector<8x32xf32>
    %275 = math.tanh %274 : vector<8x32xf32>
    %cst_61 = arith.constant 1.000000e+00 : f32
    %276 = vector.broadcast %cst_61 : f32 to vector<8x32xf32>
    %277 = arith.subf %276, %270 : vector<8x32xf32>
    %278 = arith.mulf %277, %275 : vector<8x32xf32>
    %279 = arith.mulf %270, %211 : vector<8x32xf32>
    %280 = arith.addf %278, %279 : vector<8x32xf32>
    %cst_62 = arith.constant dense<0.000000e+00> : vector<8x32xf32>
    %281 = tpu.matmul %280, %2, %cst_62 {dimension_numbers = #tpu.dot_dimension_numbers<[1], [0], [0], [1], [0, 0, 1, 1], [], []>, precision = #tpu.contract_precision<fp32>} : vector<8x32xf32>, vector<32x32xf32>, vector<8x32xf32> -> vector<8x32xf32>
    %282 = arith.addf %281, %14 : vector<8x32xf32>
    %cst_63 = arith.constant dense<0xFF800000> : vector<8xf32>
    %283 = vector.multi_reduction <maximumf>, %282, %cst_63 [1] : vector<8x32xf32> to vector<8xf32>
    %284 = vector.shape_cast %283 : vector<8xf32> to vector<8x1xf32>
    %285 = vector.broadcast %284 : vector<8x1xf32> to vector<8x32xf32>
    %286 = arith.cmpf oeq, %282, %285 : vector<8x32xf32>
    %c32_i32_64 = arith.constant 32 : i32
    %287 = vector.broadcast %c32_i32_64 : i32 to vector<8x32xi32>
    %288 = arith.select %286, %15, %287 : vector<8x32xi1>, vector<8x32xi32>
    %cst_65 = arith.constant dense<2147483647> : vector<8xi32>
    %289 = vector.multi_reduction <minsi>, %288, %cst_65 [1] : vector<8x32xi32> to vector<8xi32>
    %290 = vector.shape_cast %289 : vector<8xi32> to vector<8x1xi32>
    %c4_i32 = arith.constant 4 : i32
    %291 = vector.broadcast %c4_i32 : i32 to vector<8x8xi32>
    %292 = arith.cmpi eq, %16, %291 : vector<8x8xi32>
    %293 = vector.shape_cast %290 : vector<8x1xi32> to vector<8x1xi32>
    %294 = vector.broadcast %293 : vector<8x1xi32> to vector<8x8xi32>
    %295 = arith.select %292, %294, %226 : vector<8x8xi1>, vector<8x8xi32>
    %296 = vector.broadcast %290 : vector<8x1xi32> to vector<8x32xi32>
    %297 = arith.cmpi eq, %15, %296 : vector<8x32xi32>
    %298 = arith.extui %297 : vector<8x32xi1> to vector<8x32xi32>
    %299 = arith.sitofp %298 : vector<8x32xi32> to vector<8x32xf32>
    %300 = tpu.concatenate %299, %255 in 1 : vector<8x32xf32>, vector<8x32xf32> -> vector<8x64xf32>
    %cst_66 = arith.constant dense<0.000000e+00> : vector<8x128xf32>
    %301 = tpu.matmul %300, %0, %cst_66 {dimension_numbers = #tpu.dot_dimension_numbers<[1], [0], [0], [1], [0, 0, 1, 1], [], []>, precision = #tpu.contract_precision<fp32>} : vector<8x64xf32>, vector<64x128xf32>, vector<8x128xf32> -> vector<8x128xf32>
    %302 = arith.addf %301, %8 : vector<8x128xf32>
    %303 = vector.extract_strided_slice %302 {offsets = [0, 0], sizes = [8, 32], strides = [1, 1]} : vector<8x128xf32> to vector<8x32xf32>
    %304 = arith.negf %303 : vector<8x32xf32>
    %305 = math.exp %304 : vector<8x32xf32>
    %cst_67 = arith.constant 1.000000e+00 : f32
    %306 = vector.broadcast %cst_67 : f32 to vector<8x32xf32>
    %307 = arith.addf %306, %305 : vector<8x32xf32>
    %308 = arith.divf %306, %307 : vector<8x32xf32>
    %309 = vector.extract_strided_slice %302 {offsets = [0, 32], sizes = [8, 32], strides = [1, 1]} : vector<8x128xf32> to vector<8x32xf32>
    %310 = arith.negf %309 : vector<8x32xf32>
    %311 = math.exp %310 : vector<8x32xf32>
    %cst_68 = arith.constant 1.000000e+00 : f32
    %312 = vector.broadcast %cst_68 : f32 to vector<8x32xf32>
    %313 = arith.addf %312, %311 : vector<8x32xf32>
    %314 = arith.divf %312, %313 : vector<8x32xf32>
    %315 = vector.extract_strided_slice %302 {offsets = [0, 64], sizes = [8, 32], strides = [1, 1]} : vector<8x128xf32> to vector<8x32xf32>
    %316 = vector.extract_strided_slice %302 {offsets = [0, 96], sizes = [8, 32], strides = [1, 1]} : vector<8x128xf32> to vector<8x32xf32>
    %317 = arith.mulf %308, %316 : vector<8x32xf32>
    %318 = arith.addf %315, %317 : vector<8x32xf32>
    %319 = math.tanh %318 : vector<8x32xf32>
    %cst_69 = arith.constant 1.000000e+00 : f32
    %320 = vector.broadcast %cst_69 : f32 to vector<8x32xf32>
    %321 = arith.subf %320, %314 : vector<8x32xf32>
    %322 = arith.mulf %321, %319 : vector<8x32xf32>
    %323 = arith.mulf %314, %255 : vector<8x32xf32>
    %324 = arith.addf %322, %323 : vector<8x32xf32>
    %325 = tpu.concatenate %324, %280 in 1 : vector<8x32xf32>, vector<8x32xf32> -> vector<8x64xf32>
    %cst_70 = arith.constant dense<0.000000e+00> : vector<8x128xf32>
    %326 = tpu.matmul %325, %1, %cst_70 {dimension_numbers = #tpu.dot_dimension_numbers<[1], [0], [0], [1], [0, 0, 1, 1], [], []>, precision = #tpu.contract_precision<fp32>} : vector<8x64xf32>, vector<64x128xf32>, vector<8x128xf32> -> vector<8x128xf32>
    %327 = arith.addf %326, %11 : vector<8x128xf32>
    %328 = vector.extract_strided_slice %327 {offsets = [0, 0], sizes = [8, 32], strides = [1, 1]} : vector<8x128xf32> to vector<8x32xf32>
    %329 = arith.negf %328 : vector<8x32xf32>
    %330 = math.exp %329 : vector<8x32xf32>
    %cst_71 = arith.constant 1.000000e+00 : f32
    %331 = vector.broadcast %cst_71 : f32 to vector<8x32xf32>
    %332 = arith.addf %331, %330 : vector<8x32xf32>
    %333 = arith.divf %331, %332 : vector<8x32xf32>
    %334 = vector.extract_strided_slice %327 {offsets = [0, 32], sizes = [8, 32], strides = [1, 1]} : vector<8x128xf32> to vector<8x32xf32>
    %335 = arith.negf %334 : vector<8x32xf32>
    %336 = math.exp %335 : vector<8x32xf32>
    %cst_72 = arith.constant 1.000000e+00 : f32
    %337 = vector.broadcast %cst_72 : f32 to vector<8x32xf32>
    %338 = arith.addf %337, %336 : vector<8x32xf32>
    %339 = arith.divf %337, %338 : vector<8x32xf32>
    %340 = vector.extract_strided_slice %327 {offsets = [0, 64], sizes = [8, 32], strides = [1, 1]} : vector<8x128xf32> to vector<8x32xf32>
    %341 = vector.extract_strided_slice %327 {offsets = [0, 96], sizes = [8, 32], strides = [1, 1]} : vector<8x128xf32> to vector<8x32xf32>
    %342 = arith.mulf %333, %341 : vector<8x32xf32>
    %343 = arith.addf %340, %342 : vector<8x32xf32>
    %344 = math.tanh %343 : vector<8x32xf32>
    %cst_73 = arith.constant 1.000000e+00 : f32
    %345 = vector.broadcast %cst_73 : f32 to vector<8x32xf32>
    %346 = arith.subf %345, %339 : vector<8x32xf32>
    %347 = arith.mulf %346, %344 : vector<8x32xf32>
    %348 = arith.mulf %339, %280 : vector<8x32xf32>
    %349 = arith.addf %347, %348 : vector<8x32xf32>
    %cst_74 = arith.constant dense<0.000000e+00> : vector<8x32xf32>
    %350 = tpu.matmul %349, %2, %cst_74 {dimension_numbers = #tpu.dot_dimension_numbers<[1], [0], [0], [1], [0, 0, 1, 1], [], []>, precision = #tpu.contract_precision<fp32>} : vector<8x32xf32>, vector<32x32xf32>, vector<8x32xf32> -> vector<8x32xf32>
    %351 = arith.addf %350, %14 : vector<8x32xf32>
    %cst_75 = arith.constant dense<0xFF800000> : vector<8xf32>
    %352 = vector.multi_reduction <maximumf>, %351, %cst_75 [1] : vector<8x32xf32> to vector<8xf32>
    %353 = vector.shape_cast %352 : vector<8xf32> to vector<8x1xf32>
    %354 = vector.broadcast %353 : vector<8x1xf32> to vector<8x32xf32>
    %355 = arith.cmpf oeq, %351, %354 : vector<8x32xf32>
    %c32_i32_76 = arith.constant 32 : i32
    %356 = vector.broadcast %c32_i32_76 : i32 to vector<8x32xi32>
    %357 = arith.select %355, %15, %356 : vector<8x32xi1>, vector<8x32xi32>
    %cst_77 = arith.constant dense<2147483647> : vector<8xi32>
    %358 = vector.multi_reduction <minsi>, %357, %cst_77 [1] : vector<8x32xi32> to vector<8xi32>
    %359 = vector.shape_cast %358 : vector<8xi32> to vector<8x1xi32>
    %c5_i32 = arith.constant 5 : i32
    %360 = vector.broadcast %c5_i32 : i32 to vector<8x8xi32>
    %361 = arith.cmpi eq, %16, %360 : vector<8x8xi32>
    %362 = vector.shape_cast %359 : vector<8x1xi32> to vector<8x1xi32>
    %363 = vector.broadcast %362 : vector<8x1xi32> to vector<8x8xi32>
    %364 = arith.select %361, %363, %295 : vector<8x8xi1>, vector<8x8xi32>
    %365 = vector.broadcast %359 : vector<8x1xi32> to vector<8x32xi32>
    %366 = arith.cmpi eq, %15, %365 : vector<8x32xi32>
    %367 = arith.extui %366 : vector<8x32xi1> to vector<8x32xi32>
    %368 = arith.sitofp %367 : vector<8x32xi32> to vector<8x32xf32>
    %369 = tpu.concatenate %368, %324 in 1 : vector<8x32xf32>, vector<8x32xf32> -> vector<8x64xf32>
    %cst_78 = arith.constant dense<0.000000e+00> : vector<8x128xf32>
    %370 = tpu.matmul %369, %0, %cst_78 {dimension_numbers = #tpu.dot_dimension_numbers<[1], [0], [0], [1], [0, 0, 1, 1], [], []>, precision = #tpu.contract_precision<fp32>} : vector<8x64xf32>, vector<64x128xf32>, vector<8x128xf32> -> vector<8x128xf32>
    %371 = arith.addf %370, %8 : vector<8x128xf32>
    %372 = vector.extract_strided_slice %371 {offsets = [0, 0], sizes = [8, 32], strides = [1, 1]} : vector<8x128xf32> to vector<8x32xf32>
    %373 = arith.negf %372 : vector<8x32xf32>
    %374 = math.exp %373 : vector<8x32xf32>
    %cst_79 = arith.constant 1.000000e+00 : f32
    %375 = vector.broadcast %cst_79 : f32 to vector<8x32xf32>
    %376 = arith.addf %375, %374 : vector<8x32xf32>
    %377 = arith.divf %375, %376 : vector<8x32xf32>
    %378 = vector.extract_strided_slice %371 {offsets = [0, 32], sizes = [8, 32], strides = [1, 1]} : vector<8x128xf32> to vector<8x32xf32>
    %379 = arith.negf %378 : vector<8x32xf32>
    %380 = math.exp %379 : vector<8x32xf32>
    %cst_80 = arith.constant 1.000000e+00 : f32
    %381 = vector.broadcast %cst_80 : f32 to vector<8x32xf32>
    %382 = arith.addf %381, %380 : vector<8x32xf32>
    %383 = arith.divf %381, %382 : vector<8x32xf32>
    %384 = vector.extract_strided_slice %371 {offsets = [0, 64], sizes = [8, 32], strides = [1, 1]} : vector<8x128xf32> to vector<8x32xf32>
    %385 = vector.extract_strided_slice %371 {offsets = [0, 96], sizes = [8, 32], strides = [1, 1]} : vector<8x128xf32> to vector<8x32xf32>
    %386 = arith.mulf %377, %385 : vector<8x32xf32>
    %387 = arith.addf %384, %386 : vector<8x32xf32>
    %388 = math.tanh %387 : vector<8x32xf32>
    %cst_81 = arith.constant 1.000000e+00 : f32
    %389 = vector.broadcast %cst_81 : f32 to vector<8x32xf32>
    %390 = arith.subf %389, %383 : vector<8x32xf32>
    %391 = arith.mulf %390, %388 : vector<8x32xf32>
    %392 = arith.mulf %383, %324 : vector<8x32xf32>
    %393 = arith.addf %391, %392 : vector<8x32xf32>
    %394 = tpu.concatenate %393, %349 in 1 : vector<8x32xf32>, vector<8x32xf32> -> vector<8x64xf32>
    %cst_82 = arith.constant dense<0.000000e+00> : vector<8x128xf32>
    %395 = tpu.matmul %394, %1, %cst_82 {dimension_numbers = #tpu.dot_dimension_numbers<[1], [0], [0], [1], [0, 0, 1, 1], [], []>, precision = #tpu.contract_precision<fp32>} : vector<8x64xf32>, vector<64x128xf32>, vector<8x128xf32> -> vector<8x128xf32>
    %396 = arith.addf %395, %11 : vector<8x128xf32>
    %397 = vector.extract_strided_slice %396 {offsets = [0, 0], sizes = [8, 32], strides = [1, 1]} : vector<8x128xf32> to vector<8x32xf32>
    %398 = arith.negf %397 : vector<8x32xf32>
    %399 = math.exp %398 : vector<8x32xf32>
    %cst_83 = arith.constant 1.000000e+00 : f32
    %400 = vector.broadcast %cst_83 : f32 to vector<8x32xf32>
    %401 = arith.addf %400, %399 : vector<8x32xf32>
    %402 = arith.divf %400, %401 : vector<8x32xf32>
    %403 = vector.extract_strided_slice %396 {offsets = [0, 32], sizes = [8, 32], strides = [1, 1]} : vector<8x128xf32> to vector<8x32xf32>
    %404 = arith.negf %403 : vector<8x32xf32>
    %405 = math.exp %404 : vector<8x32xf32>
    %cst_84 = arith.constant 1.000000e+00 : f32
    %406 = vector.broadcast %cst_84 : f32 to vector<8x32xf32>
    %407 = arith.addf %406, %405 : vector<8x32xf32>
    %408 = arith.divf %406, %407 : vector<8x32xf32>
    %409 = vector.extract_strided_slice %396 {offsets = [0, 64], sizes = [8, 32], strides = [1, 1]} : vector<8x128xf32> to vector<8x32xf32>
    %410 = vector.extract_strided_slice %396 {offsets = [0, 96], sizes = [8, 32], strides = [1, 1]} : vector<8x128xf32> to vector<8x32xf32>
    %411 = arith.mulf %402, %410 : vector<8x32xf32>
    %412 = arith.addf %409, %411 : vector<8x32xf32>
    %413 = math.tanh %412 : vector<8x32xf32>
    %cst_85 = arith.constant 1.000000e+00 : f32
    %414 = vector.broadcast %cst_85 : f32 to vector<8x32xf32>
    %415 = arith.subf %414, %408 : vector<8x32xf32>
    %416 = arith.mulf %415, %413 : vector<8x32xf32>
    %417 = arith.mulf %408, %349 : vector<8x32xf32>
    %418 = arith.addf %416, %417 : vector<8x32xf32>
    %cst_86 = arith.constant dense<0.000000e+00> : vector<8x32xf32>
    %419 = tpu.matmul %418, %2, %cst_86 {dimension_numbers = #tpu.dot_dimension_numbers<[1], [0], [0], [1], [0, 0, 1, 1], [], []>, precision = #tpu.contract_precision<fp32>} : vector<8x32xf32>, vector<32x32xf32>, vector<8x32xf32> -> vector<8x32xf32>
    %420 = arith.addf %419, %14 : vector<8x32xf32>
    %cst_87 = arith.constant dense<0xFF800000> : vector<8xf32>
    %421 = vector.multi_reduction <maximumf>, %420, %cst_87 [1] : vector<8x32xf32> to vector<8xf32>
    %422 = vector.shape_cast %421 : vector<8xf32> to vector<8x1xf32>
    %423 = vector.broadcast %422 : vector<8x1xf32> to vector<8x32xf32>
    %424 = arith.cmpf oeq, %420, %423 : vector<8x32xf32>
    %c32_i32_88 = arith.constant 32 : i32
    %425 = vector.broadcast %c32_i32_88 : i32 to vector<8x32xi32>
    %426 = arith.select %424, %15, %425 : vector<8x32xi1>, vector<8x32xi32>
    %cst_89 = arith.constant dense<2147483647> : vector<8xi32>
    %427 = vector.multi_reduction <minsi>, %426, %cst_89 [1] : vector<8x32xi32> to vector<8xi32>
    %428 = vector.shape_cast %427 : vector<8xi32> to vector<8x1xi32>
    %c6_i32 = arith.constant 6 : i32
    %429 = vector.broadcast %c6_i32 : i32 to vector<8x8xi32>
    %430 = arith.cmpi eq, %16, %429 : vector<8x8xi32>
    %431 = vector.shape_cast %428 : vector<8x1xi32> to vector<8x1xi32>
    %432 = vector.broadcast %431 : vector<8x1xi32> to vector<8x8xi32>
    %433 = arith.select %430, %432, %364 : vector<8x8xi1>, vector<8x8xi32>
    %434 = vector.broadcast %428 : vector<8x1xi32> to vector<8x32xi32>
    %435 = arith.cmpi eq, %15, %434 : vector<8x32xi32>
    %436 = arith.extui %435 : vector<8x32xi1> to vector<8x32xi32>
    %437 = arith.sitofp %436 : vector<8x32xi32> to vector<8x32xf32>
    %438 = tpu.concatenate %437, %393 in 1 : vector<8x32xf32>, vector<8x32xf32> -> vector<8x64xf32>
    %cst_90 = arith.constant dense<0.000000e+00> : vector<8x128xf32>
    %439 = tpu.matmul %438, %0, %cst_90 {dimension_numbers = #tpu.dot_dimension_numbers<[1], [0], [0], [1], [0, 0, 1, 1], [], []>, precision = #tpu.contract_precision<fp32>} : vector<8x64xf32>, vector<64x128xf32>, vector<8x128xf32> -> vector<8x128xf32>
    %440 = arith.addf %439, %8 : vector<8x128xf32>
    %441 = vector.extract_strided_slice %440 {offsets = [0, 0], sizes = [8, 32], strides = [1, 1]} : vector<8x128xf32> to vector<8x32xf32>
    %442 = arith.negf %441 : vector<8x32xf32>
    %443 = math.exp %442 : vector<8x32xf32>
    %cst_91 = arith.constant 1.000000e+00 : f32
    %444 = vector.broadcast %cst_91 : f32 to vector<8x32xf32>
    %445 = arith.addf %444, %443 : vector<8x32xf32>
    %446 = arith.divf %444, %445 : vector<8x32xf32>
    %447 = vector.extract_strided_slice %440 {offsets = [0, 32], sizes = [8, 32], strides = [1, 1]} : vector<8x128xf32> to vector<8x32xf32>
    %448 = arith.negf %447 : vector<8x32xf32>
    %449 = math.exp %448 : vector<8x32xf32>
    %cst_92 = arith.constant 1.000000e+00 : f32
    %450 = vector.broadcast %cst_92 : f32 to vector<8x32xf32>
    %451 = arith.addf %450, %449 : vector<8x32xf32>
    %452 = arith.divf %450, %451 : vector<8x32xf32>
    %453 = vector.extract_strided_slice %440 {offsets = [0, 64], sizes = [8, 32], strides = [1, 1]} : vector<8x128xf32> to vector<8x32xf32>
    %454 = vector.extract_strided_slice %440 {offsets = [0, 96], sizes = [8, 32], strides = [1, 1]} : vector<8x128xf32> to vector<8x32xf32>
    %455 = arith.mulf %446, %454 : vector<8x32xf32>
    %456 = arith.addf %453, %455 : vector<8x32xf32>
    %457 = math.tanh %456 : vector<8x32xf32>
    %cst_93 = arith.constant 1.000000e+00 : f32
    %458 = vector.broadcast %cst_93 : f32 to vector<8x32xf32>
    %459 = arith.subf %458, %452 : vector<8x32xf32>
    %460 = arith.mulf %459, %457 : vector<8x32xf32>
    %461 = arith.mulf %452, %393 : vector<8x32xf32>
    %462 = arith.addf %460, %461 : vector<8x32xf32>
    %463 = tpu.concatenate %462, %418 in 1 : vector<8x32xf32>, vector<8x32xf32> -> vector<8x64xf32>
    %cst_94 = arith.constant dense<0.000000e+00> : vector<8x128xf32>
    %464 = tpu.matmul %463, %1, %cst_94 {dimension_numbers = #tpu.dot_dimension_numbers<[1], [0], [0], [1], [0, 0, 1, 1], [], []>, precision = #tpu.contract_precision<fp32>} : vector<8x64xf32>, vector<64x128xf32>, vector<8x128xf32> -> vector<8x128xf32>
    %465 = arith.addf %464, %11 : vector<8x128xf32>
    %466 = vector.extract_strided_slice %465 {offsets = [0, 0], sizes = [8, 32], strides = [1, 1]} : vector<8x128xf32> to vector<8x32xf32>
    %467 = arith.negf %466 : vector<8x32xf32>
    %468 = math.exp %467 : vector<8x32xf32>
    %cst_95 = arith.constant 1.000000e+00 : f32
    %469 = vector.broadcast %cst_95 : f32 to vector<8x32xf32>
    %470 = arith.addf %469, %468 : vector<8x32xf32>
    %471 = arith.divf %469, %470 : vector<8x32xf32>
    %472 = vector.extract_strided_slice %465 {offsets = [0, 32], sizes = [8, 32], strides = [1, 1]} : vector<8x128xf32> to vector<8x32xf32>
    %473 = arith.negf %472 : vector<8x32xf32>
    %474 = math.exp %473 : vector<8x32xf32>
    %cst_96 = arith.constant 1.000000e+00 : f32
    %475 = vector.broadcast %cst_96 : f32 to vector<8x32xf32>
    %476 = arith.addf %475, %474 : vector<8x32xf32>
    %477 = arith.divf %475, %476 : vector<8x32xf32>
    %478 = vector.extract_strided_slice %465 {offsets = [0, 64], sizes = [8, 32], strides = [1, 1]} : vector<8x128xf32> to vector<8x32xf32>
    %479 = vector.extract_strided_slice %465 {offsets = [0, 96], sizes = [8, 32], strides = [1, 1]} : vector<8x128xf32> to vector<8x32xf32>
    %480 = arith.mulf %471, %479 : vector<8x32xf32>
    %481 = arith.addf %478, %480 : vector<8x32xf32>
    %482 = math.tanh %481 : vector<8x32xf32>
    %cst_97 = arith.constant 1.000000e+00 : f32
    %483 = vector.broadcast %cst_97 : f32 to vector<8x32xf32>
    %484 = arith.subf %483, %477 : vector<8x32xf32>
    %485 = arith.mulf %484, %482 : vector<8x32xf32>
    %486 = arith.mulf %477, %418 : vector<8x32xf32>
    %487 = arith.addf %485, %486 : vector<8x32xf32>
    %cst_98 = arith.constant dense<0.000000e+00> : vector<8x32xf32>
    %488 = tpu.matmul %487, %2, %cst_98 {dimension_numbers = #tpu.dot_dimension_numbers<[1], [0], [0], [1], [0, 0, 1, 1], [], []>, precision = #tpu.contract_precision<fp32>} : vector<8x32xf32>, vector<32x32xf32>, vector<8x32xf32> -> vector<8x32xf32>
    %489 = arith.addf %488, %14 : vector<8x32xf32>
    %cst_99 = arith.constant dense<0xFF800000> : vector<8xf32>
    %490 = vector.multi_reduction <maximumf>, %489, %cst_99 [1] : vector<8x32xf32> to vector<8xf32>
    %491 = vector.shape_cast %490 : vector<8xf32> to vector<8x1xf32>
    %492 = vector.broadcast %491 : vector<8x1xf32> to vector<8x32xf32>
    %493 = arith.cmpf oeq, %489, %492 : vector<8x32xf32>
    %c32_i32_100 = arith.constant 32 : i32
    %494 = vector.broadcast %c32_i32_100 : i32 to vector<8x32xi32>
    %495 = arith.select %493, %15, %494 : vector<8x32xi1>, vector<8x32xi32>
    %cst_101 = arith.constant dense<2147483647> : vector<8xi32>
    %496 = vector.multi_reduction <minsi>, %495, %cst_101 [1] : vector<8x32xi32> to vector<8xi32>
    %497 = vector.shape_cast %496 : vector<8xi32> to vector<8x1xi32>
    %c7_i32 = arith.constant 7 : i32
    %498 = vector.broadcast %c7_i32 : i32 to vector<8x8xi32>
    %499 = arith.cmpi eq, %16, %498 : vector<8x8xi32>
    %500 = vector.shape_cast %497 : vector<8x1xi32> to vector<8x1xi32>
    %501 = vector.broadcast %500 : vector<8x1xi32> to vector<8x8xi32>
    %502 = arith.select %499, %501, %433 : vector<8x8xi1>, vector<8x8xi32>
    %c0_102 = arith.constant 0 : index
    %c0_103 = arith.constant 0 : index
    %503 = vector.load %arg9[%c0_102, %c0_103] : memref<8x8xi32, #tpu.memory_space<vmem>>, vector<8x8xi32>
    tpu.vector_store %arg9[%c0_102, %c0_103], %502 {strides = array<i32>} : memref<8x8xi32, #tpu.memory_space<vmem>>, vector<8x8xi32>,
    return
  }
  func.func @transform_0(%arg0: i32) -> (i32, i32) {
    %c0_i32 = arith.constant 0 : i32
    %c0_i32_0 = arith.constant 0 : i32
    %c0_i32_1 = arith.constant 0 : i32
    return %c0_i32, %c0_i32_0 : i32, i32
  }
  func.func @transform_1(%arg0: i32) -> (i32, i32) {
    %c0_i32 = arith.constant 0 : i32
    %c0_i32_0 = arith.constant 0 : i32
    %c0_i32_1 = arith.constant 0 : i32
    return %c0_i32, %c0_i32_0 : i32, i32
  }
  func.func @transform_2(%arg0: i32) -> (i32, i32) {
    %c0_i32 = arith.constant 0 : i32
    %c0_i32_0 = arith.constant 0 : i32
    %c0_i32_1 = arith.constant 0 : i32
    return %c0_i32, %c0_i32_0 : i32, i32
  }
  func.func @transform_3(%arg0: i32) -> (i32, i32) {
    %c0_i32 = arith.constant 0 : i32
    %c0_i32_0 = arith.constant 0 : i32
    %c0_i32_1 = arith.constant 0 : i32
    return %c0_i32, %c0_i32_0 : i32, i32
  }
  func.func @transform_4(%arg0: i32) -> (i32, i32) {
    %c0_i32 = arith.constant 0 : i32
    %c0_i32_0 = arith.constant 0 : i32
    %c0_i32_1 = arith.constant 0 : i32
    return %c0_i32, %c0_i32_0 : i32, i32
  }
  func.func @transform_5(%arg0: i32) -> (i32, i32) {
    %c0_i32 = arith.constant 0 : i32
    %c0_i32_0 = arith.constant 0 : i32
    %c0_i32_1 = arith.constant 0 : i32
    return %c0_i32, %c0_i32_0 : i32, i32
  }
  func.func @transform_6(%arg0: i32) -> (i32, i32) {
    %c0_i32 = arith.constant 0 : i32
    %c0_i32_0 = arith.constant 0 : i32
    %c0_i32_1 = arith.constant 0 : i32
    return %c0_i32, %c0_i32_0 : i32, i32
  }
  func.func @transform_7(%arg0: i32) -> (i32, i32) {
    %c0_i32 = arith.constant 0 : i32
    %c0_i32_0 = arith.constant 0 : i32
    %c0_i32_1 = arith.constant 0 : i32
    return %c0_i32, %c0_i32_0 : i32, i32
  }
  func.func @transform_8(%arg0: i32) -> (i32, i32) {
    %c0_i32 = arith.constant 0 : i32
    %c0_i32_0 = arith.constant 0 : i32
    %c0_i32_1 = arith.constant 0 : i32
    return %c0_i32, %c0_i32_0 : i32, i32
  }
}

</mosaic_0001>

<bundles_post_ra>
// kernel: tpu_custom_call.1
= control target key start
LH: loop header
LB: loop body
LE: loop exit
PB: predicated region body
PF: predicated region fallthrough
CT: control target
= control target key end

     0   :  { %13 = vsyncpa [#allocation3], 0  ;;  %s18855_s0 = inlined_call_operand.hbm [shape: f32[8,16], index: 0, kind: input, shape index: {}]   ;;  %s18856_s1 = inlined_call_operand.hbm [shape: f32[64,128], index: 1, kind: input, shape index: {}]   ;;  %s18857_s2 = inlined_call_operand.hbm [shape: f32[16,128], index: 2, kind: input, shape index: {}]   ;;  %s18858_s3 = inlined_call_operand.vmem [shape: f32[1,128], index: 3, kind: input, shape index: {}]   ;;  %s18859_s4 = inlined_call_operand.hbm [shape: f32[64,128], index: 4, kind: input, shape index: {}]   ;;  %s18860_s5 = inlined_call_operand.vmem [shape: f32[1,128], index: 5, kind: input, shape index: {}]   ;;  %s18861_s6 = inlined_call_operand.hbm [shape: f32[32,32], index: 6, kind: input, shape index: {}]   ;;  %s18862_s7 = inlined_call_operand.vmem [shape: f32[1,32], index: 7, kind: input, shape index: {}]   ;;  %s18863_s8 = inlined_call_operand.hbm [shape: s32[8,8], index: 8, kind: output, shape index: {}]  }
   0x1   :  { %14 = vsyncpa [#allocation6], 0 }
   0x2   :  { %15 = vsyncpa [#allocation9], 0 }
   0x3   :  { %16 = vsyncpa [#allocation4], 0  ;;  %s17053_s27 = smov [#allocation5]   ;;  %s16913_s9 = scalar_lea.hbm %s18856_s1, 1024 }
   0x4   :  { %s32_s28 = sshll.u32 %s17053_s27, 4  ;;  %p16914_p0 = scmp.ne.s32.totalorder %s18856_s1, %s16913_s9  ;;  %s33_s28 = int_to_ptr.vmem [resolvable:$true] %s32_s28 }
   0x5   :  { %p16917_p1 = scmp.lt.u32.totalorder %s16913_s9, %s18856_s1 }
   0x7   :  { %p16919_p2 = pnand %p16917_p1, %p16914_p0 }
   0x9   :  { %16922 = shalt.err (!%p16919_p2)
}
   0xa   :  { %s16923_s14 = scalar_lea.vmem %s33_s28, 1024  ;;  %p16928_p4 = scmp.lt.s32.totalorder %s33_s28, %s33_s28 }
   0xb   :  { %p16924_p3 = scmp.ne.s32.totalorder %s33_s28, %s16923_s14  ;;  %p16929_p5 = scmp.lt.s32.totalorder %s16923_s14, %s16923_s14 }
   0xd   :  { %p16930_p6 = por %p16929_p5, %p16928_p4 }
   0xf   :  { %p16931_p7 = pnand %p16930_p6, %p16924_p3 }
  0x11   :  { %16934 = shalt.err (!%p16931_p7)
}
  0x12   :  { %s17054_s15 = smov 128   ;;  %s17055_s16 = smov 8  }
  0x13   :  { %38 = dma.hbm_to_vmem [thread:$0]  %s18856_s1, 1024, %s33_s28, [#allocation6], %s17054_s15, %s17054_s15, %s17055_s16  }
  0x14   :  { %s17056_s19 = smov [#allocation8]   ;;  %s17057_s21 = smov [#allocation2]  }
  0x15   :  { %s58_s20 = sshll.u32 %s17056_s19, 4  ;;  %s23_s22 = sshll.u32 %s17057_s21, 4  ;;  %s59_s20 = int_to_ptr.vmem [resolvable:$true] %s58_s20  ;;  %s24_s22 = int_to_ptr.vmem [resolvable:$true] %s23_s22 }
  0x16   :  { %s16935_s25 = scalar_lea.hbm %s18859_s4, 1024 }
  0x17   :  { %p16936_p8 = scmp.ne.s32.totalorder %s18859_s4, %s16935_s25  ;;  %p16939_p9 = scmp.lt.u32.totalorder %s16935_s25, %s18859_s4 }
  0x19   :  { %p16941_p10 = pnand %p16939_p9, %p16936_p8 }
  0x1b   :  { %16944 = shalt.err (!%p16941_p10)
}
  0x1c   :  { %s16945_s1 = scalar_lea.vmem %s59_s20, 1024  ;;  %p16950_p12 = scmp.lt.s32.totalorder %s59_s20, %s59_s20 }
  0x1d   :  { %p16946_p11 = scmp.ne.s32.totalorder %s59_s20, %s16945_s1  ;;  %p16951_p13 = scmp.lt.s32.totalorder %s16945_s1, %s16945_s1 }
  0x1f   :  { %p16952_p0 = por %p16951_p13, %p16950_p12 }
  0x21   :  { %p16953_p1 = pnand %p16952_p0, %p16946_p11 }
  0x23   :  { %16956 = shalt.err (!%p16953_p1)
}
  0x24   :  { %64 = dma.hbm_to_vmem [thread:$0]  %s18859_s4, 1024, %s59_s20, [#allocation9], %s17054_s15, %s17054_s15, %s17055_s16  }
  0x25   :  { %s16957_s12 = scalar_lea.hbm %s18855_s0, 128 }
  0x26   :  { %p16958_p2 = scmp.ne.s32.totalorder %s18855_s0, %s16957_s12  ;;  %p16961_p3 = scmp.lt.u32.totalorder %s16957_s12, %s18855_s0 }
  0x28   :  { %p16963_p4 = pnand %p16961_p3, %p16958_p2 }
  0x2a   :  { %16966 = shalt.err (!%p16963_p4)
}
  0x2b   :  { %s16967_s19 = scalar_lea.vmem %s24_s22, 128  ;;  %p16972_p6 = scmp.lt.s32.totalorder %s24_s22, %s24_s22 }
  0x2c   :  { %p16968_p5 = scmp.ne.s32.totalorder %s24_s22, %s16967_s19  ;;  %p16973_p7 = scmp.lt.s32.totalorder %s16967_s19, %s16967_s19 }
  0x2e   :  { %p16974_p8 = por %p16973_p7, %p16972_p6 }
  0x30   :  { %p16975_p9 = pnand %p16974_p8, %p16968_p5 }
  0x32   :  { %16978 = shalt.err (!%p16975_p9)
}
  0x33   :  { %26 = dma.hbm_to_vmem [thread:$0]  %s18855_s0, 128, %s24_s22, [#allocation3]  }
  0x34   :  { %s17058_s21 = smov [#allocation7]   ;;  %s17059_s24 = smov [#allocation10]  }
  0x35   :  { %s44_s23 = sshll.u32 %s17058_s21, 4  ;;  %s72_s25 = sshll.u32 %s17059_s24, 4  ;;  %s45_s23 = int_to_ptr.vmem [resolvable:$true] %s44_s23  ;;  %s73_s25 = int_to_ptr.vmem [resolvable:$true] %s72_s25 }
  0x36   :  { %s16979_s29 = scalar_lea.hbm %s18857_s2, 256 }
  0x37   :  { %p16980_p10 = scmp.ne.s32.totalorder %s18857_s2, %s16979_s29  ;;  %p16983_p11 = scmp.lt.u32.totalorder %s16979_s29, %s18857_s2 }
  0x39   :  { %p16985_p12 = pnand %p16983_p11, %p16980_p10 }
  0x3b   :  { %16988 = shalt.err (!%p16985_p12)
}
  0x3c   :  { %s16989_s0 = scalar_lea.vmem %s45_s23, 256  ;;  %p16994_p0 = scmp.lt.s32.totalorder %s45_s23, %s45_s23 }
  0x3d   :  { %p16990_p13 = scmp.ne.s32.totalorder %s45_s23, %s16989_s0  ;;  %p16995_p1 = scmp.lt.s32.totalorder %s16989_s0, %s16989_s0 }
  0x3f   :  { %p16996_p2 = por %p16995_p1, %p16994_p0 }
  0x41   :  { %p16997_p3 = pnand %p16996_p2, %p16990_p13 }
  0x43   :  { %17000 = shalt.err (!%p16997_p3)
}
  0x44   :  { %50 = dma.hbm_to_vmem [thread:$0]  %s18857_s2, 256, %s45_s23, [#allocation6], %s17054_s15, %s17054_s15, %s17055_s16  }
  0x45   :  { %s17001_s13 = scalar_lea.hbm %s18861_s6, 512 }
  0x46   :  { %p17002_p4 = scmp.ne.s32.totalorder %s18861_s6, %s17001_s13  ;;  %p17005_p5 = scmp.lt.u32.totalorder %s17001_s13, %s18861_s6 }
  0x48   :  { %p17007_p6 = pnand %p17005_p5, %p17002_p4 }
  0x4a   :  { %17010 = shalt.err (!%p17007_p6)
}
  0x4b   :  { %s17011_s4 = scalar_lea.vmem %s73_s25, 512  ;;  %p17016_p8 = scmp.lt.s32.totalorder %s73_s25, %s73_s25 }
  0x4c   :  { %p17012_p7 = scmp.ne.s32.totalorder %s73_s25, %s17011_s4  ;;  %p17017_p9 = scmp.lt.s32.totalorder %s17011_s4, %s17011_s4 }
  0x4e   :  { %p17018_p10 = por %p17017_p9, %p17016_p8 }
  0x50   :  { %p17019_p11 = pnand %p17018_p10, %p17012_p7 }
  0x52   :  { %17022 = shalt.err (!%p17019_p11)
}
  0x53   :  { %78 = dma.hbm_to_vmem [thread:$0]  %s18861_s6, 512, %s73_s25, [#allocation9], %s17054_s15, %s17054_s15, %s17055_s16  }
  0x54   :  { %17045 = dma.done.wait [#allocation3], 128  }
  0x55   :  { %17046 = vsyncadd [#allocation3], 4294967168 }
  0x56   :  { %17047 = dma.done.wait [#allocation6], 1280  }
  0x57   :  { %17048 = vsyncadd [#allocation6], 4294966016 }
  0x58   :  { %17049 = dma.done.wait [#allocation9], 1536  }
  0x59   :  { %17050 = vsyncadd [#allocation9], 4294965760  ;;  %v17060_v0 = vmov 0.0|0.0   ;;  %vm17061_vm0 = vmmov 0   ;;  %v18864_v1 = vmov 0.0   ;;  %vm126_vm1 = vcmask 130048  }
  0x5a   :  { %15293 = vmatprep.subr.bf16.mxu1 %v17060_v0  ;;  %13197 = vmatprep.mubr.msk.f32.mxu1 %vm17061_vm0, %v18864_v1  ;;  %v117_v2 = vld [vmem:[#allocation7] sm:$0xff]  ;;  %v118_v3 = vld [vmem:[#allocation7 + $0x8] sm:$0xff]  ;;  %v116_v4 = vld [vmem:[#allocation2] sm:$0xff]  ;;  %v603_v60 = vlaneseq  ;;  %vm608_vm3 = vcmask 261120   ;;  %vm610_vm4 = vcmask 523264   ;;  %s17063_s16 = smov 32  }
  0x5b   :  { %15296 = vmatprep.subr.bf16.mxu0 %v17060_v0  ;;  %13204 = vmatprep.mubr.msk.f32.mxu0 %vm17061_vm0, %v18864_v1  ;;  %v131_v5 = vand.u32 4294901760, %v117_v2  ;;  %v134_v6 = vand.u32 4294901760, %v118_v3  ;;  %v128_v7 = vsel %vm126_vm1, %v116_v4, 0  ;;  %v17190_v8 = vld [vmem:[#allocation5] sm:$0xff]  ;;  %v17192_v9 = vld [vmem:[#allocation5 + $0x8] sm:$0xff]  ;;  %v17194_v10 = vld [vmem:[#allocation5 + $0x10] sm:$0xff] }
  0x5c   :  { %v17196_v11 = vand.u32 4294901760, %v128_v7  ;;  %v615_v12 = vand.u32 4294901760, %v17190_v8  ;;  %v618_v13 = vand.u32 4294901760, %v17192_v9  ;;  %v17200_v14 = vld [vmem:[#allocation5 + $0x18] sm:$0xff]  ;;  %v621_v15 = vand.u32 4294901760, %v17194_v10  ;;  %v17240_v30 = vld [vmem:[#allocation5 + $0x20] sm:$0xff] }
  0x5d   :  { %v17203_v16 = vpack.c.bf16 %v134_v6, %v131_v5  ;;  %v17205_v17 = vsub.f32 %v117_v2, %v131_v5  ;;  %v17207_v18 = vsub.f32 %v118_v3, %v134_v6  ;;  %v624_v19 = vand.u32 4294901760, %v17200_v14  ;;  %v17259_v38 = vld [vmem:[#allocation5 + $0x28] sm:$0xff]  ;;  %v17265_v43 = vld [vmem:[#allocation5 + $0x30] sm:$0xff]  ;;  %v17267_v44 = vld [vmem:[#allocation5 + $0x38] sm:$0xff]  ;;  %s17065_s21 = smov 96  }
  0x5e   :  { %v17211_v20 = vsub.f32 %v128_v7, %v17196_v11  ;;  %v17216_v21 = vsub.f32 %v17190_v8, %v615_v12  ;;  %v17221_v22 = vsub.f32 %v17192_v9, %v618_v13  ;;  %v17229_v25 = vsub.f32 %v17194_v10, %v621_v15 }
  0x5f   :  { %15295 = vmatpush3.bf16.msra.mxu1 %v17203_v16  ;;  %v210_v23 = vand.u32 4294901760, %v17205_v17  ;;  %v217_v24 = vand.u32 4294901760, %v17207_v18  ;;  %v17238_v29 = vsub.f32 %v17200_v14, %v624_v19  ;;  %v627_v42 = vand.u32 4294901760, %v17240_v30 }
  0x60   :  { %v199_v26 = vand.u32 4294901760, %v17211_v20  ;;  %15323 = vmatprep.subr.bf16.mxu1 %v17060_v0  ;;  %v700_v27 = vand.u32 4294901760, %v17216_v21  ;;  %v707_v28 = vand.u32 4294901760, %v17221_v22  ;;  %v714_v33 = vand.u32 4294901760, %v17229_v25 }
  0x61   :  { %v211_v31 = vsub.f32 %v17205_v17, %v210_v23  ;;  %v218_v32 = vsub.f32 %v17207_v18, %v217_v24  ;;  %v721_v37 = vand.u32 4294901760, %v17238_v29  ;;  %v630_v51 = vand.u32 4294901760, %v17259_v38 }
  0x62   :  { %v200_v34 = vsub.f32 %v17211_v20, %v199_v26  ;;  %v701_v35 = vsub.f32 %v17216_v21, %v700_v27  ;;  %v708_v36 = vsub.f32 %v17221_v22, %v707_v28  ;;  %v715_v41 = vsub.f32 %v17229_v25, %v714_v33 }
  0x63   :  { %v212_v39 = vand.u32 4294901760, %v211_v31  ;;  %v219_v40 = vand.u32 4294901760, %v218_v32  ;;  %v722_v48 = vsub.f32 %v17238_v29, %v721_v37  ;;  %v17276_v52 = vsub.f32 %v17240_v30, %v627_v42 }
  0x64   :  { %v201_v45 = vand.u32 4294901760, %v200_v34  ;;  %v702_v46 = vand.u32 4294901760, %v701_v35  ;;  %v709_v47 = vand.u32 4294901760, %v708_v36  ;;  %v716_v50 = vand.u32 4294901760, %v715_v41 }
  0x65   :  { %v15297_v49 = vpack.c.bf16 %v219_v40, %v212_v39  ;;  %v723_v54 = vand.u32 4294901760, %v722_v48  ;;  %v633_v55 = vand.u32 4294901760, %v17265_v43  ;;  %v636_v56 = vand.u32 4294901760, %v17267_v44 }
  0x66   :  { %13198 = vmatmul.mubr.f32.vlgmr.msra.gmra.mrb[0].mxu1 %v201_v45  ;;  %v17278_v53 = vpack.c.bf16 %v709_v47, %v702_v46  ;;  %v15300_v57 = vpack.c.bf16 %v17207_v18, %v17205_v17  ;;  %v728_v58 = vand.u32 4294901760, %v17276_v52  ;;  %v17288_v59 = vsub.f32 %v17259_v38, %v630_v51 }
  0x67   :  { %15298 = vmatpush3.bf16.msra.mxu0 %v15297_v49  ;;  %13270 = vmatprep.mubr.msk.f32.mxu1 %vm17061_vm0, %v18864_v1  ;;  %v17293_v61 = vpack.c.bf16 %v723_v54, %v716_v50  ;;  %v17299_v62 = vsub.f32 %v17265_v43, %v633_v55  ;;  %v17309_v3 = vsub.f32 %v17267_v44, %v636_v56  ;;  %v17319_v31 = vand.u32 127, %v603_v60 }
  0x68   :  { %15325 = vmatpush3.bf16.msra.mxu1 %v17278_v53  ;;  %15299 = vmatprep.subr.bf16.mxu0 %v17060_v0  ;;  %v729_v63 = vsub.f32 %v17276_v52, %v728_v58  ;;  %v735_v2 = vand.u32 4294901760, %v17288_v59  ;;  %v17351_v47 = vpack.c.bf16 %v17221_v22, %v17216_v21  ;;  %v15306_v48 = vpack.c.bf16 %v217_v24, %v210_v23 }
  0x69   :  { %15326 = vmatprep.subr.bf16.mxu1 %v17060_v0  ;;  %v742_v4 = vand.u32 4294901760, %v17299_v62  ;;  %v749_v7 = vand.u32 4294901760, %v17309_v3  ;;  %vm605_vm2 = vcmp.eq.s32.totalorder %v17319_v31, 1  ;;  %v17363_v49 = vpack.c.bf16 %v17238_v29, %v17229_v25  ;;  %v12182_v25 = vld [vmem:[%s18858_s3] ss:$0 sm:$0xff]  ;;  %s17064_s3 = smov 64  }
  0x6a   :  { %13205 = vmatmul.mubr.f32.vlgmr.msra.gmra.mrb[0].mxu0 %v17196_v11  ;;  %v730_v5 = vand.u32 4294901760, %v729_v63  ;;  %v736_v6 = vsub.f32 %v17288_v59, %v735_v2  ;;  %v12185_v45 = vsel %vm605_vm2, 1.0, %v18864_v1  ;;  %v17376_v17 = vpack.c.bf16 %v17288_v59, %v17276_v52  ;;  %v17499_v63 = vld [vmem:[#allocation8] sm:$0xff] }
  0x6b   :  { %15301 = vmatpush3.bf16.msra.mxu0 %v15300_v57  ;;  %13211 = vmatprep.mubr.msk.f32.mxu0 %vm17061_vm0, %v18864_v1  ;;  %v743_v32 = vsub.f32 %v17299_v62, %v742_v4  ;;  %v750_v35 = vsub.f32 %v17309_v3, %v749_v7  ;;  %v17347_v46 = vsel %vm608_vm3, %v12185_v45, 0.0  ;;  %v17382_v18 = vpack.c.bf16 %v17309_v3, %v17299_v62  ;;  %v109_v45 = vld [vmem:[#allocation8 + $0x28] sm:$0xff] }
  0x6c   :  { %15328 = vmatpush3.bf16.msra.mxu1 %v17293_v61  ;;  %15302 = vmatprep.subr.bf16.mxu0 %v17060_v0  ;;  %v737_v34 = vand.u32 4294901760, %v736_v6  ;;  %v17396_v24 = vpack.c.bf16 %v618_v13, %v615_v12  ;;  %v17419_v8 = vpack.c.bf16 %v630_v51, %v627_v42  ;;  %v17429_v10 = vpack.c.bf16 %v636_v56, %v633_v55 }
  0x6d   :  { %15329 = vmatprep.subr.bf16.mxu1 %v17060_v0  ;;  %v744_v36 = vand.u32 4294901760, %v743_v32  ;;  %v751_v40 = vand.u32 4294901760, %v750_v35  ;;  %v17440_v12 = vpack.c.bf16 %v707_v28, %v700_v27  ;;  %v17450_v14 = vpack.c.bf16 %v721_v37, %v714_v33  ;;  %v107_v32 = vld [vmem:[#allocation8 + $0x18] sm:$0xff] }
  0x6e   :  { %v17330_v39 = vpack.c.bf16 %v737_v34, %v730_v5  ;;  %v1185_v3 = vand.u32 4294901760, %v17499_v63  ;;  %v1194_v35 = vand.u32 4294901760, %v107_v32  ;;  %vm3906_vm10 = vcmp.eq.s32.totalorder %v17319_v31, 2 }
  0x6f   :  { %v17334_v41 = vpack.c.bf16 %v751_v40, %v744_v36  ;;  %v108_v40 = vld [vmem:[#allocation8 + $0x20] sm:$0xff]  ;;  %vm5557_vm14 = vcmp.eq.s32.totalorder %v17319_v31, 3 }
  0x70   :  { %15331 = vmatpush3.bf16.msra.mxu1 %v17330_v39 }
  0x71   :  { %15332 = vmatprep.subr.bf16.mxu1 %v17060_v0 }
  0x72   :  { %13212 = vmatmul.mubr.f32.vlgmr.msra.gmra.mrb[0].mxu0 %v17211_v20  ;;  %v612_v20 = vsel %vm610_vm4, %v17347_v46, 0 }
  0x73   :  { %15304 = vmatpush3.bf16.msra.mxu0 %v17203_v16  ;;  %13218 = vmatprep.mubr.msk.f32.mxu0 %vm17061_vm0, %v18864_v1  ;;  %v688_v23 = vsub.f32 %v612_v20, %v612_v20 }
  0x74   :  { %15305 = vmatprep.subr.bf16.mxu0 %v17060_v0  ;;  %15334 = vmatpush3.bf16.msra.mxu1 %v17334_v41 }
  0x75   :  { %15335 = vmatprep.subr.bf16.mxu1 %v17060_v0  ;;  %v689_v9 = vand.u32 4294901760, %v688_v23 }
  0x77   :  { %13271 = vmatmul.mubr.msk.f32.vlgmr.msra.gmra.mrb[2].mxu1 %vm610_vm4, %v17347_v46 }
  0x78   :  { %15337 = vmatpush3.bf16.msra.mxu1 %v17351_v47  ;;  %13289 = vmatprep.mubr.msk.f32.mxu1 %vm17061_vm0, %v18864_v1 }
  0x79   :  { %15338 = vmatprep.subr.bf16.mxu1 %v17060_v0 }
  0x7a   :  { %13219 = vmatmul.mubr.f32.vlgmr.msra.gmra.mrb[0].mxu0 %v199_v26 }
  0x7b   :  { %15307 = vmatpush3.bf16.msra.mxu0 %v15306_v48  ;;  %13225 = vmatprep.mubr.msk.f32.mxu0 %vm17061_vm0, %v18864_v1  ;;  %v1200_v48 = vand.u32 4294901760, %v109_v45 }
  0x7c   :  { %15308 = vmatprep.subr.bf16.mxu0 %v17060_v0  ;;  %15340 = vmatpush3.bf16.msra.mxu1 %v17363_v49 }
  0x7d   :  { %15341 = vmatprep.subr.bf16.mxu1 %v17060_v0 }
  0x80   :  { %15343 = vmatpush3.bf16.msra.mxu1 %v17376_v17 }
  0x81   :  { %15344 = vmatprep.subr.bf16.mxu1 %v17060_v0 }
  0x82   :  { %13226 = vmatmul.mubr.f32.vlgmr.msra.gmra.mrb[0].mxu0 %v17196_v11 }
  0x83   :  { %15310 = vmatpush3.bf16.msra.mxu0 %v17203_v16  ;;  %13232 = vmatprep.mubr.msk.f32.mxu0 %vm17061_vm0, %v18864_v1  ;;  %v17404_v16 = vpack.c.bf16 %v624_v19, %v621_v15  ;;  %v17462_v15 = vpack.c.bf16 %v735_v2, %v728_v58  ;;  %v17470_v19 = vpack.c.bf16 %v749_v7, %v742_v4  ;;  %v17501_v2 = vld [vmem:[#allocation8 + $0x8] sm:$0xff]  ;;  %v106_v7 = vld [vmem:[#allocation8 + $0x10] sm:$0xff] }
  0x84   :  { %15311 = vmatprep.subr.bf16.mxu0 %v17060_v0  ;;  %15346 = vmatpush3.bf16.msra.mxu1 %v17382_v18  ;;  %v1188_v4 = vand.u32 4294901760, %v17501_v2  ;;  %v1191_v34 = vand.u32 4294901760, %v106_v7 }
  0x85   :  { %15347 = vmatprep.subr.bf16.mxu1 %v17060_v0 }
  0x86   :  { %v17509_v5 = vpack.c.bf16 %v1188_v4, %v1185_v3  ;;  %v17514_v36 = vpack.c.bf16 %v1194_v35, %v1191_v34 }
  0x87   :  { %13290 = vmatmul.mubr.f32.vlgmr.msra.gmra.mrb[2].mxu1 %v688_v23 }
  0x88   :  { %15349 = vmatpush3.bf16.msra.mxu1 %v17396_v24  ;;  %13308 = vmatprep.mubr.msk.f32.mxu1 %vm17061_vm0, %v18864_v1 }
  0x89   :  { %15350 = vmatprep.subr.bf16.mxu1 %v17060_v0 }
  0x8a   :  { %13233 = vmatmul.mubr.f32.vlgmr.msra.gmra.mrb[0].mxu0 %v17196_v11  ;;  %v690_v11 = vsub.f32 %v688_v23, %v689_v9  ;;  %v110_v23 = vld [vmem:[#allocation8 + $0x30] sm:$0xff] }
  0x8b   :  { %15313 = vmatpush3.bf16.msra.mxu0 %v17396_v24  ;;  %13251 = vmatprep.mubr.msk.f32.mxu0 %vm17061_vm0, %v18864_v1 }
  0x8c   :  { %15314 = vmatprep.subr.bf16.mxu0 %v17060_v0  ;;  %15352 = vmatpush3.bf16.msra.mxu1 %v17404_v16  ;;  %v691_v13 = vand.u32 4294901760, %v690_v11  ;;  %v1203_v11 = vand.u32 4294901760, %v110_v23 }
  0x8d   :  { %15353 = vmatprep.subr.bf16.mxu1 %v17060_v0 }
  0x8f   :  { %15316 = vmatpush3.bf16.msra.mxu0 %v17404_v16 }
  0x90   :  { %15317 = vmatprep.subr.bf16.mxu0 %v17060_v0  ;;  %15355 = vmatpush3.bf16.msra.mxu1 %v17419_v8 }
  0x91   :  { %15356 = vmatprep.subr.bf16.mxu1 %v17060_v0 }
  0x93   :  { %15319 = vmatpush3.bf16.msra.mxu0 %v17419_v8 }
  0x94   :  { %15320 = vmatprep.subr.bf16.mxu0 %v17060_v0  ;;  %15358 = vmatpush3.bf16.msra.mxu1 %v17429_v10 }
  0x95   :  { %15359 = vmatprep.subr.bf16.mxu1 %v17060_v0 }
  0x97   :  { %15322 = vmatpush3.bf16.msra.mxu0 %v17429_v10  ;;  %13309 = vmatmul.mubr.f32.vlgmr.msra.gmra.mrb[2].mxu1 %v689_v9  ;;  %v111_v9 = vld [vmem:[#allocation8 + $0x38] sm:$0xff] }
  0x98   :  { %15383 = vmatprep.subr.bf16.mxu0 %v17060_v0  ;;  %15361 = vmatpush3.bf16.msra.mxu1 %v17440_v12 }
  0x99   :  { %13327 = vmatprep.mubr.msk.f32.mxu1 %vm17061_vm0, %v18864_v1  ;;  %15362 = vmatprep.subr.bf16.mxu1 %v17060_v0 }
  0x9a   :  { %13252 = vmatmul.mubr.f32.vlgmr.msra.gmra.mrb[2].mxu0 %v691_v13  ;;  %v1206_v13 = vand.u32 4294901760, %v111_v9 }
  0x9b   :  { %13365 = vmatprep.mubr.msk.f32.mxu0 %vm17061_vm0, %v18864_v1  ;;  %15385 = vmatpush3.bf16.msra.mxu0 %v17509_v5 }
  0x9c   :  { %15364 = vmatpush3.bf16.msra.mxu1 %v17450_v14  ;;  %15386 = vmatprep.subr.bf16.mxu0 %v17060_v0 }
  0x9d   :  { %15365 = vmatprep.subr.bf16.mxu1 %v17060_v0 }
  0x9f   :  { %15388 = vmatpush3.bf16.msra.mxu0 %v17514_v36 }
  0xa0   :  { %15367 = vmatpush3.bf16.msra.mxu1 %v17462_v15  ;;  %15389 = vmatprep.subr.bf16.mxu0 %v17060_v0 }
  0xa1   :  { %15368 = vmatprep.subr.bf16.mxu1 %v17060_v0 }
  0xa4   :  { %15370 = vmatpush3.bf16.msra.mxu1 %v17470_v19 }
  0xa5   :  { %15371 = vmatprep.subr.bf16.mxu1 %v17060_v0 }
  0xa7   :  { %13328 = vmatmul.mubr.msk.f32.vlgmr.msra.gmra.mrb[2].mxu1 %vm610_vm4, %v17347_v46 }
  0xa8   :  { %15373 = vmatpush3.bf16.msra.mxu1 %v17396_v24  ;;  %13346 = vmatprep.mubr.msk.f32.mxu1 %vm17061_vm0, %v18864_v1 }
  0xa9   :  { %15374 = vmatprep.subr.bf16.mxu1 %v17060_v0 }
  0xac   :  { %15376 = vmatpush3.bf16.msra.mxu1 %v17404_v16 }
  0xad   :  { %15377 = vmatprep.subr.bf16.mxu1 %v17060_v0 }
  0xb0   :  { %15379 = vmatpush3.bf16.msra.mxu1 %v17419_v8 }
  0xb1   :  { %15380 = vmatprep.subr.bf16.mxu1 %v17060_v0 }
  0xb4   :  { %15382 = vmatpush3.bf16.msra.mxu1 %v17429_v10 }
  0xb5   :  { %15455 = vmatprep.subr.bf16.mxu1 %v17060_v0 }
  0xb7   :  { %13347 = vmatmul.mubr.msk.f32.vlgmr.msra.gmra.mrb[2].mxu1 %vm610_vm4, %v17347_v46  ;;  %v1197_v46 = vand.u32 4294901760, %v108_v40 }
  0xb8   :  { %13471 = vmatprep.mubr.msk.f32.mxu1 %vm17061_vm0, %v18864_v1 }
  0xb9   :  { %v17518_v20 = vpack.c.bf16 %v1200_v48, %v1197_v46 }
  0xbb   :  { %15391 = vmatpush3.bf16.msra.mxu0 %v17518_v20 }
  0xbc   :  { %15392 = vmatprep.subr.bf16.mxu0 %v17060_v0 }
 0x139   :  { %v203_v21 = vpop.f32.mrb[0].mxu1 }
 0x13a   :  { %v13199_v22 = vpop.f32.mrb[1].mxu1  ;;  %v204_v26 = vadd.f32 %v12182_v25, %v203_v21  ;;  %v17522_v21 = vpack.c.bf16 %v1206_v13, %v1203_v11  ;;  %v1283_v25 = vsub.f32 %v106_v7, %v1191_v34 }
 0x13c   :  { %v285_v27 = vadd.f32 nan, %v204_v26  ;;  %v1290_v26 = vsub.f32 %v107_v32, %v1194_v35  ;;  %15394 = vmatpush3.bf16.msra.mxu0 %v17522_v21 }
 0x13d   :  { %15395 = vmatprep.subr.bf16.mxu0 %v17060_v0 }
 0x13e   :  { %v361_v28 = vadd.f32 nan, %v285_v27 }
 0x140   :  { %v436_v29 = vadd.f32 nan, %v361_v28 }
 0x142   :  { %v513_v30 = vadd.f32 nan, %v436_v29 }
 0x15d   :  { %v585_v33 = vpop.f32.mrb[0].mxu0 }
 0x15e   :  { %v17494_v37 = vadd.f32 %v585_v33, %v513_v30  ;;  %v13234_v38 = vpop.f32.mrb[1].mxu0  ;;  %v1284_v30 = vand.u32 4294901760, %v1283_v25  ;;  %v1291_v33 = vand.u32 4294901760, %v1290_v26 }
 0x16d   :  { %v693_v42 = vpop.f32.mrb[2].mxu0 }
 0x16e   :  { %v13253_v43 = vpop.f32.mrb[3].mxu0  ;;  %v16573_v44 = vadd.f32 %v693_v42, %v17494_v37  ;;  %v1285_v42 = vsub.f32 %v1283_v25, %v1284_v30 }
 0x16f   :  { %v1292_v43 = vsub.f32 %v1290_v26, %v1291_v33 }
 0x18a   :  { %v1147_v50 = vpop.f32.mrb[2].mxu1 }
 0x18b   :  { %v16574_v51 = vadd.f32 %v16573_v44, %v1147_v50  ;;  %v13348_v52 = vpop.f32.mrb[3].mxu1  ;;  %v1297_v44 = vsub.f32 %v108_v40, %v1197_v46  ;;  %v1304_v50 = vsub.f32 %v109_v45, %v1200_v48 }
 0x18c   :  { %v1293_v52 = vand.u32 4294901760, %v1292_v43 }
 0x18d   :  { %1158 = vrot.lane.b32.xlu0 %v16574_v51, %s17063_s16  ;;  %v12189_v54 = vmul.f32 -1.442695, %v16574_v51 }
 0x18f   :  { %16825 = vpow2.f32 %v12189_v54  ;;  %v1298_v54 = vand.u32 4294901760, %v1297_v44 }
 0x199   :  { %v16826_v55 = vpop.eup %16825 }
 0x19a   :  { %v1154_v56 = vadd.f32 1.0, %v16826_v55  ;;  %v1305_v55 = vand.u32 4294901760, %v1304_v50 }
 0x19c   :  { %16827 = vrcp.f32 %v1154_v56 }
 0x1a6   :  { %v16828_v57 = vpop.eup %16827 }
 0x1a7   :  { %v1168_v22 = vsub.f32 1.0, %v16828_v57  ;;  %v1174_v28 = vmul.f32 0.0, %v16828_v57 }
 0x1ff   :  { %v1159_v58 = vpop.permute.xlu0 %1158 }
 0x200   :  { %v1161_v59 = vmul.f32 %v16828_v57, %v1159_v58  ;;  %v1299_v57 = vsub.f32 %v1297_v44, %v1298_v54  ;;  %v1311_v58 = vsub.f32 %v110_v23, %v1203_v11  ;;  %v17542_v23 = vpack.c.bf16 %v1291_v33, %v1284_v30 }
 0x202   :  { %1163 = vrot.lane.b32.xlu0 %v1161_v59, %s17064_s3  ;;  %v1318_v59 = vsub.f32 %v111_v9, %v1206_v13  ;;  %v17544_v9 = vpack.c.bf16 %v1305_v55, %v1298_v54  ;;  %v1269_v13 = vsub.f32 %v17499_v63, %v1185_v3 }
 0x204   :  { %v1319_v7 = vand.u32 4294901760, %v1318_v59 }
 0x206   :  { %v1320_v35 = vsub.f32 %v1318_v59, %v1319_v7 }
 0x208   :  { %v1321_v46 = vand.u32 4294901760, %v1320_v35 }
 0x274   :  { %v1164_v60 = vpop.permute.xlu0 %1163 }
 0x275   :  { %v1166_v62 = vadd.f32 %v16574_v51, %v1164_v60  ;;  %v1286_v51 = vand.u32 4294901760, %v1285_v42  ;;  %v1306_v60 = vsub.f32 %v1304_v50, %v1305_v55 }
 0x277   :  { %16829 = vtanh.f32 %v1166_v62  ;;  %v17530_v56 = vpack.c.bf16 %v1293_v52, %v1286_v51  ;;  %v1300_v62 = vand.u32 4294901760, %v1299_v57  ;;  %v1307_v32 = vand.u32 4294901760, %v1306_v60 }
 0x279   :  { %v17532_v40 = vpack.c.bf16 %v1307_v32, %v1300_v62 }
 0x281   :  { %v16830_v6 = vpop.eup %16829 }
 0x282   :  { %1170 = vrot.lane.b32.xlu1 %v16830_v6, %s17065_s21  ;;  %v1312_v6 = vand.u32 4294901760, %v1311_v58 }
 0x284   :  { %v1313_v34 = vsub.f32 %v1311_v58, %v1312_v6  ;;  %v17546_v11 = vpack.c.bf16 %v1319_v7, %v1312_v6 }
 0x286   :  { %v1314_v45 = vand.u32 4294901760, %v1313_v34 }
 0x288   :  { %v17534_v48 = vpack.c.bf16 %v1321_v46, %v1314_v45 }
 0x2f4   :  { %v1171_v27 = vpop.permute.xlu1 %1170 }
 0x2f5   :  { %v1173_v29 = vmul.f32 %v1171_v27, %v1168_v22  ;;  %v17536_v22 = vpack.c.bf16 %v1290_v26, %v1283_v25  ;;  %v17538_v27 = vpack.c.bf16 %v1304_v50, %v1297_v44  ;;  %v1270_v25 = vand.u32 4294901760, %v1269_v13 }
 0x2f7   :  { %v17526_v38 = vadd.f32 %v1174_v28, %v1173_v29  ;;  %v17540_v28 = vpack.c.bf16 %v1318_v59, %v1311_v58  ;;  %v1276_v29 = vsub.f32 %v17501_v2, %v1188_v4  ;;  %v1271_v33 = vsub.f32 %v1269_v13, %v1270_v25  ;;  %v17625_v58 = vld [vmem:[%s18860_s5] ss:$0 sm:$0xff] }
 0x2f9   :  { %1177 = vrot.lane.b32.xlu1 %v17526_v38, %s17065_s21  ;;  %v1277_v26 = vand.u32 4294901760, %v1276_v29  ;;  %v1272_v52 = vand.u32 4294901760, %v1271_v33  ;;  %v17567_v2 = vpack.c.bf16 %v1276_v29, %v1269_v13 }
 0x2fb   :  { %v1278_v44 = vsub.f32 %v1276_v29, %v1277_v26  ;;  %v17589_v4 = vpack.c.bf16 %v1277_v26, %v1270_v25  ;;  %v112_v25 = vld [vmem:[#allocation10] sm:$0xff]  ;;  %v113_v26 = vld [vmem:[#allocation10 + $0x8] sm:$0xff] }
 0x2fd   :  { %v1279_v54 = vand.u32 4294901760, %v1278_v44 }
 0x2ff   :  { %v17556_v63 = vpack.c.bf16 %v1279_v54, %v1272_v52 }
 0x36b   :  { %v1178_v42 = vpop.permute.xlu1 %1177 }
 0x36c   :  { %v1180_v43 = vsel %vm608_vm3, %v1178_v42, 0.0  ;;  %v1752_v42 = vand.u32 4294901760, %v112_v25 }
 0x36d   :  { %v1182_v30 = vsel %vm610_vm4, %v1180_v43, 0  ;;  %v1755_v43 = vand.u32 4294901760, %v113_v26 }
 0x36e   :  { %v1257_v50 = vand.u32 4294901760, %v1182_v30  ;;  %v1832_v33 = vsub.f32 %v112_v25, %v1752_v42 }
 0x36f   :  { %v1839_v44 = vsub.f32 %v113_v26, %v1755_v43 }
 0x370   :  { %v1258_v51 = vsub.f32 %v1182_v30, %v1257_v50  ;;  %v17631_v30 = vpack.c.bf16 %v1755_v43, %v1752_v42 }
 0x372   :  { %v1259_v55 = vand.u32 4294901760, %v1258_v51  ;;  %15457 = vmatpush3.bf16.msra.mxu1 %v17631_v30 }
 0x373   :  { %15458 = vmatprep.subr.bf16.mxu1 %v17060_v0 }
 0x374   :  { %v1260_v57 = vsub.f32 %v1258_v51, %v1259_v55 }
 0x376   :  { %v1261_v3 = vand.u32 4294901760, %v1260_v57  ;;  %v1840_v57 = vand.u32 4294901760, %v1839_v44 }
 0x378   :  { %13366 = vmatmul.mubr.f32.vlgmr.msra.gmra.mrb[4].mxu0 %v1261_v3 }
 0x379   :  { %15397 = vmatpush3.bf16.msra.mxu0 %v17556_v63  ;;  %13384 = vmatprep.mubr.msk.f32.mxu0 %vm17061_vm0, %v18864_v1 }
 0x37a   :  { %15398 = vmatprep.subr.bf16.mxu0 %v17060_v0 }
 0x37d   :  { %15400 = vmatpush3.bf16.msra.mxu0 %v17530_v56 }
 0x37e   :  { %15401 = vmatprep.subr.bf16.mxu0 %v17060_v0 }
 0x381   :  { %15403 = vmatpush3.bf16.msra.mxu0 %v17532_v40 }
 0x382   :  { %15404 = vmatprep.subr.bf16.mxu0 %v17060_v0 }
 0x385   :  { %15406 = vmatpush3.bf16.msra.mxu0 %v17534_v48 }
 0x386   :  { %15407 = vmatprep.subr.bf16.mxu0 %v17060_v0 }
 0x388   :  { %13385 = vmatmul.mubr.f32.vlgmr.msra.gmra.mrb[4].mxu0 %v1257_v50 }
 0x389   :  { %15409 = vmatpush3.bf16.msra.mxu0 %v17567_v2  ;;  %13403 = vmatprep.mubr.msk.f32.mxu0 %vm17061_vm0, %v18864_v1 }
 0x38a   :  { %15410 = vmatprep.subr.bf16.mxu0 %v17060_v0 }
 0x38d   :  { %15412 = vmatpush3.bf16.msra.mxu0 %v17536_v22 }
 0x38e   :  { %15413 = vmatprep.subr.bf16.mxu0 %v17060_v0 }
 0x391   :  { %15415 = vmatpush3.bf16.msra.mxu0 %v17538_v27 }
 0x392   :  { %15416 = vmatprep.subr.bf16.mxu0 %v17060_v0 }
 0x395   :  { %15418 = vmatpush3.bf16.msra.mxu0 %v17540_v28 }
 0x396   :  { %15419 = vmatprep.subr.bf16.mxu0 %v17060_v0 }
 0x398   :  { %13404 = vmatmul.mubr.f32.vlgmr.msra.gmra.mrb[4].mxu0 %v1258_v51  ;;  %v115_v51 = vld [vmem:[#allocation10 + $0x18] sm:$0xff] }
 0x399   :  { %15421 = vmatpush3.bf16.msra.mxu0 %v17509_v5  ;;  %13422 = vmatprep.mubr.msk.f32.mxu0 %vm17061_vm0, %v18864_v1  ;;  %v1761_v54 = vand.u32 4294901760, %v115_v51 }
 0x39a   :  { %15422 = vmatprep.subr.bf16.mxu0 %v17060_v0 }
 0x39d   :  { %15424 = vmatpush3.bf16.msra.mxu0 %v17514_v36 }
 0x39e   :  { %15425 = vmatprep.subr.bf16.mxu0 %v17060_v0 }
 0x3a1   :  { %15427 = vmatpush3.bf16.msra.mxu0 %v17518_v20 }
 0x3a2   :  { %15428 = vmatprep.subr.bf16.mxu0 %v17060_v0 }
 0x3a5   :  { %15430 = vmatpush3.bf16.msra.mxu0 %v17522_v21 }
 0x3a6   :  { %15431 = vmatprep.subr.bf16.mxu0 %v17060_v0 }
 0x3a8   :  { %13423 = vmatmul.mubr.f32.vlgmr.msra.gmra.mrb[4].mxu0 %v1259_v55  ;;  %v1833_v55 = vand.u32 4294901760, %v1832_v33 }
 0x3a9   :  { %15433 = vmatpush3.bf16.msra.mxu0 %v17589_v4  ;;  %13441 = vmatprep.mubr.msk.f32.mxu0 %vm17061_vm0, %v18864_v1 }
 0x3aa   :  { %15434 = vmatprep.subr.bf16.mxu0 %v17060_v0 }
 0x3ad   :  { %15436 = vmatpush3.bf16.msra.mxu0 %v17542_v23 }
 0x3ae   :  { %15437 = vmatprep.subr.bf16.mxu0 %v17060_v0 }
 0x3b1   :  { %15439 = vmatpush3.bf16.msra.mxu0 %v17544_v9 }
 0x3b2   :  { %15440 = vmatprep.subr.bf16.mxu0 %v17060_v0 }
 0x3b5   :  { %15442 = vmatpush3.bf16.msra.mxu0 %v17546_v11 }
 0x3b6   :  { %15443 = vmatprep.subr.bf16.mxu0 %v17060_v0 }
 0x3b8   :  { %13442 = vmatmul.mubr.f32.vlgmr.msra.gmra.mrb[4].mxu0 %v1257_v50 }
 0x3b9   :  { %15445 = vmatpush3.bf16.msra.mxu0 %v17509_v5  ;;  %13460 = vmatprep.mubr.msk.f32.mxu0 %vm17061_vm0, %v18864_v1 }
 0x3ba   :  { %15446 = vmatprep.subr.bf16.mxu0 %v17060_v0 }
 0x3bd   :  { %15448 = vmatpush3.bf16.msra.mxu0 %v17514_v36 }
 0x3be   :  { %15449 = vmatprep.subr.bf16.mxu0 %v17060_v0 }
 0x3c1   :  { %15451 = vmatpush3.bf16.msra.mxu0 %v17518_v20 }
 0x3c2   :  { %15452 = vmatprep.subr.bf16.mxu0 %v17060_v0 }
 0x3c5   :  { %15454 = vmatpush3.bf16.msra.mxu0 %v17522_v21 }
 0x3c6   :  { %15491 = vmatprep.subr.bf16.mxu0 %v17060_v0 }
 0x3c8   :  { %13461 = vmatmul.mubr.f32.vlgmr.msra.gmra.mrb[4].mxu0 %v1257_v50  ;;  %v114_v50 = vld [vmem:[#allocation10 + $0x10] sm:$0xff] }
 0x3c9   :  { %15493 = vmatpush3.bf16.msra.mxu0 %v17396_v24  ;;  %13545 = vmatprep.mubr.msk.f32.mxu0 %vm17061_vm0, %v18864_v1  ;;  %v1758_v52 = vand.u32 4294901760, %v114_v50 }
 0x3ca   :  { %15494 = vmatprep.subr.bf16.mxu0 %v17060_v0 }
 0x3cb   :  { %v17635_v3 = vpack.c.bf16 %v1761_v54, %v1758_v52 }
 0x3cd   :  { %15496 = vmatpush3.bf16.msra.mxu0 %v17404_v16  ;;  %15460 = vmatpush3.bf16.msra.mxu1 %v17635_v3 }
 0x3ce   :  { %15497 = vmatprep.subr.bf16.mxu0 %v17060_v0  ;;  %15461 = vmatprep.subr.bf16.mxu1 %v17060_v0 }
 0x3d1   :  { %15499 = vmatpush3.bf16.msra.mxu0 %v17419_v8 }
 0x3d2   :  { %15500 = vmatprep.subr.bf16.mxu0 %v17060_v0 }
 0x3d5   :  { %15502 = vmatpush3.bf16.msra.mxu0 %v17429_v10 }
 0x3d6   :  { %15503 = vmatprep.subr.bf16.mxu0 %v17060_v0 }
 0x49b   :  { %v1717_v59 = vpop.f32.mrb[4].mxu0 }
 0x49c   :  { %v16575_v60 = vadd.f32 %v17625_v58, %v1717_v59  ;;  %v13462_v62 = vpop.f32.mrb[5].mxu0  ;;  %v1834_v59 = vsub.f32 %v1832_v33, %v1833_v55 }
 0x49d   :  { %v1846_v62 = vsub.f32 %v114_v50, %v1758_v52 }
 0x49e   :  { %1728 = vrot.lane.b32.xlu0 %v16575_v60, %s17063_s16  ;;  %v12190_v6 = vmul.f32 -1.442695, %v16575_v60 }
 0x4a0   :  { %16831 = vpow2.f32 %v12190_v6 }
 0x4aa   :  { %v16832_v7 = vpop.eup %16831 }
 0x4ab   :  { %v1724_v32 = vadd.f32 1.0, %v16832_v7  ;;  %v1853_v7 = vsub.f32 %v115_v51, %v1761_v54  ;;  %v17647_v54 = vpack.c.bf16 %v1839_v44, %v1832_v33  ;;  %v17699_v33 = vld [vmem:[%s18862_s7] ss:$0 sm:$0xff] }
 0x4ad   :  { %16833 = vrcp.f32 %v1724_v32  ;;  %v1854_v25 = vand.u32 4294901760, %v1853_v7 }
 0x4af   :  { %v1855_v1 = vsub.f32 %v1853_v7, %v1854_v25 }
 0x4b1   :  { %v1856_v51 = vand.u32 4294901760, %v1855_v1  ;;  %v18866_v1 = vmov 0.0  }
 0x4b7   :  { %v16834_v34 = vpop.eup %16833 }
 0x4b8   :  { %v1738_v6 = vsub.f32 1.0, %v16834_v34 }
 0x510   :  { %v1729_v35 = vpop.permute.xlu0 %1728 }
 0x511   :  { %v1731_v45 = vmul.f32 %v16834_v34, %v1729_v35  ;;  %v1835_v35 = vand.u32 4294901760, %v1834_v59  ;;  %v17651_v59 = vpack.c.bf16 %v1840_v57, %v1833_v55 }
 0x513   :  { %1733 = vrot.lane.b32.xlu1 %v1731_v45, %s17064_s3 }
 0x585   :  { %v1734_v46 = vpop.permute.xlu1 %1733 }
 0x586   :  { %v1736_v13 = vadd.f32 %v16575_v60, %v1734_v46  ;;  %v1841_v60 = vsub.f32 %v1839_v44, %v1840_v57  ;;  %v1847_v46 = vand.u32 4294901760, %v1846_v62 }
 0x588   :  { %16835 = vtanh.f32 %v1736_v13  ;;  %v1842_v45 = vand.u32 4294901760, %v1841_v60  ;;  %v1744_v13 = vmul.f32 0.0, %v16834_v34  ;;  %v1848_v42 = vsub.f32 %v1846_v62, %v1847_v46 }
 0x589   :  { %v17649_v34 = vpack.c.bf16 %v1853_v7, %v1846_v62  ;;  %v17653_v60 = vpack.c.bf16 %v1854_v25, %v1847_v46 }
 0x58a   :  { %v17639_v26 = vpack.c.bf16 %v1842_v45, %v1835_v35  ;;  %v1849_v50 = vand.u32 4294901760, %v1848_v42 }
 0x58c   :  { %v17645_v52 = vpack.c.bf16 %v1856_v51, %v1849_v50 }
 0x592   :  { %v16836_v29 = vpop.eup %16835 }
 0x593   :  { %1740 = vrot.lane.b32.xlu0 %v16836_v29, %s17065_s21 }
 0x605   :  { %v1741_v32 = vpop.permute.xlu0 %1740 }
 0x606   :  { %v1743_v29 = vmul.f32 %v1741_v32, %v1738_v6 }
 0x608   :  { %v17641_v43 = vadd.f32 %v1744_v13, %v1743_v29 }
 0x60a   :  { %1747 = vrot.lane.b32.xlu1 %v17641_v43, %s17065_s21 }
 0x67c   :  { %v1748_v6 = vpop.permute.xlu1 %1747 }
 0x67d   :  { %v1749_v32 = vsel %vm608_vm3, %v1748_v6, 0 }
 0x67e   :  { %v1820_v35 = vand.u32 4294901760, %v1749_v32 }
 0x680   :  { %v1821_v45 = vsub.f32 %v1749_v32, %v1820_v35 }
 0x682   :  { %v1822_v13 = vand.u32 4294901760, %v1821_v45 }
 0x684   :  { %v1823_v29 = vsub.f32 %v1821_v45, %v1822_v13 }
 0x686   :  { %v1824_v42 = vand.u32 4294901760, %v1823_v29 }
 0x688   :  { %13472 = vmatmul.mubr.f32.vlgmr.msra.gmra.mrb[4].mxu1 %v1824_v42 }
 0x689   :  { %15463 = vmatpush3.bf16.msra.mxu1 %v17639_v26  ;;  %13482 = vmatprep.mubr.msk.f32.mxu1 %vm17061_vm0, %v18866_v1 }
 0x68a   :  { %15464 = vmatprep.subr.bf16.mxu1 %v17060_v0 }
 0x68d   :  { %15466 = vmatpush3.bf16.msra.mxu1 %v17645_v52 }
 0x68e   :  { %15467 = vmatprep.subr.bf16.mxu1 %v17060_v0 }
 0x690   :  { %13483 = vmatmul.mubr.f32.vlgmr.msra.gmra.mrb[4].mxu1 %v1820_v35 }
 0x691   :  { %15469 = vmatpush3.bf16.msra.mxu1 %v17647_v54  ;;  %13493 = vmatprep.mubr.msk.f32.mxu1 %vm17061_vm0, %v18866_v1 }
 0x692   :  { %15470 = vmatprep.subr.bf16.mxu1 %v17060_v0 }
 0x695   :  { %15472 = vmatpush3.bf16.msra.mxu1 %v17649_v34 }
 0x696   :  { %15473 = vmatprep.subr.bf16.mxu1 %v17060_v0 }
 0x698   :  { %13494 = vmatmul.mubr.f32.vlgmr.msra.gmra.mrb[4].mxu1 %v1821_v45 }
 0x699   :  { %15475 = vmatpush3.bf16.msra.mxu1 %v17631_v30  ;;  %13504 = vmatprep.mubr.msk.f32.mxu1 %vm17061_vm0, %v18866_v1 }
 0x69a   :  { %15476 = vmatprep.subr.bf16.mxu1 %v17060_v0 }
 0x69d   :  { %15478 = vmatpush3.bf16.msra.mxu1 %v17635_v3 }
 0x69e   :  { %15479 = vmatprep.subr.bf16.mxu1 %v17060_v0 }
 0x6a0   :  { %13505 = vmatmul.mubr.f32.vlgmr.msra.gmra.mrb[4].mxu1 %v1822_v13 }
 0x6a1   :  { %15481 = vmatpush3.bf16.msra.mxu1 %v17651_v59  ;;  %13515 = vmatprep.mubr.msk.f32.mxu1 %vm17061_vm0, %v18866_v1 }
 0x6a2   :  { %15482 = vmatprep.subr.bf16.mxu1 %v17060_v0 }
 0x6a5   :  { %15484 = vmatpush3.bf16.msra.mxu1 %v17653_v60 }
 0x6a6   :  { %15485 = vmatprep.subr.bf16.mxu1 %v17060_v0 }
 0x6a8   :  { %13516 = vmatmul.mubr.f32.vlgmr.msra.gmra.mrb[4].mxu1 %v1820_v35 }
 0x6a9   :  { %15487 = vmatpush3.bf16.msra.mxu1 %v17631_v30  ;;  %13526 = vmatprep.mubr.msk.f32.mxu1 %vm17061_vm0, %v18866_v1 }
 0x6aa   :  { %15488 = vmatprep.subr.bf16.mxu1 %v17060_v0 }
 0x6ad   :  { %15490 = vmatpush3.bf16.msra.mxu1 %v17635_v3 }
 0x6ae   :  { %15563 = vmatprep.subr.bf16.mxu1 %v17060_v0 }
 0x6b0   :  { %13527 = vmatmul.mubr.f32.vlgmr.msra.gmra.mrb[4].mxu1 %v1820_v35 }
 0x6b1   :  { %15565 = vmatpush3.bf16.msra.mxu1 %v17509_v5  ;;  %13659 = vmatprep.mubr.msk.f32.mxu1 %vm17061_vm0, %v18866_v1 }
 0x6b2   :  { %15566 = vmatprep.subr.bf16.mxu1 %v17060_v0 }
 0x6b5   :  { %15568 = vmatpush3.bf16.msra.mxu1 %v17514_v36 }
 0x6b6   :  { %15569 = vmatprep.subr.bf16.mxu1 %v17060_v0 }
 0x6b9   :  { %15571 = vmatpush3.bf16.msra.mxu1 %v17518_v20 }
 0x6ba   :  { %15572 = vmatprep.subr.bf16.mxu1 %v17060_v0 }
 0x6bd   :  { %15574 = vmatpush3.bf16.msra.mxu1 %v17522_v21 }
 0x6be   :  { %15575 = vmatprep.subr.bf16.mxu1 %v17060_v0 }
 0x783   :  { %v2232_v44 = vpop.f32.mrb[4].mxu1 }
 0x784   :  { %v16576_v55 = vadd.f32 %v17699_v33, %v2232_v44  ;;  %v13528_v57 = vpop.f32.mrb[5].mxu1 }
 0x786   :  { %v2236_v62 = vsel %vm608_vm3, %v16576_v55, -inf }
 0x787   :  { %2237 = vmax.xlane.f32.xlu0 %v2236_v62 }
 0x814   :  { %v2238_v7 = vpop.xlane.xlu0 %2237 }
 0x815   :  { %vm2239_vm5 = vcmp.eq.f32.partialorder %v16576_v55, %v2238_v7 }
 0x816   :  { %v2240_v46 = vsel %vm2239_vm5, %v17319_v31, 32  ;;  %vm7208_vm5 = vcmp.eq.s32.totalorder %v17319_v31, 4 }
 0x817   :  { %v2241_v25 = vsel %vm608_vm3, %v2240_v46, 2147483647 }
 0x818   :  { %v2243_v50 = vshra.s32 %v2241_v25, 16  ;;  %v2242_v6 = vand.u32 65535, %v2241_v25 }
 0x81a   :  { %v2245_v51 = vcvt.s32.f32 %v2243_v50  ;;  %v2244_v35 = vcvt.s32.f32 %v2242_v6 }
 0x81c   :  { %2246 = vmin.xlane.f32.xlu1 %v2245_v51 }
 0x8a9   :  { %v2247_v32 = vpop.xlane.xlu1 %2246 }
 0x8aa   :  { %vm2248_vm6 = vcmp.eq.f32.partialorder %v2245_v51, %v2247_v32  ;;  %v2253_v13 = vcvt.f32.s32 %v2247_v32 }
 0x8ab   :  { %v2249_v45 = vsel %vm2248_vm6, %v2244_v35, inf }
 0x8ac   :  { %2250 = vmin.xlane.f32.xlu0 %v2249_v45  ;;  %v2254_v42 = vshll.u32 %v2253_v13, 16 }
 0x939   :  { %v2251_v29 = vpop.xlane.xlu0 %2250 }
 0x93a   :  { %v2252_v44 = vcvt.f32.s32 %v2251_v29 }
 0x93c   :  { %v17705_v57 = vadd.s32 %v2254_v42, %v2252_v44 }
 0x93e   :  { %vm2257_vm7 = vcmp.eq.s32.totalorder %v17319_v31, %v17705_v57 }
 0x93f   :  { %v12191_v55 = vsel %vm2257_vm7, 1.0, %v18866_v1 }
 0x940   :  { %v2260_v62 = vsel %vm608_vm3, %v12191_v55, %v17526_v38 }
 0x941   :  { %v2262_v7 = vsel %vm610_vm4, %v2260_v62, 0 }
 0x942   :  { %v2337_v46 = vand.u32 4294901760, %v2262_v7 }
 0x944   :  { %v2338_v25 = vsub.f32 %v2262_v7, %v2337_v46 }
 0x946   :  { %v2339_v50 = vand.u32 4294901760, %v2338_v25 }
 0x948   :  { %v2340_v51 = vsub.f32 %v2338_v25, %v2339_v50 }
 0x94a   :  { %v2341_v6 = vand.u32 4294901760, %v2340_v51 }
 0x94c   :  { %13546 = vmatmul.mubr.f32.vlgmr.msra.gmra.mrb[6].mxu0 %v2341_v6 }
 0x94d   :  { %15505 = vmatpush3.bf16.msra.mxu0 %v17278_v53  ;;  %13564 = vmatprep.mubr.msk.f32.mxu0 %vm17061_vm0, %v18866_v1 }
 0x94e   :  { %15506 = vmatprep.subr.bf16.mxu0 %v17060_v0 }
 0x951   :  { %15508 = vmatpush3.bf16.msra.mxu0 %v17293_v61 }
 0x952   :  { %15509 = vmatprep.subr.bf16.mxu0 %v17060_v0 }
 0x955   :  { %15511 = vmatpush3.bf16.msra.mxu0 %v17330_v39 }
 0x956   :  { %15512 = vmatprep.subr.bf16.mxu0 %v17060_v0 }
 0x959   :  { %15514 = vmatpush3.bf16.msra.mxu0 %v17334_v41 }
 0x95a   :  { %15515 = vmatprep.subr.bf16.mxu0 %v17060_v0 }
 0x95c   :  { %13565 = vmatmul.mubr.f32.vlgmr.msra.gmra.mrb[6].mxu0 %v2337_v46 }
 0x95d   :  { %15517 = vmatpush3.bf16.msra.mxu0 %v17351_v47  ;;  %13583 = vmatprep.mubr.msk.f32.mxu0 %vm17061_vm0, %v18866_v1 }
 0x95e   :  { %15518 = vmatprep.subr.bf16.mxu0 %v17060_v0 }
 0x961   :  { %15520 = vmatpush3.bf16.msra.mxu0 %v17363_v49 }
 0x962   :  { %15521 = vmatprep.subr.bf16.mxu0 %v17060_v0 }
 0x965   :  { %15523 = vmatpush3.bf16.msra.mxu0 %v17376_v17 }
 0x966   :  { %15524 = vmatprep.subr.bf16.mxu0 %v17060_v0 }
 0x969   :  { %15526 = vmatpush3.bf16.msra.mxu0 %v17382_v18 }
 0x96a   :  { %15527 = vmatprep.subr.bf16.mxu0 %v17060_v0 }
 0x96c   :  { %13584 = vmatmul.mubr.f32.vlgmr.msra.gmra.mrb[6].mxu0 %v2338_v25 }
 0x96d   :  { %15529 = vmatpush3.bf16.msra.mxu0 %v17396_v24  ;;  %13602 = vmatprep.mubr.msk.f32.mxu0 %vm17061_vm0, %v18866_v1 }
 0x96e   :  { %15530 = vmatprep.subr.bf16.mxu0 %v17060_v0 }
 0x971   :  { %15532 = vmatpush3.bf16.msra.mxu0 %v17404_v16 }
 0x972   :  { %15533 = vmatprep.subr.bf16.mxu0 %v17060_v0 }
 0x975   :  { %15535 = vmatpush3.bf16.msra.mxu0 %v17419_v8 }
 0x976   :  { %15536 = vmatprep.subr.bf16.mxu0 %v17060_v0 }
 0x979   :  { %15538 = vmatpush3.bf16.msra.mxu0 %v17429_v10 }
 0x97a   :  { %15539 = vmatprep.subr.bf16.mxu0 %v17060_v0 }
 0x97c   :  { %13603 = vmatmul.mubr.f32.vlgmr.msra.gmra.mrb[6].mxu0 %v2339_v50 }
 0x97d   :  { %15541 = vmatpush3.bf16.msra.mxu0 %v17440_v12  ;;  %13621 = vmatprep.mubr.msk.f32.mxu0 %vm17061_vm0, %v18866_v1 }
 0x97e   :  { %15542 = vmatprep.subr.bf16.mxu0 %v17060_v0 }
 0x981   :  { %15544 = vmatpush3.bf16.msra.mxu0 %v17450_v14 }
 0x982   :  { %15545 = vmatprep.subr.bf16.mxu0 %v17060_v0 }
 0x985   :  { %15547 = vmatpush3.bf16.msra.mxu0 %v17462_v15 }
 0x986   :  { %15548 = vmatprep.subr.bf16.mxu0 %v17060_v0 }
 0x989   :  { %15550 = vmatpush3.bf16.msra.mxu0 %v17470_v19 }
 0x98a   :  { %15551 = vmatprep.subr.bf16.mxu0 %v17060_v0 }
 0x98c   :  { %13622 = vmatmul.mubr.f32.vlgmr.msra.gmra.mrb[6].mxu0 %v2337_v46 }
 0x98d   :  { %15553 = vmatpush3.bf16.msra.mxu0 %v17396_v24  ;;  %13640 = vmatprep.mubr.msk.f32.mxu0 %vm17061_vm0, %v18866_v1 }
 0x98e   :  { %15554 = vmatprep.subr.bf16.mxu0 %v17060_v0 }
 0x991   :  { %15556 = vmatpush3.bf16.msra.mxu0 %v17404_v16 }
 0x992   :  { %15557 = vmatprep.subr.bf16.mxu0 %v17060_v0 }
 0x995   :  { %15559 = vmatpush3.bf16.msra.mxu0 %v17419_v8 }
 0x996   :  { %15560 = vmatprep.subr.bf16.mxu0 %v17060_v0 }
 0x999   :  { %15562 = vmatpush3.bf16.msra.mxu0 %v17429_v10 }
 0x99a   :  { %15635 = vmatprep.subr.bf16.mxu0 %v17060_v0 }
 0x99c   :  { %13641 = vmatmul.mubr.f32.vlgmr.msra.gmra.mrb[6].mxu0 %v2337_v46 }
 0x99d   :  { %15637 = vmatpush3.bf16.msra.mxu0 %v17631_v30  ;;  %13765 = vmatprep.mubr.msk.f32.mxu0 %vm17061_vm0, %v18866_v1 }
 0x99e   :  { %15638 = vmatprep.subr.bf16.mxu0 %v17060_v0 }
 0x9a1   :  { %15640 = vmatpush3.bf16.msra.mxu0 %v17635_v3 }
 0x9a2   :  { %15641 = vmatprep.subr.bf16.mxu0 %v17060_v0 }
 0xa6f   :  { %v2797_v32 = vpop.f32.mrb[6].mxu0 }
 0xa70   :  { %v16577_v35 = vadd.f32 %v2797_v32, %v17494_v37  ;;  %v13642_v45 = vpop.f32.mrb[7].mxu0 }
 0xa72   :  { %2808 = vrot.lane.b32.xlu0 %v16577_v35, %s17063_s16  ;;  %v12192_v13 = vmul.f32 -1.442695, %v16577_v35 }
 0xa74   :  { %16837 = vpow2.f32 %v12192_v13 }
 0xa7e   :  { %v16838_v29 = vpop.eup %16837 }
 0xa7f   :  { %v2804_v42 = vadd.f32 1.0, %v16838_v29 }
 0xa81   :  { %16839 = vrcp.f32 %v2804_v42 }
 0xa8b   :  { %v16840_v44 = vpop.eup %16839 }
 0xa8c   :  { %v2818_v50 = vsub.f32 1.0, %v16840_v44  ;;  %v2824_v6 = vmul.f32 %v16840_v44, %v17526_v38 }
 0xae4   :  { %v2809_v55 = vpop.permute.xlu0 %2808 }
 0xae5   :  { %v2811_v62 = vmul.f32 %v16840_v44, %v2809_v55 }
 0xae7   :  { %2813 = vrot.lane.b32.xlu1 %v2811_v62, %s17064_s3 }
 0xb59   :  { %v2814_v7 = vpop.permute.xlu1 %2813 }
 0xb5a   :  { %v2816_v46 = vadd.f32 %v16577_v35, %v2814_v7 }
 0xb5c   :  { %16841 = vtanh.f32 %v2816_v46 }
 0xb66   :  { %v16842_v25 = vpop.eup %16841 }
 0xb67   :  { %2820 = vrot.lane.b32.xlu1 %v16842_v25, %s17065_s21 }
 0xbd9   :  { %v2821_v51 = vpop.permute.xlu1 %2820 }
 0xbda   :  { %v2823_v32 = vmul.f32 %v2821_v51, %v2818_v50 }
 0xbdc   :  { %v17774_v45 = vadd.f32 %v2824_v6, %v2823_v32 }
 0xbde   :  { %2827 = vrot.lane.b32.xlu0 %v17774_v45, %s17065_s21 }
 0xc50   :  { %v2828_v13 = vpop.permute.xlu0 %2827 }
 0xc51   :  { %v2830_v29 = vsel %vm608_vm3, %v2828_v13, %v17641_v43 }
 0xc52   :  { %v2832_v35 = vsel %vm610_vm4, %v2830_v29, 0 }
 0xc53   :  { %v2907_v42 = vand.u32 4294901760, %v2832_v35 }
 0xc55   :  { %v2908_v55 = vsub.f32 %v2832_v35, %v2907_v42 }
 0xc57   :  { %v2909_v62 = vand.u32 4294901760, %v2908_v55 }
 0xc59   :  { %v2910_v7 = vsub.f32 %v2908_v55, %v2909_v62 }
 0xc5b   :  { %v2911_v46 = vand.u32 4294901760, %v2910_v7 }
 0xc5d   :  { %13660 = vmatmul.mubr.f32.vlgmr.msra.gmra.mrb[6].mxu1 %v2911_v46 }
 0xc5e   :  { %15577 = vmatpush3.bf16.msra.mxu1 %v17556_v63  ;;  %13678 = vmatprep.mubr.msk.f32.mxu1 %vm17061_vm0, %v18866_v1 }
 0xc5f   :  { %15578 = vmatprep.subr.bf16.mxu1 %v17060_v0 }
 0xc62   :  { %15580 = vmatpush3.bf16.msra.mxu1 %v17530_v56 }
 0xc63   :  { %15581 = vmatprep.subr.bf16.mxu1 %v17060_v0 }
 0xc66   :  { %15583 = vmatpush3.bf16.msra.mxu1 %v17532_v40 }
 0xc67   :  { %15584 = vmatprep.subr.bf16.mxu1 %v17060_v0 }
 0xc6a   :  { %15586 = vmatpush3.bf16.msra.mxu1 %v17534_v48 }
 0xc6b   :  { %15587 = vmatprep.subr.bf16.mxu1 %v17060_v0 }
 0xc6d   :  { %13679 = vmatmul.mubr.f32.vlgmr.msra.gmra.mrb[6].mxu1 %v2907_v42 }
 0xc6e   :  { %15589 = vmatpush3.bf16.msra.mxu1 %v17567_v2  ;;  %13697 = vmatprep.mubr.msk.f32.mxu1 %vm17061_vm0, %v18866_v1 }
 0xc6f   :  { %15590 = vmatprep.subr.bf16.mxu1 %v17060_v0 }
 0xc72   :  { %15592 = vmatpush3.bf16.msra.mxu1 %v17536_v22 }
 0xc73   :  { %15593 = vmatprep.subr.bf16.mxu1 %v17060_v0 }
 0xc76   :  { %15595 = vmatpush3.bf16.msra.mxu1 %v17538_v27 }
 0xc77   :  { %15596 = vmatprep.subr.bf16.mxu1 %v17060_v0 }
 0xc7a   :  { %15598 = vmatpush3.bf16.msra.mxu1 %v17540_v28 }
 0xc7b   :  { %15599 = vmatprep.subr.bf16.mxu1 %v17060_v0 }
 0xc7d   :  { %13698 = vmatmul.mubr.f32.vlgmr.msra.gmra.mrb[6].mxu1 %v2908_v55 }
 0xc7e   :  { %15601 = vmatpush3.bf16.msra.mxu1 %v17509_v5  ;;  %13716 = vmatprep.mubr.msk.f32.mxu1 %vm17061_vm0, %v18866_v1 }
 0xc7f   :  { %15602 = vmatprep.subr.bf16.mxu1 %v17060_v0 }
 0xc82   :  { %15604 = vmatpush3.bf16.msra.mxu1 %v17514_v36 }
 0xc83   :  { %15605 = vmatprep.subr.bf16.mxu1 %v17060_v0 }
 0xc86   :  { %15607 = vmatpush3.bf16.msra.mxu1 %v17518_v20 }
 0xc87   :  { %15608 = vmatprep.subr.bf16.mxu1 %v17060_v0 }
 0xc8a   :  { %15610 = vmatpush3.bf16.msra.mxu1 %v17522_v21 }
 0xc8b   :  { %15611 = vmatprep.subr.bf16.mxu1 %v17060_v0 }
 0xc8d   :  { %13717 = vmatmul.mubr.f32.vlgmr.msra.gmra.mrb[6].mxu1 %v2909_v62 }
 0xc8e   :  { %15613 = vmatpush3.bf16.msra.mxu1 %v17589_v4  ;;  %13735 = vmatprep.mubr.msk.f32.mxu1 %vm17061_vm0, %v18866_v1 }
 0xc8f   :  { %15614 = vmatprep.subr.bf16.mxu1 %v17060_v0 }
 0xc92   :  { %15616 = vmatpush3.bf16.msra.mxu1 %v17542_v23 }
 0xc93   :  { %15617 = vmatprep.subr.bf16.mxu1 %v17060_v0 }
 0xc96   :  { %15619 = vmatpush3.bf16.msra.mxu1 %v17544_v9 }
 0xc97   :  { %15620 = vmatprep.subr.bf16.mxu1 %v17060_v0 }
 0xc9a   :  { %15622 = vmatpush3.bf16.msra.mxu1 %v17546_v11 }
 0xc9b   :  { %15623 = vmatprep.subr.bf16.mxu1 %v17060_v0 }
 0xc9d   :  { %13736 = vmatmul.mubr.f32.vlgmr.msra.gmra.mrb[6].mxu1 %v2907_v42 }
 0xc9e   :  { %15625 = vmatpush3.bf16.msra.mxu1 %v17509_v5  ;;  %13754 = vmatprep.mubr.msk.f32.mxu1 %vm17061_vm0, %v18866_v1 }
 0xc9f   :  { %15626 = vmatprep.subr.bf16.mxu1 %v17060_v0 }
 0xca2   :  { %15628 = vmatpush3.bf16.msra.mxu1 %v17514_v36 }
 0xca3   :  { %15629 = vmatprep.subr.bf16.mxu1 %v17060_v0 }
 0xca6   :  { %15631 = vmatpush3.bf16.msra.mxu1 %v17518_v20 }
 0xca7   :  { %15632 = vmatprep.subr.bf16.mxu1 %v17060_v0 }
 0xcaa   :  { %15634 = vmatpush3.bf16.msra.mxu1 %v17522_v21 }
 0xcab   :  { %15671 = vmatprep.subr.bf16.mxu1 %v17060_v0 }
 0xcad   :  { %13755 = vmatmul.mubr.f32.vlgmr.msra.gmra.mrb[6].mxu1 %v2907_v42 }
 0xcae   :  { %15673 = vmatpush3.bf16.msra.mxu1 %v17396_v24  ;;  %13839 = vmatprep.mubr.msk.f32.mxu1 %vm17061_vm0, %v18866_v1 }
 0xcaf   :  { %15674 = vmatprep.subr.bf16.mxu1 %v17060_v0 }
 0xcb2   :  { %15676 = vmatpush3.bf16.msra.mxu1 %v17404_v16 }
 0xcb3   :  { %15677 = vmatprep.subr.bf16.mxu1 %v17060_v0 }
 0xcb6   :  { %15679 = vmatpush3.bf16.msra.mxu1 %v17419_v8 }
 0xcb7   :  { %15680 = vmatprep.subr.bf16.mxu1 %v17060_v0 }
 0xcba   :  { %15682 = vmatpush3.bf16.msra.mxu1 %v17429_v10 }
 0xcbb   :  { %15683 = vmatprep.subr.bf16.mxu1 %v17060_v0 }
 0xd80   :  { %v3367_v38 = vpop.f32.mrb[6].mxu1 }
 0xd81   :  { %v16578_v44 = vadd.f32 %v17625_v58, %v3367_v38  ;;  %v13756_v25 = vpop.f32.mrb[7].mxu1 }
 0xd83   :  { %3378 = vrot.lane.b32.xlu1 %v16578_v44, %s17063_s16  ;;  %v12193_v50 = vmul.f32 -1.442695, %v16578_v44 }
 0xd85   :  { %16843 = vpow2.f32 %v12193_v50 }
 0xd8f   :  { %v16844_v51 = vpop.eup %16843 }
 0xd90   :  { %v3374_v6 = vadd.f32 1.0, %v16844_v51 }
 0xd92   :  { %16845 = vrcp.f32 %v3374_v6 }
 0xd9c   :  { %v16846_v32 = vpop.eup %16845 }
 0xd9d   :  { %v3388_v58 = vsub.f32 1.0, %v16846_v32  ;;  %v3394_v7 = vmul.f32 %v16846_v32, %v17641_v43 }
 0xdf5   :  { %v3379_v13 = vpop.permute.xlu1 %3378 }
 0xdf6   :  { %v3381_v29 = vmul.f32 %v16846_v32, %v3379_v13 }
 0xdf8   :  { %3383 = vrot.lane.b32.xlu0 %v3381_v29, %s17064_s3 }
 0xe6a   :  { %v3384_v35 = vpop.permute.xlu0 %3383 }
 0xe6b   :  { %v3386_v42 = vadd.f32 %v16578_v44, %v3384_v35 }
 0xe6d   :  { %16847 = vtanh.f32 %v3386_v42 }
 0xe77   :  { %v16848_v55 = vpop.eup %16847 }
 0xe78   :  { %3390 = vrot.lane.b32.xlu1 %v16848_v55, %s17065_s21 }
 0xeea   :  { %v3391_v62 = vpop.permute.xlu1 %3390 }
 0xeeb   :  { %v3393_v46 = vmul.f32 %v3391_v62, %v3388_v58 }
 0xeed   :  { %v17846_v38 = vadd.f32 %v3394_v7, %v3393_v46 }
 0xeef   :  { %3397 = vrot.lane.b32.xlu0 %v17846_v38, %s17065_s21 }
 0xf61   :  { %v3398_v25 = vpop.permute.xlu0 %3397 }
 0xf62   :  { %v3399_v50 = vsel %vm608_vm3, %v3398_v25, 0 }
 0xf63   :  { %v3470_v51 = vand.u32 4294901760, %v3399_v50 }
 0xf65   :  { %v3471_v6 = vsub.f32 %v3399_v50, %v3470_v51 }
 0xf67   :  { %v3472_v44 = vand.u32 4294901760, %v3471_v6 }
 0xf69   :  { %v3473_v13 = vsub.f32 %v3471_v6, %v3472_v44 }
 0xf6b   :  { %v3474_v29 = vand.u32 4294901760, %v3473_v13 }
 0xf6d   :  { %13766 = vmatmul.mubr.f32.vlgmr.msra.gmra.mrb[8].mxu0 %v3474_v29 }
 0xf6e   :  { %15643 = vmatpush3.bf16.msra.mxu0 %v17639_v26  ;;  %13776 = vmatprep.mubr.msk.f32.mxu0 %vm17061_vm0, %v18866_v1 }
 0xf6f   :  { %15644 = vmatprep.subr.bf16.mxu0 %v17060_v0 }
 0xf72   :  { %15646 = vmatpush3.bf16.msra.mxu0 %v17645_v52 }
 0xf73   :  { %15647 = vmatprep.subr.bf16.mxu0 %v17060_v0 }
 0xf75   :  { %13777 = vmatmul.mubr.f32.vlgmr.msra.gmra.mrb[8].mxu0 %v3470_v51 }
 0xf76   :  { %15649 = vmatpush3.bf16.msra.mxu0 %v17647_v54  ;;  %13787 = vmatprep.mubr.msk.f32.mxu0 %vm17061_vm0, %v18866_v1 }
 0xf77   :  { %15650 = vmatprep.subr.bf16.mxu0 %v17060_v0 }
 0xf7a   :  { %15652 = vmatpush3.bf16.msra.mxu0 %v17649_v34 }
 0xf7b   :  { %15653 = vmatprep.subr.bf16.mxu0 %v17060_v0 }
 0xf7d   :  { %13788 = vmatmul.mubr.f32.vlgmr.msra.gmra.mrb[8].mxu0 %v3471_v6 }
 0xf7e   :  { %15655 = vmatpush3.bf16.msra.mxu0 %v17631_v30  ;;  %13798 = vmatprep.mubr.msk.f32.mxu0 %vm17061_vm0, %v18866_v1 }
 0xf7f   :  { %15656 = vmatprep.subr.bf16.mxu0 %v17060_v0 }
 0xf82   :  { %15658 = vmatpush3.bf16.msra.mxu0 %v17635_v3 }
 0xf83   :  { %15659 = vmatprep.subr.bf16.mxu0 %v17060_v0 }
 0xf85   :  { %13799 = vmatmul.mubr.f32.vlgmr.msra.gmra.mrb[8].mxu0 %v3472_v44 }
 0xf86   :  { %15661 = vmatpush3.bf16.msra.mxu0 %v17651_v59  ;;  %13809 = vmatprep.mubr.msk.f32.mxu0 %vm17061_vm0, %v18866_v1 }
 0xf87   :  { %15662 = vmatprep.subr.bf16.mxu0 %v17060_v0 }
 0xf8a   :  { %15664 = vmatpush3.bf16.msra.mxu0 %v17653_v60 }
 0xf8b   :  { %15665 = vmatprep.subr.bf16.mxu0 %v17060_v0 }
 0xf8d   :  { %13810 = vmatmul.mubr.f32.vlgmr.msra.gmra.mrb[8].mxu0 %v3470_v51 }
 0xf8e   :  { %15667 = vmatpush3.bf16.msra.mxu0 %v17631_v30  ;;  %13820 = vmatprep.mubr.msk.f32.mxu0 %vm17061_vm0, %v18866_v1 }
 0xf8f   :  { %15668 = vmatprep.subr.bf16.mxu0 %v17060_v0 }
 0xf92   :  { %15670 = vmatpush3.bf16.msra.mxu0 %v17635_v3 }
 0xf93   :  { %15743 = vmatprep.subr.bf16.mxu0 %v17060_v0 }
 0xf95   :  { %13821 = vmatmul.mubr.f32.vlgmr.msra.gmra.mrb[8].mxu0 %v3470_v51 }
 0xf96   :  { %15745 = vmatpush3.bf16.msra.mxu0 %v17509_v5  ;;  %13953 = vmatprep.mubr.msk.f32.mxu0 %vm17061_vm0, %v18866_v1 }
 0xf97   :  { %15746 = vmatprep.subr.bf16.mxu0 %v17060_v0 }
 0xf9a   :  { %15748 = vmatpush3.bf16.msra.mxu0 %v17514_v36 }
 0xf9b   :  { %15749 = vmatprep.subr.bf16.mxu0 %v17060_v0 }
 0xf9e   :  { %15751 = vmatpush3.bf16.msra.mxu0 %v17518_v20 }
 0xf9f   :  { %15752 = vmatprep.subr.bf16.mxu0 %v17060_v0 }
 0xfa2   :  { %15754 = vmatpush3.bf16.msra.mxu0 %v17522_v21 }
 0xfa3   :  { %15755 = vmatprep.subr.bf16.mxu0 %v17060_v0 }
0x1068   :  { %v3882_v43 = vpop.f32.mrb[8].mxu0 }
0x1069   :  { %v16579_v32 = vadd.f32 %v17699_v33, %v3882_v43  ;;  %v13822_v35 = vpop.f32.mrb[9].mxu0 }
0x106a   :  { %v2256_v35 = vsel %vm605_vm2, %v17705_v57, 1 }
0x106b   :  { %v3886_v42 = vsel %vm608_vm3, %v16579_v32, -inf }
0x106c   :  { %3887 = vmax.xlane.f32.xlu1 %v3886_v42 }
0x10f9   :  { %v3888_v55 = vpop.xlane.xlu1 %3887 }
0x10fa   :  { %vm3889_vm8 = vcmp.eq.f32.partialorder %v16579_v32, %v3888_v55 }
0x10fb   :  { %v3890_v58 = vsel %vm3889_vm8, %v17319_v31, 32 }
0x10fc   :  { %v3891_v62 = vsel %vm608_vm3, %v3890_v58, 2147483647 }
0x10fd   :  { %v3893_v7 = vshra.s32 %v3891_v62, 16  ;;  %v3892_v25 = vand.u32 65535, %v3891_v62 }
0x10ff   :  { %v3895_v46 = vcvt.s32.f32 %v3893_v7  ;;  %v3894_v51 = vcvt.s32.f32 %v3892_v25 }
0x1101   :  { %3896 = vmin.xlane.f32.xlu0 %v3895_v46 }
0x118e   :  { %v3897_v50 = vpop.xlane.xlu0 %3896 }
0x118f   :  { %vm3898_vm9 = vcmp.eq.f32.partialorder %v3895_v46, %v3897_v50  ;;  %v3903_v44 = vcvt.f32.s32 %v3897_v50 }
0x1190   :  { %v3899_v6 = vsel %vm3898_vm9, %v3894_v51, inf  ;;  %vm8859_vm9 = vcmp.eq.s32.totalorder %v17319_v31, 5 }
0x1191   :  { %3900 = vmin.xlane.f32.xlu0 %v3899_v6  ;;  %v3904_v29 = vshll.u32 %v3903_v44, 16 }
0x121e   :  { %v3901_v13 = vpop.xlane.xlu0 %3900 }
0x121f   :  { %v3902_v43 = vcvt.f32.s32 %v3901_v13 }
0x1221   :  { %v3905_v32 = vadd.s32 %v3904_v29, %v3902_v43 }
0x1223   :  { %v17899_v42 = vsel %vm3906_vm10, %v3905_v32, %v2256_v35  ;;  %vm3908_vm11 = vcmp.eq.s32.totalorder %v17319_v31, %v3905_v32 }
0x1224   :  { %v12194_v55 = vsel %vm3908_vm11, 1.0, %v18866_v1 }
0x1225   :  { %v3911_v58 = vsel %vm608_vm3, %v12194_v55, %v17774_v45 }
0x1226   :  { %v3913_v62 = vsel %vm610_vm4, %v3911_v58, 0 }
0x1227   :  { %v3988_v7 = vand.u32 4294901760, %v3913_v62 }
0x1229   :  { %v3989_v46 = vsub.f32 %v3913_v62, %v3988_v7 }
0x122b   :  { %v3990_v25 = vand.u32 4294901760, %v3989_v46 }
0x122d   :  { %v3991_v50 = vsub.f32 %v3989_v46, %v3990_v25 }
0x122f   :  { %v3992_v51 = vand.u32 4294901760, %v3991_v50 }
0x1231   :  { %13840 = vmatmul.mubr.f32.vlgmr.msra.gmra.mrb[8].mxu1 %v3992_v51 }
0x1232   :  { %15685 = vmatpush3.bf16.msra.mxu1 %v17278_v53  ;;  %13858 = vmatprep.mubr.msk.f32.mxu1 %vm17061_vm0, %v18866_v1 }
0x1233   :  { %15686 = vmatprep.subr.bf16.mxu1 %v17060_v0 }
0x1236   :  { %15688 = vmatpush3.bf16.msra.mxu1 %v17293_v61 }
0x1237   :  { %15689 = vmatprep.subr.bf16.mxu1 %v17060_v0 }
0x123a   :  { %15691 = vmatpush3.bf16.msra.mxu1 %v17330_v39 }
0x123b   :  { %15692 = vmatprep.subr.bf16.mxu1 %v17060_v0 }
0x123e   :  { %15694 = vmatpush3.bf16.msra.mxu1 %v17334_v41 }
0x123f   :  { %15695 = vmatprep.subr.bf16.mxu1 %v17060_v0 }
0x1241   :  { %13859 = vmatmul.mubr.f32.vlgmr.msra.gmra.mrb[8].mxu1 %v3988_v7 }
0x1242   :  { %15697 = vmatpush3.bf16.msra.mxu1 %v17351_v47  ;;  %13877 = vmatprep.mubr.msk.f32.mxu1 %vm17061_vm0, %v18866_v1 }
0x1243   :  { %15698 = vmatprep.subr.bf16.mxu1 %v17060_v0 }
0x1246   :  { %15700 = vmatpush3.bf16.msra.mxu1 %v17363_v49 }
0x1247   :  { %15701 = vmatprep.subr.bf16.mxu1 %v17060_v0 }
0x124a   :  { %15703 = vmatpush3.bf16.msra.mxu1 %v17376_v17 }
0x124b   :  { %15704 = vmatprep.subr.bf16.mxu1 %v17060_v0 }
0x124e   :  { %15706 = vmatpush3.bf16.msra.mxu1 %v17382_v18 }
0x124f   :  { %15707 = vmatprep.subr.bf16.mxu1 %v17060_v0 }
0x1251   :  { %13878 = vmatmul.mubr.f32.vlgmr.msra.gmra.mrb[8].mxu1 %v3989_v46 }
0x1252   :  { %15709 = vmatpush3.bf16.msra.mxu1 %v17396_v24  ;;  %13896 = vmatprep.mubr.msk.f32.mxu1 %vm17061_vm0, %v18866_v1 }
0x1253   :  { %15710 = vmatprep.subr.bf16.mxu1 %v17060_v0 }
0x1256   :  { %15712 = vmatpush3.bf16.msra.mxu1 %v17404_v16 }
0x1257   :  { %15713 = vmatprep.subr.bf16.mxu1 %v17060_v0 }
0x125a   :  { %15715 = vmatpush3.bf16.msra.mxu1 %v17419_v8 }
0x125b   :  { %15716 = vmatprep.subr.bf16.mxu1 %v17060_v0 }
0x125e   :  { %15718 = vmatpush3.bf16.msra.mxu1 %v17429_v10 }
0x125f   :  { %15719 = vmatprep.subr.bf16.mxu1 %v17060_v0 }
0x1261   :  { %13897 = vmatmul.mubr.f32.vlgmr.msra.gmra.mrb[8].mxu1 %v3990_v25 }
0x1262   :  { %15721 = vmatpush3.bf16.msra.mxu1 %v17440_v12  ;;  %13915 = vmatprep.mubr.msk.f32.mxu1 %vm17061_vm0, %v18866_v1 }
0x1263   :  { %15722 = vmatprep.subr.bf16.mxu1 %v17060_v0 }
0x1266   :  { %15724 = vmatpush3.bf16.msra.mxu1 %v17450_v14 }
0x1267   :  { %15725 = vmatprep.subr.bf16.mxu1 %v17060_v0 }
0x126a   :  { %15727 = vmatpush3.bf16.msra.mxu1 %v17462_v15 }
0x126b   :  { %15728 = vmatprep.subr.bf16.mxu1 %v17060_v0 }
0x126e   :  { %15730 = vmatpush3.bf16.msra.mxu1 %v17470_v19 }
0x126f   :  { %15731 = vmatprep.subr.bf16.mxu1 %v17060_v0 }
0x1271   :  { %13916 = vmatmul.mubr.f32.vlgmr.msra.gmra.mrb[8].mxu1 %v3988_v7 }
0x1272   :  { %15733 = vmatpush3.bf16.msra.mxu1 %v17396_v24  ;;  %13934 = vmatprep.mubr.msk.f32.mxu1 %vm17061_vm0, %v18866_v1 }
0x1273   :  { %15734 = vmatprep.subr.bf16.mxu1 %v17060_v0 }
0x1276   :  { %15736 = vmatpush3.bf16.msra.mxu1 %v17404_v16 }
0x1277   :  { %15737 = vmatprep.subr.bf16.mxu1 %v17060_v0 }
0x127a   :  { %15739 = vmatpush3.bf16.msra.mxu1 %v17419_v8 }
0x127b   :  { %15740 = vmatprep.subr.bf16.mxu1 %v17060_v0 }
0x127e   :  { %15742 = vmatpush3.bf16.msra.mxu1 %v17429_v10 }
0x127f   :  { %15815 = vmatprep.subr.bf16.mxu1 %v17060_v0 }
0x1281   :  { %13935 = vmatmul.mubr.f32.vlgmr.msra.gmra.mrb[8].mxu1 %v3988_v7 }
0x1282   :  { %15817 = vmatpush3.bf16.msra.mxu1 %v17631_v30  ;;  %14059 = vmatprep.mubr.msk.f32.mxu1 %vm17061_vm0, %v18866_v1 }
0x1283   :  { %15818 = vmatprep.subr.bf16.mxu1 %v17060_v0 }
0x1286   :  { %15820 = vmatpush3.bf16.msra.mxu1 %v17635_v3 }
0x1287   :  { %15821 = vmatprep.subr.bf16.mxu1 %v17060_v0 }
0x1354   :  { %v4448_v57 = vpop.f32.mrb[8].mxu1 }
0x1355   :  { %v16580_v6 = vadd.f32 %v4448_v57, %v17494_v37  ;;  %v13936_v44 = vpop.f32.mrb[9].mxu1 }
0x1357   :  { %4459 = vrot.lane.b32.xlu1 %v16580_v6, %s17063_s16  ;;  %v12195_v13 = vmul.f32 -1.442695, %v16580_v6 }
0x1359   :  { %16849 = vpow2.f32 %v12195_v13 }
0x1363   :  { %v16850_v29 = vpop.eup %16849 }
0x1364   :  { %v4455_v43 = vadd.f32 1.0, %v16850_v29 }
0x1366   :  { %16851 = vrcp.f32 %v4455_v43 }
0x1370   :  { %v16852_v32 = vpop.eup %16851 }
0x1371   :  { %v4469_v46 = vsub.f32 1.0, %v16852_v32  ;;  %v4475_v50 = vmul.f32 %v16852_v32, %v17774_v45 }
0x13c9   :  { %v4460_v35 = vpop.permute.xlu1 %4459 }
0x13ca   :  { %v4462_v55 = vmul.f32 %v16852_v32, %v4460_v35  ;;  %v18037_v32 = vld [vmem:[%s18860_s5] ss:$0 sm:$0xff] }
0x13cc   :  { %4464 = vrot.lane.b32.xlu0 %v4462_v55, %s17064_s3 }
0x143e   :  { %v4465_v58 = vpop.permute.xlu0 %4464 }
0x143f   :  { %v4467_v62 = vadd.f32 %v16580_v6, %v4465_v58 }
0x1441   :  { %16853 = vtanh.f32 %v4467_v62 }
0x144b   :  { %v16854_v7 = vpop.eup %16853 }
0x144c   :  { %4471 = vrot.lane.b32.xlu1 %v16854_v7, %s17065_s21 }
0x14be   :  { %v4472_v25 = vpop.permute.xlu1 %4471 }
0x14bf   :  { %v4474_v51 = vmul.f32 %v4472_v25, %v4469_v46 }
0x14c1   :  { %v17967_v57 = vadd.f32 %v4475_v50, %v4474_v51 }
0x14c3   :  { %4478 = vrot.lane.b32.xlu1 %v17967_v57, %s17065_s21 }
0x1535   :  { %v4479_v44 = vpop.permute.xlu1 %4478 }
0x1536   :  { %v4481_v13 = vsel %vm608_vm3, %v4479_v44, %v17846_v38 }
0x1537   :  { %v4483_v6 = vsel %vm610_vm4, %v4481_v13, 0 }
0x1538   :  { %v4558_v29 = vand.u32 4294901760, %v4483_v6 }
0x153a   :  { %v4559_v43 = vsub.f32 %v4483_v6, %v4558_v29 }
0x153c   :  { %v4560_v35 = vand.u32 4294901760, %v4559_v43 }
0x153e   :  { %v4561_v55 = vsub.f32 %v4559_v43, %v4560_v35 }
0x1540   :  { %v4562_v58 = vand.u32 4294901760, %v4561_v55 }
0x1542   :  { %13954 = vmatmul.mubr.f32.vlgmr.msra.gmra.mrb[10].mxu0 %v4562_v58 }
0x1543   :  { %15757 = vmatpush3.bf16.msra.mxu0 %v17556_v63  ;;  %13972 = vmatprep.mubr.msk.f32.mxu0 %vm17061_vm0, %v18866_v1 }
0x1544   :  { %15758 = vmatprep.subr.bf16.mxu0 %v17060_v0 }
0x1547   :  { %15760 = vmatpush3.bf16.msra.mxu0 %v17530_v56 }
0x1548   :  { %15761 = vmatprep.subr.bf16.mxu0 %v17060_v0 }
0x154b   :  { %15763 = vmatpush3.bf16.msra.mxu0 %v17532_v40 }
0x154c   :  { %15764 = vmatprep.subr.bf16.mxu0 %v17060_v0 }
0x154f   :  { %15766 = vmatpush3.bf16.msra.mxu0 %v17534_v48 }
0x1550   :  { %15767 = vmatprep.subr.bf16.mxu0 %v17060_v0 }
0x1552   :  { %13973 = vmatmul.mubr.f32.vlgmr.msra.gmra.mrb[10].mxu0 %v4558_v29 }
0x1553   :  { %15769 = vmatpush3.bf16.msra.mxu0 %v17567_v2  ;;  %13991 = vmatprep.mubr.msk.f32.mxu0 %vm17061_vm0, %v18866_v1 }
0x1554   :  { %15770 = vmatprep.subr.bf16.mxu0 %v17060_v0 }
0x1557   :  { %15772 = vmatpush3.bf16.msra.mxu0 %v17536_v22 }
0x1558   :  { %15773 = vmatprep.subr.bf16.mxu0 %v17060_v0 }
0x155b   :  { %15775 = vmatpush3.bf16.msra.mxu0 %v17538_v27 }
0x155c   :  { %15776 = vmatprep.subr.bf16.mxu0 %v17060_v0 }
0x155f   :  { %15778 = vmatpush3.bf16.msra.mxu0 %v17540_v28 }
0x1560   :  { %15779 = vmatprep.subr.bf16.mxu0 %v17060_v0 }
0x1562   :  { %13992 = vmatmul.mubr.f32.vlgmr.msra.gmra.mrb[10].mxu0 %v4559_v43 }
0x1563   :  { %15781 = vmatpush3.bf16.msra.mxu0 %v17509_v5  ;;  %14010 = vmatprep.mubr.msk.f32.mxu0 %vm17061_vm0, %v18866_v1 }
0x1564   :  { %15782 = vmatprep.subr.bf16.mxu0 %v17060_v0 }
0x1567   :  { %15784 = vmatpush3.bf16.msra.mxu0 %v17514_v36 }
0x1568   :  { %15785 = vmatprep.subr.bf16.mxu0 %v17060_v0 }
0x156b   :  { %15787 = vmatpush3.bf16.msra.mxu0 %v17518_v20 }
0x156c   :  { %15788 = vmatprep.subr.bf16.mxu0 %v17060_v0 }
0x156f   :  { %15790 = vmatpush3.bf16.msra.mxu0 %v17522_v21 }
0x1570   :  { %15791 = vmatprep.subr.bf16.mxu0 %v17060_v0 }
0x1572   :  { %14011 = vmatmul.mubr.f32.vlgmr.msra.gmra.mrb[10].mxu0 %v4560_v35 }
0x1573   :  { %15793 = vmatpush3.bf16.msra.mxu0 %v17589_v4  ;;  %14029 = vmatprep.mubr.msk.f32.mxu0 %vm17061_vm0, %v18866_v1 }
0x1574   :  { %15794 = vmatprep.subr.bf16.mxu0 %v17060_v0 }
0x1577   :  { %15796 = vmatpush3.bf16.msra.mxu0 %v17542_v23 }
0x1578   :  { %15797 = vmatprep.subr.bf16.mxu0 %v17060_v0 }
0x157b   :  { %15799 = vmatpush3.bf16.msra.mxu0 %v17544_v9 }
0x157c   :  { %15800 = vmatprep.subr.bf16.mxu0 %v17060_v0 }
0x157f   :  { %15802 = vmatpush3.bf16.msra.mxu0 %v17546_v11 }
0x1580   :  { %15803 = vmatprep.subr.bf16.mxu0 %v17060_v0 }
0x1582   :  { %14030 = vmatmul.mubr.f32.vlgmr.msra.gmra.mrb[10].mxu0 %v4558_v29 }
0x1583   :  { %15805 = vmatpush3.bf16.msra.mxu0 %v17509_v5  ;;  %14048 = vmatprep.mubr.msk.f32.mxu0 %vm17061_vm0, %v18866_v1 }
0x1584   :  { %15806 = vmatprep.subr.bf16.mxu0 %v17060_v0 }
0x1587   :  { %15808 = vmatpush3.bf16.msra.mxu0 %v17514_v36 }
0x1588   :  { %15809 = vmatprep.subr.bf16.mxu0 %v17060_v0 }
0x158b   :  { %15811 = vmatpush3.bf16.msra.mxu0 %v17518_v20 }
0x158c   :  { %15812 = vmatprep.subr.bf16.mxu0 %v17060_v0 }
0x158f   :  { %15814 = vmatpush3.bf16.msra.mxu0 %v17522_v21 }
0x1590   :  { %15851 = vmatprep.subr.bf16.mxu0 %v17060_v0 }
0x1592   :  { %14049 = vmatmul.mubr.f32.vlgmr.msra.gmra.mrb[10].mxu0 %v4558_v29 }
0x1593   :  { %15853 = vmatpush3.bf16.msra.mxu0 %v17396_v24  ;;  %14133 = vmatprep.mubr.msk.f32.mxu0 %vm17061_vm0, %v18866_v1 }
0x1594   :  { %15854 = vmatprep.subr.bf16.mxu0 %v17060_v0 }
0x1597   :  { %15856 = vmatpush3.bf16.msra.mxu0 %v17404_v16 }
0x1598   :  { %15857 = vmatprep.subr.bf16.mxu0 %v17060_v0 }
0x159b   :  { %15859 = vmatpush3.bf16.msra.mxu0 %v17419_v8 }
0x159c   :  { %15860 = vmatprep.subr.bf16.mxu0 %v17060_v0 }
0x159f   :  { %15862 = vmatpush3.bf16.msra.mxu0 %v17429_v10 }
0x15a0   :  { %15863 = vmatprep.subr.bf16.mxu0 %v17060_v0 }
0x1665   :  { %v5018_v45 = vpop.f32.mrb[10].mxu0 }
0x1666   :  { %v16581_v62 = vadd.f32 %v18037_v32, %v5018_v45  ;;  %v14050_v7 = vpop.f32.mrb[11].mxu0 }
0x1668   :  { %5029 = vrot.lane.b32.xlu0 %v16581_v62, %s17063_s16  ;;  %v12196_v46 = vmul.f32 -1.442695, %v16581_v62 }
0x166a   :  { %16855 = vpow2.f32 %v12196_v46 }
0x1674   :  { %v16856_v25 = vpop.eup %16855 }
0x1675   :  { %v5025_v50 = vadd.f32 1.0, %v16856_v25 }
0x1677   :  { %16857 = vrcp.f32 %v5025_v50 }
0x1681   :  { %v16858_v51 = vpop.eup %16857 }
0x1682   :  { %v5039_v35 = vsub.f32 1.0, %v16858_v51  ;;  %v5045_v58 = vmul.f32 %v16858_v51, %v17846_v38 }
0x16da   :  { %v5030_v44 = vpop.permute.xlu0 %5029 }
0x16db   :  { %v5032_v13 = vmul.f32 %v16858_v51, %v5030_v44 }
0x16dd   :  { %5034 = vrot.lane.b32.xlu1 %v5032_v13, %s17064_s3 }
0x174f   :  { %v5035_v6 = vpop.permute.xlu1 %5034 }
0x1750   :  { %v5037_v29 = vadd.f32 %v16581_v62, %v5035_v6 }
0x1752   :  { %16859 = vtanh.f32 %v5037_v29 }
0x175c   :  { %v16860_v43 = vpop.eup %16859 }
0x175d   :  { %5041 = vrot.lane.b32.xlu0 %v16860_v43, %s17065_s21 }
0x17cf   :  { %v5042_v55 = vpop.permute.xlu0 %5041 }
0x17d0   :  { %v5044_v45 = vmul.f32 %v5042_v55, %v5039_v35 }
0x17d2   :  { %v18044_v7 = vadd.f32 %v5045_v58, %v5044_v45 }
0x17d4   :  { %5048 = vrot.lane.b32.xlu1 %v18044_v7, %s17065_s21 }
0x1846   :  { %v5049_v46 = vpop.permute.xlu1 %5048 }
0x1847   :  { %v5050_v25 = vsel %vm608_vm3, %v5049_v46, 0 }
0x1848   :  { %v5121_v50 = vand.u32 4294901760, %v5050_v25 }
0x184a   :  { %v5122_v44 = vsub.f32 %v5050_v25, %v5121_v50 }
0x184c   :  { %v5123_v62 = vand.u32 4294901760, %v5122_v44 }
0x184e   :  { %v5124_v13 = vsub.f32 %v5122_v44, %v5123_v62 }
0x1850   :  { %v5125_v6 = vand.u32 4294901760, %v5124_v13 }
0x1852   :  { %14060 = vmatmul.mubr.f32.vlgmr.msra.gmra.mrb[10].mxu1 %v5125_v6 }
0x1853   :  { %15823 = vmatpush3.bf16.msra.mxu1 %v17639_v26  ;;  %14070 = vmatprep.mubr.msk.f32.mxu1 %vm17061_vm0, %v18866_v1 }
0x1854   :  { %15824 = vmatprep.subr.bf16.mxu1 %v17060_v0 }
0x1857   :  { %15826 = vmatpush3.bf16.msra.mxu1 %v17645_v52 }
0x1858   :  { %15827 = vmatprep.subr.bf16.mxu1 %v17060_v0 }
0x185a   :  { %14071 = vmatmul.mubr.f32.vlgmr.msra.gmra.mrb[10].mxu1 %v5121_v50 }
0x185b   :  { %15829 = vmatpush3.bf16.msra.mxu1 %v17647_v54  ;;  %14081 = vmatprep.mubr.msk.f32.mxu1 %vm17061_vm0, %v18866_v1 }
0x185c   :  { %15830 = vmatprep.subr.bf16.mxu1 %v17060_v0 }
0x185f   :  { %15832 = vmatpush3.bf16.msra.mxu1 %v17649_v34 }
0x1860   :  { %15833 = vmatprep.subr.bf16.mxu1 %v17060_v0 }
0x1862   :  { %14082 = vmatmul.mubr.f32.vlgmr.msra.gmra.mrb[10].mxu1 %v5122_v44 }
0x1863   :  { %15835 = vmatpush3.bf16.msra.mxu1 %v17631_v30  ;;  %14092 = vmatprep.mubr.msk.f32.mxu1 %vm17061_vm0, %v18866_v1 }
0x1864   :  { %15836 = vmatprep.subr.bf16.mxu1 %v17060_v0 }
0x1867   :  { %15838 = vmatpush3.bf16.msra.mxu1 %v17635_v3 }
0x1868   :  { %15839 = vmatprep.subr.bf16.mxu1 %v17060_v0 }
0x186a   :  { %14093 = vmatmul.mubr.f32.vlgmr.msra.gmra.mrb[10].mxu1 %v5123_v62 }
0x186b   :  { %15841 = vmatpush3.bf16.msra.mxu1 %v17651_v59  ;;  %14103 = vmatprep.mubr.msk.f32.mxu1 %vm17061_vm0, %v18866_v1 }
0x186c   :  { %15842 = vmatprep.subr.bf16.mxu1 %v17060_v0 }
0x186f   :  { %15844 = vmatpush3.bf16.msra.mxu1 %v17653_v60 }
0x1870   :  { %15845 = vmatprep.subr.bf16.mxu1 %v17060_v0 }
0x1872   :  { %14104 = vmatmul.mubr.f32.vlgmr.msra.gmra.mrb[10].mxu1 %v5121_v50 }
0x1873   :  { %15847 = vmatpush3.bf16.msra.mxu1 %v17631_v30  ;;  %14114 = vmatprep.mubr.msk.f32.mxu1 %vm17061_vm0, %v18866_v1 }
0x1874   :  { %15848 = vmatprep.subr.bf16.mxu1 %v17060_v0 }
0x1877   :  { %15850 = vmatpush3.bf16.msra.mxu1 %v17635_v3 }
0x1878   :  { %15923 = vmatprep.subr.bf16.mxu1 %v17060_v0 }
0x187a   :  { %14115 = vmatmul.mubr.f32.vlgmr.msra.gmra.mrb[10].mxu1 %v5121_v50 }
0x187b   :  { %15925 = vmatpush3.bf16.msra.mxu1 %v17509_v5  ;;  %14247 = vmatprep.mubr.msk.f32.mxu1 %vm17061_vm0, %v18866_v1 }
0x187c   :  { %15926 = vmatprep.subr.bf16.mxu1 %v17060_v0 }
0x187f   :  { %15928 = vmatpush3.bf16.msra.mxu1 %v17514_v36 }
0x1880   :  { %15929 = vmatprep.subr.bf16.mxu1 %v17060_v0 }
0x1883   :  { %15931 = vmatpush3.bf16.msra.mxu1 %v17518_v20 }
0x1884   :  { %15932 = vmatprep.subr.bf16.mxu1 %v17060_v0 }
0x1887   :  { %15934 = vmatpush3.bf16.msra.mxu1 %v17522_v21 }
0x1888   :  { %15935 = vmatprep.subr.bf16.mxu1 %v17060_v0 }
0x194d   :  { %v5533_v38 = vpop.f32.mrb[10].mxu1 }
0x194e   :  { %v16582_v51 = vadd.f32 %v17699_v33, %v5533_v38  ;;  %v14116_v29 = vpop.f32.mrb[11].mxu1 }
0x1950   :  { %v5537_v43 = vsel %vm608_vm3, %v16582_v51, -inf }
0x1951   :  { %5538 = vmax.xlane.f32.xlu0 %v5537_v43 }
0x19de   :  { %v5539_v35 = vpop.xlane.xlu0 %5538 }
0x19df   :  { %vm5540_vm12 = vcmp.eq.f32.partialorder %v16582_v51, %v5539_v35 }
0x19e0   :  { %v5541_v55 = vsel %vm5540_vm12, %v17319_v31, 32 }
0x19e1   :  { %v5542_v58 = vsel %vm608_vm3, %v5541_v55, 2147483647 }
0x19e2   :  { %v5544_v45 = vshra.s32 %v5542_v58, 16  ;;  %v5543_v25 = vand.u32 65535, %v5542_v58 }
0x19e4   :  { %v5546_v46 = vcvt.s32.f32 %v5544_v45  ;;  %v5545_v44 = vcvt.s32.f32 %v5543_v25 }
0x19e6   :  { %5547 = vmin.xlane.f32.xlu1 %v5546_v46 }
0x1a73   :  { %v5548_v50 = vpop.xlane.xlu1 %5547 }
0x1a74   :  { %vm5549_vm13 = vcmp.eq.f32.partialorder %v5546_v46, %v5548_v50  ;;  %v5554_v33 = vcvt.f32.s32 %v5548_v50 }
0x1a75   :  { %v5550_v62 = vsel %vm5549_vm13, %v5545_v44, inf  ;;  %vm10510_vm13 = vcmp.eq.s32.totalorder %v17319_v31, 6 }
0x1a76   :  { %5551 = vmin.xlane.f32.xlu0 %v5550_v62  ;;  %v5555_v6 = vshll.u32 %v5554_v33, 16 }
0x1b03   :  { %v5552_v13 = vpop.xlane.xlu0 %5551 }
0x1b04   :  { %v5553_v38 = vcvt.f32.s32 %v5552_v13 }
0x1b06   :  { %v5556_v51 = vadd.s32 %v5555_v6, %v5553_v38 }
0x1b08   :  { %v18095_v29 = vsel %vm5557_vm14, %v5556_v51, %v17899_v42  ;;  %vm5559_vm15 = vcmp.eq.s32.totalorder %v17319_v31, %v5556_v51 }
0x1b09   :  { %v12197_v43 = vsel %vm5559_vm15, 1.0, %v18866_v1  ;;  %vm12161_vm15 = vcmp.eq.s32.totalorder %v17319_v31, 7 }
0x1b0a   :  { %v5562_v35 = vsel %vm608_vm3, %v12197_v43, %v17967_v57 }
0x1b0b   :  { %v5564_v55 = vsel %vm610_vm4, %v5562_v35, 0 }
0x1b0c   :  { %v5639_v58 = vand.u32 4294901760, %v5564_v55 }
0x1b0e   :  { %v5640_v45 = vsub.f32 %v5564_v55, %v5639_v58 }
0x1b10   :  { %v5641_v46 = vand.u32 4294901760, %v5640_v45 }
0x1b12   :  { %v5642_v25 = vsub.f32 %v5640_v45, %v5641_v46 }
0x1b14   :  { %v5643_v50 = vand.u32 4294901760, %v5642_v25 }
0x1b16   :  { %14134 = vmatmul.mubr.f32.vlgmr.msra.gmra.mrb[12].mxu0 %v5643_v50 }
0x1b17   :  { %15865 = vmatpush3.bf16.msra.mxu0 %v17278_v53  ;;  %14152 = vmatprep.mubr.msk.f32.mxu0 %vm17061_vm0, %v18866_v1 }
0x1b18   :  { %15866 = vmatprep.subr.bf16.mxu0 %v17060_v0 }
0x1b1b   :  { %15868 = vmatpush3.bf16.msra.mxu0 %v17293_v61 }
0x1b1c   :  { %15869 = vmatprep.subr.bf16.mxu0 %v17060_v0 }
0x1b1f   :  { %15871 = vmatpush3.bf16.msra.mxu0 %v17330_v39 }
0x1b20   :  { %15872 = vmatprep.subr.bf16.mxu0 %v17060_v0 }
0x1b23   :  { %15874 = vmatpush3.bf16.msra.mxu0 %v17334_v41 }
0x1b24   :  { %15875 = vmatprep.subr.bf16.mxu0 %v17060_v0 }
0x1b26   :  { %14153 = vmatmul.mubr.f32.vlgmr.msra.gmra.mrb[12].mxu0 %v5639_v58 }
0x1b27   :  { %15877 = vmatpush3.bf16.msra.mxu0 %v17351_v47  ;;  %14171 = vmatprep.mubr.msk.f32.mxu0 %vm17061_vm0, %v18866_v1 }
0x1b28   :  { %15878 = vmatprep.subr.bf16.mxu0 %v17060_v0 }
0x1b2b   :  { %15880 = vmatpush3.bf16.msra.mxu0 %v17363_v49 }
0x1b2c   :  { %15881 = vmatprep.subr.bf16.mxu0 %v17060_v0 }
0x1b2f   :  { %15883 = vmatpush3.bf16.msra.mxu0 %v17376_v17 }
0x1b30   :  { %15884 = vmatprep.subr.bf16.mxu0 %v17060_v0 }
0x1b33   :  { %15886 = vmatpush3.bf16.msra.mxu0 %v17382_v18 }
0x1b34   :  { %15887 = vmatprep.subr.bf16.mxu0 %v17060_v0 }
0x1b36   :  { %14172 = vmatmul.mubr.f32.vlgmr.msra.gmra.mrb[12].mxu0 %v5640_v45 }
0x1b37   :  { %15889 = vmatpush3.bf16.msra.mxu0 %v17396_v24  ;;  %14190 = vmatprep.mubr.msk.f32.mxu0 %vm17061_vm0, %v18866_v1 }
0x1b38   :  { %15890 = vmatprep.subr.bf16.mxu0 %v17060_v0 }
0x1b3b   :  { %15892 = vmatpush3.bf16.msra.mxu0 %v17404_v16 }
0x1b3c   :  { %15893 = vmatprep.subr.bf16.mxu0 %v17060_v0 }
0x1b3f   :  { %15895 = vmatpush3.bf16.msra.mxu0 %v17419_v8 }
0x1b40   :  { %15896 = vmatprep.subr.bf16.mxu0 %v17060_v0 }
0x1b43   :  { %15898 = vmatpush3.bf16.msra.mxu0 %v17429_v10 }
0x1b44   :  { %15899 = vmatprep.subr.bf16.mxu0 %v17060_v0 }
0x1b46   :  { %14191 = vmatmul.mubr.f32.vlgmr.msra.gmra.mrb[12].mxu0 %v5641_v46 }
0x1b47   :  { %15901 = vmatpush3.bf16.msra.mxu0 %v17440_v12  ;;  %14209 = vmatprep.mubr.msk.f32.mxu0 %vm17061_vm0, %v18866_v1 }
0x1b48   :  { %15902 = vmatprep.subr.bf16.mxu0 %v17060_v0 }
0x1b4b   :  { %15904 = vmatpush3.bf16.msra.mxu0 %v17450_v14 }
0x1b4c   :  { %15905 = vmatprep.subr.bf16.mxu0 %v17060_v0 }
0x1b4f   :  { %15907 = vmatpush3.bf16.msra.mxu0 %v17462_v15 }
0x1b50   :  { %15908 = vmatprep.subr.bf16.mxu0 %v17060_v0 }
0x1b53   :  { %15910 = vmatpush3.bf16.msra.mxu0 %v17470_v19 }
0x1b54   :  { %15911 = vmatprep.subr.bf16.mxu0 %v17060_v0 }
0x1b56   :  { %14210 = vmatmul.mubr.f32.vlgmr.msra.gmra.mrb[12].mxu0 %v5639_v58 }
0x1b57   :  { %15913 = vmatpush3.bf16.msra.mxu0 %v17396_v24  ;;  %14228 = vmatprep.mubr.msk.f32.mxu0 %vm17061_vm0, %v18866_v1 }
0x1b58   :  { %15914 = vmatprep.subr.bf16.mxu0 %v17060_v0 }
0x1b5b   :  { %15916 = vmatpush3.bf16.msra.mxu0 %v17404_v16 }
0x1b5c   :  { %15917 = vmatprep.subr.bf16.mxu0 %v17060_v0 }
0x1b5f   :  { %15919 = vmatpush3.bf16.msra.mxu0 %v17419_v8 }
0x1b60   :  { %15920 = vmatprep.subr.bf16.mxu0 %v17060_v0 }
0x1b63   :  { %15922 = vmatpush3.bf16.msra.mxu0 %v17429_v10 }
0x1b64   :  { %15995 = vmatprep.subr.bf16.mxu0 %v17060_v0 }
0x1b66   :  { %14229 = vmatmul.mubr.f32.vlgmr.msra.gmra.mrb[12].mxu0 %v5639_v58 }
0x1b67   :  { %15997 = vmatpush3.bf16.msra.mxu0 %v17631_v30  ;;  %14353 = vmatprep.mubr.msk.f32.mxu0 %vm17061_vm0, %v18866_v1 }
0x1b68   :  { %15998 = vmatprep.subr.bf16.mxu0 %v17060_v0 }
0x1b6b   :  { %16000 = vmatpush3.bf16.msra.mxu0 %v17635_v3 }
0x1b6c   :  { %16001 = vmatprep.subr.bf16.mxu0 %v17060_v0 }
0x1c39   :  { %v6099_v42 = vpop.f32.mrb[12].mxu0 }
0x1c3a   :  { %v16583_v44 = vadd.f32 %v6099_v42, %v17494_v37  ;;  %v14230_v62 = vpop.f32.mrb[13].mxu0 }
0x1c3c   :  { %6110 = vrot.lane.b32.xlu0 %v16583_v44, %s17063_s16  ;;  %v12198_v33 = vmul.f32 -1.442695, %v16583_v44 }
0x1c3e   :  { %16861 = vpow2.f32 %v12198_v33 }
0x1c48   :  { %v16862_v13 = vpop.eup %16861 }
0x1c49   :  { %v6106_v6 = vadd.f32 1.0, %v16862_v13 }
0x1c4b   :  { %16863 = vrcp.f32 %v6106_v6 }
0x1c55   :  { %v16864_v38 = vpop.eup %16863 }
0x1c56   :  { %v6120_v45 = vsub.f32 1.0, %v16864_v38  ;;  %v6126_v25 = vmul.f32 %v16864_v38, %v17967_v57 }
0x1cae   :  { %v6111_v51 = vpop.permute.xlu0 %6110 }
0x1caf   :  { %v6113_v43 = vmul.f32 %v16864_v38, %v6111_v51 }
0x1cb1   :  { %6115 = vrot.lane.b32.xlu1 %v6113_v43, %s17064_s3 }
0x1d23   :  { %v6116_v35 = vpop.permute.xlu1 %6115 }
0x1d24   :  { %v6118_v55 = vadd.f32 %v16583_v44, %v6116_v35 }
0x1d26   :  { %16865 = vtanh.f32 %v6118_v55 }
0x1d30   :  { %v16866_v58 = vpop.eup %16865 }
0x1d31   :  { %6122 = vrot.lane.b32.xlu1 %v16866_v58, %s17065_s21 }
0x1da3   :  { %v6123_v46 = vpop.permute.xlu1 %6122 }
0x1da4   :  { %v6125_v50 = vmul.f32 %v6123_v46, %v6120_v45 }
0x1da6   :  { %v18163_v42 = vadd.f32 %v6126_v25, %v6125_v50 }
0x1da8   :  { %6129 = vrot.lane.b32.xlu0 %v18163_v42, %s17065_s21 }
0x1e1a   :  { %v6130_v62 = vpop.permute.xlu0 %6129 }
0x1e1b   :  { %v6132_v33 = vsel %vm608_vm3, %v6130_v62, %v18044_v7 }
0x1e1c   :  { %v6134_v44 = vsel %vm610_vm4, %v6132_v33, 0 }
0x1e1d   :  { %v6209_v13 = vand.u32 4294901760, %v6134_v44 }
0x1e1f   :  { %v6210_v6 = vsub.f32 %v6134_v44, %v6209_v13 }
0x1e21   :  { %v6211_v51 = vand.u32 4294901760, %v6210_v6 }
0x1e23   :  { %v6212_v43 = vsub.f32 %v6210_v6, %v6211_v51 }
0x1e25   :  { %v6213_v35 = vand.u32 4294901760, %v6212_v43 }
0x1e27   :  { %14248 = vmatmul.mubr.f32.vlgmr.msra.gmra.mrb[12].mxu1 %v6213_v35 }
0x1e28   :  { %15937 = vmatpush3.bf16.msra.mxu1 %v17556_v63  ;;  %14266 = vmatprep.mubr.msk.f32.mxu1 %vm17061_vm0, %v18866_v1 }
0x1e29   :  { %15938 = vmatprep.subr.bf16.mxu1 %v17060_v0 }
0x1e2c   :  { %15940 = vmatpush3.bf16.msra.mxu1 %v17530_v56 }
0x1e2d   :  { %15941 = vmatprep.subr.bf16.mxu1 %v17060_v0 }
0x1e30   :  { %15943 = vmatpush3.bf16.msra.mxu1 %v17532_v40 }
0x1e31   :  { %15944 = vmatprep.subr.bf16.mxu1 %v17060_v0 }
0x1e34   :  { %15946 = vmatpush3.bf16.msra.mxu1 %v17534_v48 }
0x1e35   :  { %15947 = vmatprep.subr.bf16.mxu1 %v17060_v0 }
0x1e37   :  { %14267 = vmatmul.mubr.f32.vlgmr.msra.gmra.mrb[12].mxu1 %v6209_v13 }
0x1e38   :  { %15949 = vmatpush3.bf16.msra.mxu1 %v17567_v2  ;;  %14285 = vmatprep.mubr.msk.f32.mxu1 %vm17061_vm0, %v18866_v1 }
0x1e39   :  { %15950 = vmatprep.subr.bf16.mxu1 %v17060_v0 }
0x1e3c   :  { %15952 = vmatpush3.bf16.msra.mxu1 %v17536_v22 }
0x1e3d   :  { %15953 = vmatprep.subr.bf16.mxu1 %v17060_v0 }
0x1e40   :  { %15955 = vmatpush3.bf16.msra.mxu1 %v17538_v27 }
0x1e41   :  { %15956 = vmatprep.subr.bf16.mxu1 %v17060_v0 }
0x1e44   :  { %15958 = vmatpush3.bf16.msra.mxu1 %v17540_v28 }
0x1e45   :  { %15959 = vmatprep.subr.bf16.mxu1 %v17060_v0 }
0x1e47   :  { %14286 = vmatmul.mubr.f32.vlgmr.msra.gmra.mrb[12].mxu1 %v6210_v6 }
0x1e48   :  { %15961 = vmatpush3.bf16.msra.mxu1 %v17509_v5  ;;  %14304 = vmatprep.mubr.msk.f32.mxu1 %vm17061_vm0, %v18866_v1 }
0x1e49   :  { %15962 = vmatprep.subr.bf16.mxu1 %v17060_v0 }
0x1e4c   :  { %15964 = vmatpush3.bf16.msra.mxu1 %v17514_v36 }
0x1e4d   :  { %15965 = vmatprep.subr.bf16.mxu1 %v17060_v0 }
0x1e50   :  { %15967 = vmatpush3.bf16.msra.mxu1 %v17518_v20 }
0x1e51   :  { %15968 = vmatprep.subr.bf16.mxu1 %v17060_v0 }
0x1e54   :  { %15970 = vmatpush3.bf16.msra.mxu1 %v17522_v21 }
0x1e55   :  { %15971 = vmatprep.subr.bf16.mxu1 %v17060_v0 }
0x1e57   :  { %14305 = vmatmul.mubr.f32.vlgmr.msra.gmra.mrb[12].mxu1 %v6211_v51 }
0x1e58   :  { %15973 = vmatpush3.bf16.msra.mxu1 %v17589_v4  ;;  %14323 = vmatprep.mubr.msk.f32.mxu1 %vm17061_vm0, %v18866_v1 }
0x1e59   :  { %15974 = vmatprep.subr.bf16.mxu1 %v17060_v0 }
0x1e5c   :  { %15976 = vmatpush3.bf16.msra.mxu1 %v17542_v23 }
0x1e5d   :  { %15977 = vmatprep.subr.bf16.mxu1 %v17060_v0 }
0x1e60   :  { %15979 = vmatpush3.bf16.msra.mxu1 %v17544_v9 }
0x1e61   :  { %15980 = vmatprep.subr.bf16.mxu1 %v17060_v0 }
0x1e64   :  { %15982 = vmatpush3.bf16.msra.mxu1 %v17546_v11 }
0x1e65   :  { %15983 = vmatprep.subr.bf16.mxu1 %v17060_v0 }
0x1e67   :  { %14324 = vmatmul.mubr.f32.vlgmr.msra.gmra.mrb[12].mxu1 %v6209_v13 }
0x1e68   :  { %15985 = vmatpush3.bf16.msra.mxu1 %v17509_v5  ;;  %14342 = vmatprep.mubr.msk.f32.mxu1 %vm17061_vm0, %v18866_v1 }
0x1e69   :  { %15986 = vmatprep.subr.bf16.mxu1 %v17060_v0 }
0x1e6c   :  { %15988 = vmatpush3.bf16.msra.mxu1 %v17514_v36 }
0x1e6d   :  { %15989 = vmatprep.subr.bf16.mxu1 %v17060_v0 }
0x1e70   :  { %15991 = vmatpush3.bf16.msra.mxu1 %v17518_v20 }
0x1e71   :  { %15992 = vmatprep.subr.bf16.mxu1 %v17060_v0 }
0x1e74   :  { %15994 = vmatpush3.bf16.msra.mxu1 %v17522_v21 }
0x1e75   :  { %16031 = vmatprep.subr.bf16.mxu1 %v17060_v0 }
0x1e77   :  { %14343 = vmatmul.mubr.f32.vlgmr.msra.gmra.mrb[12].mxu1 %v6209_v13 }
0x1e78   :  { %16033 = vmatpush3.bf16.msra.mxu1 %v17396_v24  ;;  %14427 = vmatprep.mubr.msk.f32.mxu1 %vm17061_vm0, %v18866_v1 }
0x1e79   :  { %16034 = vmatprep.subr.bf16.mxu1 %v17060_v0 }
0x1e7c   :  { %16036 = vmatpush3.bf16.msra.mxu1 %v17404_v16 }
0x1e7d   :  { %16037 = vmatprep.subr.bf16.mxu1 %v17060_v0 }
0x1e80   :  { %16039 = vmatpush3.bf16.msra.mxu1 %v17419_v8 }
0x1e81   :  { %16040 = vmatprep.subr.bf16.mxu1 %v17060_v0 }
0x1e84   :  { %16042 = vmatpush3.bf16.msra.mxu1 %v17429_v10 }
0x1e85   :  { %16043 = vmatprep.subr.bf16.mxu1 %v17060_v0 }
0x1f4a   :  { %v6669_v57 = vpop.f32.mrb[12].mxu1 }
0x1f4b   :  { %v16584_v38 = vadd.f32 %v18037_v32, %v6669_v57  ;;  %v14344_v55 = vpop.f32.mrb[13].mxu1 }
0x1f4d   :  { %6680 = vrot.lane.b32.xlu1 %v16584_v38, %s17063_s16  ;;  %v12199_v58 = vmul.f32 -1.442695, %v16584_v38 }
0x1f4f   :  { %16867 = vpow2.f32 %v12199_v58 }
0x1f59   :  { %v16868_v45 = vpop.eup %16867 }
0x1f5a   :  { %v6676_v46 = vadd.f32 1.0, %v16868_v45 }
0x1f5c   :  { %16869 = vrcp.f32 %v6676_v46 }
0x1f66   :  { %v16870_v25 = vpop.eup %16869 }
0x1f67   :  { %v6690_v6 = vsub.f32 1.0, %v16870_v25  ;;  %v6696_v43 = vmul.f32 %v16870_v25, %v18044_v7 }
0x1fbf   :  { %v6681_v50 = vpop.permute.xlu1 %6680 }
0x1fc0   :  { %v6683_v62 = vmul.f32 %v16870_v25, %v6681_v50  ;;  %v18283_v25 = vld [vmem:[%s18862_s7] ss:$0 sm:$0xff] }
0x1fc2   :  { %6685 = vrot.lane.b32.xlu0 %v6683_v62, %s17064_s3 }
0x2034   :  { %v6686_v33 = vpop.permute.xlu0 %6685 }
0x2035   :  { %v6688_v44 = vadd.f32 %v16584_v38, %v6686_v33 }
0x2037   :  { %16871 = vtanh.f32 %v6688_v44 }
0x2041   :  { %v16872_v13 = vpop.eup %16871 }
0x2042   :  { %6692 = vrot.lane.b32.xlu1 %v16872_v13, %s17065_s21 }
0x20b4   :  { %v6693_v51 = vpop.permute.xlu1 %6692 }
0x20b5   :  { %v6695_v35 = vmul.f32 %v6693_v51, %v6690_v6 }
0x20b7   :  { %v18235_v57 = vadd.f32 %v6696_v43, %v6695_v35 }
0x20b9   :  { %6699 = vrot.lane.b32.xlu0 %v18235_v57, %s17065_s21 }
0x212b   :  { %v6700_v55 = vpop.permute.xlu0 %6699 }
0x212c   :  { %v6701_v58 = vsel %vm608_vm3, %v6700_v55, 0 }
0x212d   :  { %v6772_v45 = vand.u32 4294901760, %v6701_v58 }
0x212f   :  { %v6773_v46 = vsub.f32 %v6701_v58, %v6772_v45 }
0x2131   :  { %v6774_v38 = vand.u32 4294901760, %v6773_v46 }
0x2133   :  { %v6775_v50 = vsub.f32 %v6773_v46, %v6774_v38 }
0x2135   :  { %v6776_v62 = vand.u32 4294901760, %v6775_v50 }
0x2137   :  { %14354 = vmatmul.mubr.f32.vlgmr.msra.gmra.mrb[14].mxu0 %v6776_v62 }
0x2138   :  { %16003 = vmatpush3.bf16.msra.mxu0 %v17639_v26  ;;  %14364 = vmatprep.mubr.msk.f32.mxu0 %vm17061_vm0, %v18866_v1 }
0x2139   :  { %16004 = vmatprep.subr.bf16.mxu0 %v17060_v0 }
0x213c   :  { %16006 = vmatpush3.bf16.msra.mxu0 %v17645_v52 }
0x213d   :  { %16007 = vmatprep.subr.bf16.mxu0 %v17060_v0 }
0x213f   :  { %14365 = vmatmul.mubr.f32.vlgmr.msra.gmra.mrb[14].mxu0 %v6772_v45 }
0x2140   :  { %16009 = vmatpush3.bf16.msra.mxu0 %v17647_v54  ;;  %14375 = vmatprep.mubr.msk.f32.mxu0 %vm17061_vm0, %v18866_v1 }
0x2141   :  { %16010 = vmatprep.subr.bf16.mxu0 %v17060_v0 }
0x2144   :  { %16012 = vmatpush3.bf16.msra.mxu0 %v17649_v34 }
0x2145   :  { %16013 = vmatprep.subr.bf16.mxu0 %v17060_v0 }
0x2147   :  { %14376 = vmatmul.mubr.f32.vlgmr.msra.gmra.mrb[14].mxu0 %v6773_v46 }
0x2148   :  { %16015 = vmatpush3.bf16.msra.mxu0 %v17631_v30  ;;  %14386 = vmatprep.mubr.msk.f32.mxu0 %vm17061_vm0, %v18866_v1 }
0x2149   :  { %16016 = vmatprep.subr.bf16.mxu0 %v17060_v0 }
0x214c   :  { %16018 = vmatpush3.bf16.msra.mxu0 %v17635_v3 }
0x214d   :  { %16019 = vmatprep.subr.bf16.mxu0 %v17060_v0 }
0x214f   :  { %14387 = vmatmul.mubr.f32.vlgmr.msra.gmra.mrb[14].mxu0 %v6774_v38 }
0x2150   :  { %16021 = vmatpush3.bf16.msra.mxu0 %v17651_v59  ;;  %14397 = vmatprep.mubr.msk.f32.mxu0 %vm17061_vm0, %v18866_v1 }
0x2151   :  { %16022 = vmatprep.subr.bf16.mxu0 %v17060_v0 }
0x2154   :  { %16024 = vmatpush3.bf16.msra.mxu0 %v17653_v60 }
0x2155   :  { %16025 = vmatprep.subr.bf16.mxu0 %v17060_v0 }
0x2157   :  { %14398 = vmatmul.mubr.f32.vlgmr.msra.gmra.mrb[14].mxu0 %v6772_v45 }
0x2158   :  { %16027 = vmatpush3.bf16.msra.mxu0 %v17631_v30  ;;  %14408 = vmatprep.mubr.msk.f32.mxu0 %vm17061_vm0, %v18866_v1 }
0x2159   :  { %16028 = vmatprep.subr.bf16.mxu0 %v17060_v0 }
0x215c   :  { %16030 = vmatpush3.bf16.msra.mxu0 %v17635_v3 }
0x215d   :  { %16103 = vmatprep.subr.bf16.mxu0 %v17060_v0 }
0x215f   :  { %14409 = vmatmul.mubr.f32.vlgmr.msra.gmra.mrb[14].mxu0 %v6772_v45 }
0x2160   :  { %16105 = vmatpush3.bf16.msra.mxu0 %v17509_v5  ;;  %14541 = vmatprep.mubr.msk.f32.mxu0 %vm17061_vm0, %v18866_v1 }
0x2161   :  { %16106 = vmatprep.subr.bf16.mxu0 %v17060_v0 }
0x2164   :  { %16108 = vmatpush3.bf16.msra.mxu0 %v17514_v36 }
0x2165   :  { %16109 = vmatprep.subr.bf16.mxu0 %v17060_v0 }
0x2168   :  { %16111 = vmatpush3.bf16.msra.mxu0 %v17518_v20 }
0x2169   :  { %16112 = vmatprep.subr.bf16.mxu0 %v17060_v0 }
0x216c   :  { %16114 = vmatpush3.bf16.msra.mxu0 %v17522_v21 }
0x216d   :  { %16115 = vmatprep.subr.bf16.mxu0 %v17060_v0 }
0x2232   :  { %v7184_v7 = vpop.f32.mrb[14].mxu0 }
0x2233   :  { %v16585_v33 = vadd.f32 %v18283_v25, %v7184_v7  ;;  %v14410_v44 = vpop.f32.mrb[15].mxu0 }
0x2235   :  { %v7188_v13 = vsel %vm608_vm3, %v16585_v33, -inf }
0x2236   :  { %7189 = vmax.xlane.f32.xlu1 %v7188_v13 }
0x22c3   :  { %v7190_v6 = vpop.xlane.xlu1 %7189 }
0x22c4   :  { %vm7191_vm1 = vcmp.eq.f32.partialorder %v16585_v33, %v7190_v6 }
0x22c5   :  { %v7192_v51 = vsel %vm7191_vm1, %v17319_v31, 32  ;;  %vm12163_vm1 = vcmask 64512  }
0x22c6   :  { %v7193_v43 = vsel %vm608_vm3, %v7192_v51, 2147483647 }
0x22c7   :  { %v7195_v35 = vshra.s32 %v7193_v43, 16  ;;  %v7194_v58 = vand.u32 65535, %v7193_v43 }
0x22c9   :  { %v7197_v55 = vcvt.s32.f32 %v7195_v35  ;;  %v7196_v46 = vcvt.s32.f32 %v7194_v58 }
0x22cb   :  { %7198 = vmin.xlane.f32.xlu0 %v7197_v55 }
0x2358   :  { %v7199_v45 = vpop.xlane.xlu0 %7198 }
0x2359   :  { %vm7200_vm2 = vcmp.eq.f32.partialorder %v7197_v55, %v7199_v45  ;;  %v7205_v50 = vcvt.f32.s32 %v7199_v45 }
0x235a   :  { %v7201_v38 = vsel %vm7200_vm2, %v7196_v46, inf }
0x235b   :  { %7202 = vmin.xlane.f32.xlu0 %v7201_v38  ;;  %v7206_v7 = vshll.u32 %v7205_v50, 16 }
0x23e8   :  { %v7203_v62 = vpop.xlane.xlu0 %7202 }
0x23e9   :  { %v7204_v44 = vcvt.f32.s32 %v7203_v62 }
0x23eb   :  { %v7207_v33 = vadd.s32 %v7206_v7, %v7204_v44 }
0x23ed   :  { %v18291_v13 = vsel %vm7208_vm5, %v7207_v33, %v18095_v29  ;;  %vm7210_vm6 = vcmp.eq.s32.totalorder %v17319_v31, %v7207_v33 }
0x23ee   :  { %v12200_v6 = vsel %vm7210_vm6, 1.0, %v18866_v1 }
0x23ef   :  { %v7213_v51 = vsel %vm608_vm3, %v12200_v6, %v18163_v42 }
0x23f0   :  { %v7215_v43 = vsel %vm610_vm4, %v7213_v51, 0 }
0x23f1   :  { %v7290_v35 = vand.u32 4294901760, %v7215_v43 }
0x23f3   :  { %v7291_v55 = vsub.f32 %v7215_v43, %v7290_v35 }
0x23f5   :  { %v7292_v58 = vand.u32 4294901760, %v7291_v55 }
0x23f7   :  { %v7293_v45 = vsub.f32 %v7291_v55, %v7292_v58 }
0x23f9   :  { %v7294_v46 = vand.u32 4294901760, %v7293_v45 }
0x23fb   :  { %14428 = vmatmul.mubr.f32.vlgmr.msra.gmra.mrb[14].mxu1 %v7294_v46 }
0x23fc   :  { %16045 = vmatpush3.bf16.msra.mxu1 %v17278_v53  ;;  %14446 = vmatprep.mubr.msk.f32.mxu1 %vm17061_vm0, %v18866_v1 }
0x23fd   :  { %16046 = vmatprep.subr.bf16.mxu1 %v17060_v0 }
0x2400   :  { %16048 = vmatpush3.bf16.msra.mxu1 %v17293_v61 }
0x2401   :  { %16049 = vmatprep.subr.bf16.mxu1 %v17060_v0 }
0x2404   :  { %16051 = vmatpush3.bf16.msra.mxu1 %v17330_v39 }
0x2405   :  { %16052 = vmatprep.subr.bf16.mxu1 %v17060_v0 }
0x2408   :  { %16054 = vmatpush3.bf16.msra.mxu1 %v17334_v41 }
0x2409   :  { %16055 = vmatprep.subr.bf16.mxu1 %v17060_v0 }
0x240b   :  { %14447 = vmatmul.mubr.f32.vlgmr.msra.gmra.mrb[14].mxu1 %v7290_v35 }
0x240c   :  { %16057 = vmatpush3.bf16.msra.mxu1 %v17351_v47  ;;  %14465 = vmatprep.mubr.msk.f32.mxu1 %vm17061_vm0, %v18866_v1 }
0x240d   :  { %16058 = vmatprep.subr.bf16.mxu1 %v17060_v0 }
0x2410   :  { %16060 = vmatpush3.bf16.msra.mxu1 %v17363_v49 }
0x2411   :  { %16061 = vmatprep.subr.bf16.mxu1 %v17060_v0 }
0x2414   :  { %16063 = vmatpush3.bf16.msra.mxu1 %v17376_v17 }
0x2415   :  { %16064 = vmatprep.subr.bf16.mxu1 %v17060_v0 }
0x2418   :  { %16066 = vmatpush3.bf16.msra.mxu1 %v17382_v18 }
0x2419   :  { %16067 = vmatprep.subr.bf16.mxu1 %v17060_v0 }
0x241b   :  { %14466 = vmatmul.mubr.f32.vlgmr.msra.gmra.mrb[14].mxu1 %v7291_v55 }
0x241c   :  { %16069 = vmatpush3.bf16.msra.mxu1 %v17396_v24  ;;  %14484 = vmatprep.mubr.msk.f32.mxu1 %vm17061_vm0, %v18866_v1 }
0x241d   :  { %16070 = vmatprep.subr.bf16.mxu1 %v17060_v0 }
0x2420   :  { %16072 = vmatpush3.bf16.msra.mxu1 %v17404_v16 }
0x2421   :  { %16073 = vmatprep.subr.bf16.mxu1 %v17060_v0 }
0x2424   :  { %16075 = vmatpush3.bf16.msra.mxu1 %v17419_v8 }
0x2425   :  { %16076 = vmatprep.subr.bf16.mxu1 %v17060_v0 }
0x2428   :  { %16078 = vmatpush3.bf16.msra.mxu1 %v17429_v10 }
0x2429   :  { %16079 = vmatprep.subr.bf16.mxu1 %v17060_v0 }
0x242b   :  { %14485 = vmatmul.mubr.f32.vlgmr.msra.gmra.mrb[14].mxu1 %v7292_v58 }
0x242c   :  { %16081 = vmatpush3.bf16.msra.mxu1 %v17440_v12  ;;  %14503 = vmatprep.mubr.msk.f32.mxu1 %vm17061_vm0, %v18866_v1 }
0x242d   :  { %16082 = vmatprep.subr.bf16.mxu1 %v17060_v0 }
0x2430   :  { %16084 = vmatpush3.bf16.msra.mxu1 %v17450_v14 }
0x2431   :  { %16085 = vmatprep.subr.bf16.mxu1 %v17060_v0 }
0x2434   :  { %16087 = vmatpush3.bf16.msra.mxu1 %v17462_v15 }
0x2435   :  { %16088 = vmatprep.subr.bf16.mxu1 %v17060_v0 }
0x2438   :  { %16090 = vmatpush3.bf16.msra.mxu1 %v17470_v19 }
0x2439   :  { %16091 = vmatprep.subr.bf16.mxu1 %v17060_v0 }
0x243b   :  { %14504 = vmatmul.mubr.f32.vlgmr.msra.gmra.mrb[14].mxu1 %v7290_v35 }
0x243c   :  { %16093 = vmatpush3.bf16.msra.mxu1 %v17396_v24  ;;  %14522 = vmatprep.mubr.msk.f32.mxu1 %vm17061_vm0, %v18866_v1 }
0x243d   :  { %16094 = vmatprep.subr.bf16.mxu1 %v17060_v0 }
0x2440   :  { %16096 = vmatpush3.bf16.msra.mxu1 %v17404_v16 }
0x2441   :  { %16097 = vmatprep.subr.bf16.mxu1 %v17060_v0 }
0x2444   :  { %16099 = vmatpush3.bf16.msra.mxu1 %v17419_v8 }
0x2445   :  { %16100 = vmatprep.subr.bf16.mxu1 %v17060_v0 }
0x2448   :  { %16102 = vmatpush3.bf16.msra.mxu1 %v17429_v10 }
0x2449   :  { %16175 = vmatprep.subr.bf16.mxu1 %v17060_v0 }
0x244b   :  { %14523 = vmatmul.mubr.f32.vlgmr.msra.gmra.mrb[14].mxu1 %v7290_v35 }
0x244c   :  { %16177 = vmatpush3.bf16.msra.mxu1 %v17631_v30  ;;  %14647 = vmatprep.mubr.msk.f32.mxu1 %vm17061_vm0, %v18866_v1 }
0x244d   :  { %16178 = vmatprep.subr.bf16.mxu1 %v17060_v0 }
0x2450   :  { %16180 = vmatpush3.bf16.msra.mxu1 %v17635_v3 }
0x2451   :  { %16181 = vmatprep.subr.bf16.mxu1 %v17060_v0 }
0x251e   :  { %v7750_v29 = vpop.f32.mrb[14].mxu1 }
0x251f   :  { %v16586_v38 = vadd.f32 %v7750_v29, %v17494_v37  ;;  %v14524_v50 = vpop.f32.mrb[15].mxu1 }
0x2521   :  { %7761 = vrot.lane.b32.xlu1 %v16586_v38, %s17063_s16  ;;  %v12201_v62 = vmul.f32 -1.442695, %v16586_v38 }
0x2523   :  { %16873 = vpow2.f32 %v12201_v62 }
0x252d   :  { %v16874_v7 = vpop.eup %16873 }
0x252e   :  { %v7757_v44 = vadd.f32 1.0, %v16874_v7 }
0x2530   :  { %16875 = vrcp.f32 %v7757_v44 }
0x253a   :  { %v16876_v33 = vpop.eup %16875 }
0x253b   :  { %v7771_v58 = vsub.f32 1.0, %v16876_v33  ;;  %v7777_v46 = vmul.f32 %v16876_v33, %v18163_v42 }
0x2593   :  { %v7762_v6 = vpop.permute.xlu1 %7761 }
0x2594   :  { %v7764_v51 = vmul.f32 %v16876_v33, %v7762_v6 }
0x2596   :  { %7766 = vrot.lane.b32.xlu0 %v7764_v51, %s17064_s3 }
0x2608   :  { %v7767_v43 = vpop.permute.xlu0 %7766 }
0x2609   :  { %v7769_v35 = vadd.f32 %v16586_v38, %v7767_v43 }
0x260b   :  { %16877 = vtanh.f32 %v7769_v35 }
0x2615   :  { %v16878_v55 = vpop.eup %16877 }
0x2616   :  { %7773 = vrot.lane.b32.xlu1 %v16878_v55, %s17065_s21 }
0x2688   :  { %v7774_v45 = vpop.permute.xlu1 %7773 }
0x2689   :  { %v7776_v29 = vmul.f32 %v7774_v45, %v7771_v58 }
0x268b   :  { %v18359_v50 = vadd.f32 %v7777_v46, %v7776_v29 }
0x268d   :  { %7780 = vrot.lane.b32.xlu1 %v18359_v50, %s17065_s21 }
0x26ff   :  { %v7781_v62 = vpop.permute.xlu1 %7780 }
0x2700   :  { %v7783_v7 = vsel %vm608_vm3, %v7781_v62, %v18235_v57 }
0x2701   :  { %v7785_v38 = vsel %vm610_vm4, %v7783_v7, 0 }
0x2702   :  { %v7860_v44 = vand.u32 4294901760, %v7785_v38 }
0x2704   :  { %v7861_v6 = vsub.f32 %v7785_v38, %v7860_v44 }
0x2706   :  { %v7862_v51 = vand.u32 4294901760, %v7861_v6 }
0x2708   :  { %v7863_v43 = vsub.f32 %v7861_v6, %v7862_v51 }
0x270a   :  { %v7864_v35 = vand.u32 4294901760, %v7863_v43 }
0x270c   :  { %14542 = vmatmul.mubr.f32.vlgmr.msra.gmra.mrb[16].mxu0 %v7864_v35 }
0x270d   :  { %16117 = vmatpush3.bf16.msra.mxu0 %v17556_v63  ;;  %14560 = vmatprep.mubr.msk.f32.mxu0 %vm17061_vm0, %v18866_v1 }
0x270e   :  { %16118 = vmatprep.subr.bf16.mxu0 %v17060_v0 }
0x2711   :  { %16120 = vmatpush3.bf16.msra.mxu0 %v17530_v56 }
0x2712   :  { %16121 = vmatprep.subr.bf16.mxu0 %v17060_v0 }
0x2715   :  { %16123 = vmatpush3.bf16.msra.mxu0 %v17532_v40 }
0x2716   :  { %16124 = vmatprep.subr.bf16.mxu0 %v17060_v0 }
0x2719   :  { %16126 = vmatpush3.bf16.msra.mxu0 %v17534_v48 }
0x271a   :  { %16127 = vmatprep.subr.bf16.mxu0 %v17060_v0 }
0x271c   :  { %14561 = vmatmul.mubr.f32.vlgmr.msra.gmra.mrb[16].mxu0 %v7860_v44 }
0x271d   :  { %16129 = vmatpush3.bf16.msra.mxu0 %v17567_v2  ;;  %14579 = vmatprep.mubr.msk.f32.mxu0 %vm17061_vm0, %v18866_v1 }
0x271e   :  { %16130 = vmatprep.subr.bf16.mxu0 %v17060_v0 }
0x2721   :  { %16132 = vmatpush3.bf16.msra.mxu0 %v17536_v22 }
0x2722   :  { %16133 = vmatprep.subr.bf16.mxu0 %v17060_v0 }
0x2725   :  { %16135 = vmatpush3.bf16.msra.mxu0 %v17538_v27 }
0x2726   :  { %16136 = vmatprep.subr.bf16.mxu0 %v17060_v0 }
0x2729   :  { %16138 = vmatpush3.bf16.msra.mxu0 %v17540_v28 }
0x272a   :  { %16139 = vmatprep.subr.bf16.mxu0 %v17060_v0 }
0x272c   :  { %14580 = vmatmul.mubr.f32.vlgmr.msra.gmra.mrb[16].mxu0 %v7861_v6 }
0x272d   :  { %16141 = vmatpush3.bf16.msra.mxu0 %v17509_v5  ;;  %14598 = vmatprep.mubr.msk.f32.mxu0 %vm17061_vm0, %v18866_v1 }
0x272e   :  { %16142 = vmatprep.subr.bf16.mxu0 %v17060_v0 }
0x2731   :  { %16144 = vmatpush3.bf16.msra.mxu0 %v17514_v36 }
0x2732   :  { %16145 = vmatprep.subr.bf16.mxu0 %v17060_v0 }
0x2735   :  { %16147 = vmatpush3.bf16.msra.mxu0 %v17518_v20 }
0x2736   :  { %16148 = vmatprep.subr.bf16.mxu0 %v17060_v0 }
0x2739   :  { %16150 = vmatpush3.bf16.msra.mxu0 %v17522_v21 }
0x273a   :  { %16151 = vmatprep.subr.bf16.mxu0 %v17060_v0 }
0x273c   :  { %14599 = vmatmul.mubr.f32.vlgmr.msra.gmra.mrb[16].mxu0 %v7862_v51 }
0x273d   :  { %16153 = vmatpush3.bf16.msra.mxu0 %v17589_v4  ;;  %14617 = vmatprep.mubr.msk.f32.mxu0 %vm17061_vm0, %v18866_v1 }
0x273e   :  { %16154 = vmatprep.subr.bf16.mxu0 %v17060_v0 }
0x2741   :  { %16156 = vmatpush3.bf16.msra.mxu0 %v17542_v23 }
0x2742   :  { %16157 = vmatprep.subr.bf16.mxu0 %v17060_v0 }
0x2745   :  { %16159 = vmatpush3.bf16.msra.mxu0 %v17544_v9 }
0x2746   :  { %16160 = vmatprep.subr.bf16.mxu0 %v17060_v0 }
0x2749   :  { %16162 = vmatpush3.bf16.msra.mxu0 %v17546_v11 }
0x274a   :  { %16163 = vmatprep.subr.bf16.mxu0 %v17060_v0 }
0x274c   :  { %14618 = vmatmul.mubr.f32.vlgmr.msra.gmra.mrb[16].mxu0 %v7860_v44 }
0x274d   :  { %16165 = vmatpush3.bf16.msra.mxu0 %v17509_v5  ;;  %14636 = vmatprep.mubr.msk.f32.mxu0 %vm17061_vm0, %v18866_v1 }
0x274e   :  { %16166 = vmatprep.subr.bf16.mxu0 %v17060_v0 }
0x2751   :  { %16168 = vmatpush3.bf16.msra.mxu0 %v17514_v36 }
0x2752   :  { %16169 = vmatprep.subr.bf16.mxu0 %v17060_v0 }
0x2755   :  { %16171 = vmatpush3.bf16.msra.mxu0 %v17518_v20 }
0x2756   :  { %16172 = vmatprep.subr.bf16.mxu0 %v17060_v0 }
0x2759   :  { %16174 = vmatpush3.bf16.msra.mxu0 %v17522_v21 }
0x275a   :  { %16211 = vmatprep.subr.bf16.mxu0 %v17060_v0 }
0x275c   :  { %14637 = vmatmul.mubr.f32.vlgmr.msra.gmra.mrb[16].mxu0 %v7860_v44 }
0x275d   :  { %16213 = vmatpush3.bf16.msra.mxu0 %v17396_v24  ;;  %14721 = vmatprep.mubr.msk.f32.mxu0 %vm17061_vm0, %v18866_v1 }
0x275e   :  { %16214 = vmatprep.subr.bf16.mxu0 %v17060_v0 }
0x2761   :  { %16216 = vmatpush3.bf16.msra.mxu0 %v17404_v16 }
0x2762   :  { %16217 = vmatprep.subr.bf16.mxu0 %v17060_v0 }
0x2765   :  { %16219 = vmatpush3.bf16.msra.mxu0 %v17419_v8 }
0x2766   :  { %16220 = vmatprep.subr.bf16.mxu0 %v17060_v0 }
0x2769   :  { %16222 = vmatpush3.bf16.msra.mxu0 %v17429_v10 }
0x276a   :  { %16223 = vmatprep.subr.bf16.mxu0 %v17060_v0 }
0x282f   :  { %v8320_v42 = vpop.f32.mrb[16].mxu0 }
0x2830   :  { %v16587_v33 = vadd.f32 %v18037_v32, %v8320_v42  ;;  %v14638_v55 = vpop.f32.mrb[17].mxu0 }
0x2832   :  { %8331 = vrot.lane.b32.xlu0 %v16587_v33, %s17063_s16  ;;  %v12202_v58 = vmul.f32 -1.442695, %v16587_v33 }
0x2834   :  { %16879 = vpow2.f32 %v12202_v58 }
0x283e   :  { %v16880_v45 = vpop.eup %16879 }
0x283f   :  { %v8327_v46 = vadd.f32 1.0, %v16880_v45 }
0x2841   :  { %16881 = vrcp.f32 %v8327_v46 }
0x284b   :  { %v16882_v29 = vpop.eup %16881 }
0x284c   :  { %v8341_v32 = vsub.f32 1.0, %v16882_v29  ;;  %v8347_v43 = vmul.f32 %v16882_v29, %v18235_v57 }
0x28a4   :  { %v8332_v62 = vpop.permute.xlu0 %8331 }
0x28a5   :  { %v8334_v7 = vmul.f32 %v16882_v29, %v8332_v62 }
0x28a7   :  { %8336 = vrot.lane.b32.xlu1 %v8334_v7, %s17064_s3 }
0x2919   :  { %v8337_v38 = vpop.permute.xlu1 %8336 }
0x291a   :  { %v8339_v44 = vadd.f32 %v16587_v33, %v8337_v38 }
0x291c   :  { %16883 = vtanh.f32 %v8339_v44 }
0x2926   :  { %v16884_v6 = vpop.eup %16883 }
0x2927   :  { %8343 = vrot.lane.b32.xlu0 %v16884_v6, %s17065_s21 }
0x2999   :  { %v8344_v51 = vpop.permute.xlu0 %8343 }
0x299a   :  { %v8346_v35 = vmul.f32 %v8344_v51, %v8341_v32 }
0x299c   :  { %v18431_v42 = vadd.f32 %v8347_v43, %v8346_v35 }
0x299e   :  { %8350 = vrot.lane.b32.xlu1 %v18431_v42, %s17065_s21 }
0x2a10   :  { %v8351_v55 = vpop.permute.xlu1 %8350 }
0x2a11   :  { %v8352_v58 = vsel %vm608_vm3, %v8351_v55, 0 }
0x2a12   :  { %v8423_v45 = vand.u32 4294901760, %v8352_v58 }
0x2a14   :  { %v8424_v46 = vsub.f32 %v8352_v58, %v8423_v45 }
0x2a16   :  { %v8425_v33 = vand.u32 4294901760, %v8424_v46 }
0x2a18   :  { %v8426_v62 = vsub.f32 %v8424_v46, %v8425_v33 }
0x2a1a   :  { %v8427_v7 = vand.u32 4294901760, %v8426_v62 }
0x2a1c   :  { %14648 = vmatmul.mubr.f32.vlgmr.msra.gmra.mrb[16].mxu1 %v8427_v7 }
0x2a1d   :  { %16183 = vmatpush3.bf16.msra.mxu1 %v17639_v26  ;;  %14658 = vmatprep.mubr.msk.f32.mxu1 %vm17061_vm0, %v18866_v1 }
0x2a1e   :  { %16184 = vmatprep.subr.bf16.mxu1 %v17060_v0 }
0x2a21   :  { %16186 = vmatpush3.bf16.msra.mxu1 %v17645_v52 }
0x2a22   :  { %16187 = vmatprep.subr.bf16.mxu1 %v17060_v0 }
0x2a24   :  { %14659 = vmatmul.mubr.f32.vlgmr.msra.gmra.mrb[16].mxu1 %v8423_v45 }
0x2a25   :  { %16189 = vmatpush3.bf16.msra.mxu1 %v17647_v54  ;;  %14669 = vmatprep.mubr.msk.f32.mxu1 %vm17061_vm0, %v18866_v1 }
0x2a26   :  { %16190 = vmatprep.subr.bf16.mxu1 %v17060_v0 }
0x2a29   :  { %16192 = vmatpush3.bf16.msra.mxu1 %v17649_v34 }
0x2a2a   :  { %16193 = vmatprep.subr.bf16.mxu1 %v17060_v0 }
0x2a2c   :  { %14670 = vmatmul.mubr.f32.vlgmr.msra.gmra.mrb[16].mxu1 %v8424_v46 }
0x2a2d   :  { %16195 = vmatpush3.bf16.msra.mxu1 %v17631_v30  ;;  %14680 = vmatprep.mubr.msk.f32.mxu1 %vm17061_vm0, %v18866_v1 }
0x2a2e   :  { %16196 = vmatprep.subr.bf16.mxu1 %v17060_v0 }
0x2a31   :  { %16198 = vmatpush3.bf16.msra.mxu1 %v17635_v3 }
0x2a32   :  { %16199 = vmatprep.subr.bf16.mxu1 %v17060_v0 }
0x2a34   :  { %14681 = vmatmul.mubr.f32.vlgmr.msra.gmra.mrb[16].mxu1 %v8425_v33 }
0x2a35   :  { %16201 = vmatpush3.bf16.msra.mxu1 %v17651_v59  ;;  %14691 = vmatprep.mubr.msk.f32.mxu1 %vm17061_vm0, %v18866_v1 }
0x2a36   :  { %16202 = vmatprep.subr.bf16.mxu1 %v17060_v0 }
0x2a39   :  { %16204 = vmatpush3.bf16.msra.mxu1 %v17653_v60 }
0x2a3a   :  { %16205 = vmatprep.subr.bf16.mxu1 %v17060_v0 }
0x2a3c   :  { %14692 = vmatmul.mubr.f32.vlgmr.msra.gmra.mrb[16].mxu1 %v8423_v45 }
0x2a3d   :  { %16207 = vmatpush3.bf16.msra.mxu1 %v17631_v30  ;;  %14702 = vmatprep.mubr.msk.f32.mxu1 %vm17061_vm0, %v18866_v1 }
0x2a3e   :  { %16208 = vmatprep.subr.bf16.mxu1 %v17060_v0 }
0x2a41   :  { %16210 = vmatpush3.bf16.msra.mxu1 %v17635_v3 }
0x2a42   :  { %16283 = vmatprep.subr.bf16.mxu1 %v17060_v0 }
0x2a44   :  { %14703 = vmatmul.mubr.f32.vlgmr.msra.gmra.mrb[16].mxu1 %v8423_v45 }
0x2a45   :  { %16285 = vmatpush3.bf16.msra.mxu1 %v17509_v5  ;;  %14835 = vmatprep.mubr.msk.f32.mxu1 %vm17061_vm0, %v18866_v1 }
0x2a46   :  { %16286 = vmatprep.subr.bf16.mxu1 %v17060_v0 }
0x2a49   :  { %16288 = vmatpush3.bf16.msra.mxu1 %v17514_v36 }
0x2a4a   :  { %16289 = vmatprep.subr.bf16.mxu1 %v17060_v0 }
0x2a4d   :  { %16291 = vmatpush3.bf16.msra.mxu1 %v17518_v20 }
0x2a4e   :  { %16292 = vmatprep.subr.bf16.mxu1 %v17060_v0 }
0x2a51   :  { %16294 = vmatpush3.bf16.msra.mxu1 %v17522_v21 }
0x2a52   :  { %16295 = vmatprep.subr.bf16.mxu1 %v17060_v0 }
0x2b17   :  { %v8835_v57 = vpop.f32.mrb[16].mxu1 }
0x2b18   :  { %v16588_v29 = vadd.f32 %v18283_v25, %v8835_v57  ;;  %v14704_v38 = vpop.f32.mrb[17].mxu1 }
0x2b1a   :  { %v8839_v44 = vsel %vm608_vm3, %v16588_v29, -inf }
0x2b1b   :  { %8840 = vmax.xlane.f32.xlu0 %v8839_v44 }
0x2ba8   :  { %v8841_v6 = vpop.xlane.xlu0 %8840 }
0x2ba9   :  { %vm8842_vm7 = vcmp.eq.f32.partialorder %v16588_v29, %v8841_v6 }
0x2baa   :  { %v8843_v32 = vsel %vm8842_vm7, %v17319_v31, 32 }
0x2bab   :  { %v8844_v51 = vsel %vm608_vm3, %v8843_v32, 2147483647 }
0x2bac   :  { %v8846_v43 = vshra.s32 %v8844_v51, 16  ;;  %v8845_v55 = vand.u32 65535, %v8844_v51 }
0x2bae   :  { %v8848_v35 = vcvt.s32.f32 %v8846_v43  ;;  %v8847_v45 = vcvt.s32.f32 %v8845_v55 }
0x2bb0   :  { %8849 = vmin.xlane.f32.xlu1 %v8848_v35 }
0x2c3d   :  { %v8850_v58 = vpop.xlane.xlu1 %8849 }
0x2c3e   :  { %vm8851_vm8 = vcmp.eq.f32.partialorder %v8848_v35, %v8850_v58  ;;  %v8856_v33 = vcvt.f32.s32 %v8850_v58 }
0x2c3f   :  { %v8852_v46 = vsel %vm8851_vm8, %v8847_v45, inf }
0x2c40   :  { %8853 = vmin.xlane.f32.xlu0 %v8852_v46  ;;  %v8857_v7 = vshll.u32 %v8856_v33, 16 }
0x2ccd   :  { %v8854_v62 = vpop.xlane.xlu0 %8853 }
0x2cce   :  { %v8855_v57 = vcvt.f32.s32 %v8854_v62 }
0x2cd0   :  { %v8858_v29 = vadd.s32 %v8857_v7, %v8855_v57 }
0x2cd2   :  { %v18482_v38 = vsel %vm8859_vm9, %v8858_v29, %v18291_v13  ;;  %vm8861_vm10 = vcmp.eq.s32.totalorder %v17319_v31, %v8858_v29 }
0x2cd3   :  { %v12203_v44 = vsel %vm8861_vm10, 1.0, %v18866_v1 }
0x2cd4   :  { %v8864_v6 = vsel %vm608_vm3, %v12203_v44, %v18359_v50 }
0x2cd5   :  { %v8866_v32 = vsel %vm610_vm4, %v8864_v6, 0 }
0x2cd6   :  { %v8941_v51 = vand.u32 4294901760, %v8866_v32 }
0x2cd8   :  { %v8942_v43 = vsub.f32 %v8866_v32, %v8941_v51 }
0x2cda   :  { %v8943_v35 = vand.u32 4294901760, %v8942_v43 }
0x2cdc   :  { %v8944_v55 = vsub.f32 %v8942_v43, %v8943_v35 }
0x2cde   :  { %v8945_v58 = vand.u32 4294901760, %v8944_v55 }
0x2ce0   :  { %14722 = vmatmul.mubr.f32.vlgmr.msra.gmra.mrb[18].mxu0 %v8945_v58 }
0x2ce1   :  { %16225 = vmatpush3.bf16.msra.mxu0 %v17278_v53  ;;  %14740 = vmatprep.mubr.msk.f32.mxu0 %vm17061_vm0, %v18866_v1 }
0x2ce2   :  { %16226 = vmatprep.subr.bf16.mxu0 %v17060_v0 }
0x2ce5   :  { %16228 = vmatpush3.bf16.msra.mxu0 %v17293_v61 }
0x2ce6   :  { %16229 = vmatprep.subr.bf16.mxu0 %v17060_v0 }
0x2ce9   :  { %16231 = vmatpush3.bf16.msra.mxu0 %v17330_v39 }
0x2cea   :  { %16232 = vmatprep.subr.bf16.mxu0 %v17060_v0 }
0x2ced   :  { %16234 = vmatpush3.bf16.msra.mxu0 %v17334_v41 }
0x2cee   :  { %16235 = vmatprep.subr.bf16.mxu0 %v17060_v0 }
0x2cf0   :  { %14741 = vmatmul.mubr.f32.vlgmr.msra.gmra.mrb[18].mxu0 %v8941_v51 }
0x2cf1   :  { %16237 = vmatpush3.bf16.msra.mxu0 %v17351_v47  ;;  %14759 = vmatprep.mubr.msk.f32.mxu0 %vm17061_vm0, %v18866_v1 }
0x2cf2   :  { %16238 = vmatprep.subr.bf16.mxu0 %v17060_v0 }
0x2cf5   :  { %16240 = vmatpush3.bf16.msra.mxu0 %v17363_v49 }
0x2cf6   :  { %16241 = vmatprep.subr.bf16.mxu0 %v17060_v0 }
0x2cf9   :  { %16243 = vmatpush3.bf16.msra.mxu0 %v17376_v17 }
0x2cfa   :  { %16244 = vmatprep.subr.bf16.mxu0 %v17060_v0 }
0x2cfd   :  { %16246 = vmatpush3.bf16.msra.mxu0 %v17382_v18 }
0x2cfe   :  { %16247 = vmatprep.subr.bf16.mxu0 %v17060_v0 }
0x2d00   :  { %14760 = vmatmul.mubr.f32.vlgmr.msra.gmra.mrb[18].mxu0 %v8942_v43 }
0x2d01   :  { %16249 = vmatpush3.bf16.msra.mxu0 %v17396_v24  ;;  %14778 = vmatprep.mubr.msk.f32.mxu0 %vm17061_vm0, %v18866_v1 }
0x2d02   :  { %16250 = vmatprep.subr.bf16.mxu0 %v17060_v0 }
0x2d05   :  { %16252 = vmatpush3.bf16.msra.mxu0 %v17404_v16 }
0x2d06   :  { %16253 = vmatprep.subr.bf16.mxu0 %v17060_v0 }
0x2d09   :  { %16255 = vmatpush3.bf16.msra.mxu0 %v17419_v8 }
0x2d0a   :  { %16256 = vmatprep.subr.bf16.mxu0 %v17060_v0 }
0x2d0d   :  { %16258 = vmatpush3.bf16.msra.mxu0 %v17429_v10 }
0x2d0e   :  { %16259 = vmatprep.subr.bf16.mxu0 %v17060_v0 }
0x2d10   :  { %14779 = vmatmul.mubr.f32.vlgmr.msra.gmra.mrb[18].mxu0 %v8943_v35 }
0x2d11   :  { %16261 = vmatpush3.bf16.msra.mxu0 %v17440_v12  ;;  %14797 = vmatprep.mubr.msk.f32.mxu0 %vm17061_vm0, %v18866_v1 }
0x2d12   :  { %16262 = vmatprep.subr.bf16.mxu0 %v17060_v0 }
0x2d15   :  { %16264 = vmatpush3.bf16.msra.mxu0 %v17450_v14 }
0x2d16   :  { %16265 = vmatprep.subr.bf16.mxu0 %v17060_v0 }
0x2d19   :  { %16267 = vmatpush3.bf16.msra.mxu0 %v17462_v15 }
0x2d1a   :  { %16268 = vmatprep.subr.bf16.mxu0 %v17060_v0 }
0x2d1d   :  { %16270 = vmatpush3.bf16.msra.mxu0 %v17470_v19 }
0x2d1e   :  { %16271 = vmatprep.subr.bf16.mxu0 %v17060_v0 }
0x2d20   :  { %14798 = vmatmul.mubr.f32.vlgmr.msra.gmra.mrb[18].mxu0 %v8941_v51 }
0x2d21   :  { %16273 = vmatpush3.bf16.msra.mxu0 %v17396_v24  ;;  %14816 = vmatprep.mubr.msk.f32.mxu0 %vm17061_vm0, %v18866_v1 }
0x2d22   :  { %16274 = vmatprep.subr.bf16.mxu0 %v17060_v0 }
0x2d25   :  { %16276 = vmatpush3.bf16.msra.mxu0 %v17404_v16 }
0x2d26   :  { %16277 = vmatprep.subr.bf16.mxu0 %v17060_v0 }
0x2d29   :  { %16279 = vmatpush3.bf16.msra.mxu0 %v17419_v8 }
0x2d2a   :  { %16280 = vmatprep.subr.bf16.mxu0 %v17060_v0 }
0x2d2d   :  { %16282 = vmatpush3.bf16.msra.mxu0 %v17429_v10 }
0x2d2e   :  { %16355 = vmatprep.subr.bf16.mxu0 %v17060_v0 }
0x2d30   :  { %14817 = vmatmul.mubr.f32.vlgmr.msra.gmra.mrb[18].mxu0 %v8941_v51 }
0x2d31   :  { %16357 = vmatpush3.bf16.msra.mxu0 %v17631_v30  ;;  %14941 = vmatprep.mubr.msk.f32.mxu0 %vm17061_vm0, %v18866_v1 }
0x2d32   :  { %16358 = vmatprep.subr.bf16.mxu0 %v17060_v0 }
0x2d35   :  { %16360 = vmatpush3.bf16.msra.mxu0 %v17635_v3 }
0x2d36   :  { %16361 = vmatprep.subr.bf16.mxu0 %v17060_v0 }
0x2e03   :  { %v9401_v13 = vpop.f32.mrb[18].mxu0 }
0x2e04   :  { %v16589_v45 = vadd.f32 %v9401_v13, %v17494_v37  ;;  %v14818_v46 = vpop.f32.mrb[19].mxu0 }
0x2e06   :  { %9412 = vrot.lane.b32.xlu0 %v16589_v45, %s17063_s16  ;;  %v12204_v33 = vmul.f32 -1.442695, %v16589_v45 }
0x2e08   :  { %16885 = vpow2.f32 %v12204_v33 }
0x2e12   :  { %v16886_v62 = vpop.eup %16885 }
0x2e13   :  { %v9408_v7 = vadd.f32 1.0, %v16886_v62 }
0x2e15   :  { %16887 = vrcp.f32 %v9408_v7 }
0x2e1f   :  { %v16888_v57 = vpop.eup %16887 }
0x2e20   :  { %v9422_v43 = vsub.f32 1.0, %v16888_v57  ;;  %v9428_v55 = vmul.f32 %v16888_v57, %v18359_v50 }
0x2e78   :  { %v9413_v29 = vpop.permute.xlu0 %9412 }
0x2e79   :  { %v9415_v44 = vmul.f32 %v16888_v57, %v9413_v29  ;;  %v18620_v57 = vld [vmem:[%s18860_s5] ss:$0 sm:$0xff] }
0x2e7b   :  { %9417 = vrot.lane.b32.xlu1 %v9415_v44, %s17064_s3 }
0x2eed   :  { %v9418_v6 = vpop.permute.xlu1 %9417 }
0x2eee   :  { %v9420_v32 = vadd.f32 %v16589_v45, %v9418_v6 }
0x2ef0   :  { %16889 = vtanh.f32 %v9420_v32 }
0x2efa   :  { %v16890_v51 = vpop.eup %16889 }
0x2efb   :  { %9424 = vrot.lane.b32.xlu1 %v16890_v51, %s17065_s21 }
0x2f6d   :  { %v9425_v35 = vpop.permute.xlu1 %9424 }
0x2f6e   :  { %v9427_v58 = vmul.f32 %v9425_v35, %v9422_v43 }
0x2f70   :  { %v18550_v13 = vadd.f32 %v9428_v55, %v9427_v58 }
0x2f72   :  { %9431 = vrot.lane.b32.xlu0 %v18550_v13, %s17065_s21 }
0x2fe4   :  { %v9432_v46 = vpop.permute.xlu0 %9431 }
0x2fe5   :  { %v9434_v33 = vsel %vm608_vm3, %v9432_v46, %v18431_v42 }
0x2fe6   :  { %v9436_v45 = vsel %vm610_vm4, %v9434_v33, 0 }
0x2fe7   :  { %v9511_v62 = vand.u32 4294901760, %v9436_v45 }
0x2fe9   :  { %v9512_v7 = vsub.f32 %v9436_v45, %v9511_v62 }
0x2feb   :  { %v9513_v29 = vand.u32 4294901760, %v9512_v7 }
0x2fed   :  { %v9514_v44 = vsub.f32 %v9512_v7, %v9513_v29 }
0x2fef   :  { %v9515_v6 = vand.u32 4294901760, %v9514_v44 }
0x2ff1   :  { %14836 = vmatmul.mubr.f32.vlgmr.msra.gmra.mrb[18].mxu1 %v9515_v6 }
0x2ff2   :  { %16297 = vmatpush3.bf16.msra.mxu1 %v17556_v63  ;;  %14854 = vmatprep.mubr.msk.f32.mxu1 %vm17061_vm0, %v18866_v1 }
0x2ff3   :  { %16298 = vmatprep.subr.bf16.mxu1 %v17060_v0 }
0x2ff6   :  { %16300 = vmatpush3.bf16.msra.mxu1 %v17530_v56 }
0x2ff7   :  { %16301 = vmatprep.subr.bf16.mxu1 %v17060_v0 }
0x2ffa   :  { %16303 = vmatpush3.bf16.msra.mxu1 %v17532_v40 }
0x2ffb   :  { %16304 = vmatprep.subr.bf16.mxu1 %v17060_v0 }
0x2ffe   :  { %16306 = vmatpush3.bf16.msra.mxu1 %v17534_v48 }
0x2fff   :  { %16307 = vmatprep.subr.bf16.mxu1 %v17060_v0 }
0x3001   :  { %14855 = vmatmul.mubr.f32.vlgmr.msra.gmra.mrb[18].mxu1 %v9511_v62 }
0x3002   :  { %16309 = vmatpush3.bf16.msra.mxu1 %v17567_v2  ;;  %14873 = vmatprep.mubr.msk.f32.mxu1 %vm17061_vm0, %v18866_v1 }
0x3003   :  { %16310 = vmatprep.subr.bf16.mxu1 %v17060_v0 }
0x3006   :  { %16312 = vmatpush3.bf16.msra.mxu1 %v17536_v22 }
0x3007   :  { %16313 = vmatprep.subr.bf16.mxu1 %v17060_v0 }
0x300a   :  { %16315 = vmatpush3.bf16.msra.mxu1 %v17538_v27 }
0x300b   :  { %16316 = vmatprep.subr.bf16.mxu1 %v17060_v0 }
0x300e   :  { %16318 = vmatpush3.bf16.msra.mxu1 %v17540_v28 }
0x300f   :  { %16319 = vmatprep.subr.bf16.mxu1 %v17060_v0 }
0x3011   :  { %14874 = vmatmul.mubr.f32.vlgmr.msra.gmra.mrb[18].mxu1 %v9512_v7 }
0x3012   :  { %16321 = vmatpush3.bf16.msra.mxu1 %v17509_v5  ;;  %14892 = vmatprep.mubr.msk.f32.mxu1 %vm17061_vm0, %v18866_v1 }
0x3013   :  { %16322 = vmatprep.subr.bf16.mxu1 %v17060_v0 }
0x3016   :  { %16324 = vmatpush3.bf16.msra.mxu1 %v17514_v36 }
0x3017   :  { %16325 = vmatprep.subr.bf16.mxu1 %v17060_v0 }
0x301a   :  { %16327 = vmatpush3.bf16.msra.mxu1 %v17518_v20 }
0x301b   :  { %16328 = vmatprep.subr.bf16.mxu1 %v17060_v0 }
0x301e   :  { %16330 = vmatpush3.bf16.msra.mxu1 %v17522_v21 }
0x301f   :  { %16331 = vmatprep.subr.bf16.mxu1 %v17060_v0 }
0x3021   :  { %14893 = vmatmul.mubr.f32.vlgmr.msra.gmra.mrb[18].mxu1 %v9513_v29 }
0x3022   :  { %16333 = vmatpush3.bf16.msra.mxu1 %v17589_v4  ;;  %14911 = vmatprep.mubr.msk.f32.mxu1 %vm17061_vm0, %v18866_v1 }
0x3023   :  { %16334 = vmatprep.subr.bf16.mxu1 %v17060_v0 }
0x3026   :  { %16336 = vmatpush3.bf16.msra.mxu1 %v17542_v23 }
0x3027   :  { %16337 = vmatprep.subr.bf16.mxu1 %v17060_v0 }
0x302a   :  { %16339 = vmatpush3.bf16.msra.mxu1 %v17544_v9 }
0x302b   :  { %16340 = vmatprep.subr.bf16.mxu1 %v17060_v0 }
0x302e   :  { %16342 = vmatpush3.bf16.msra.mxu1 %v17546_v11 }
0x302f   :  { %16343 = vmatprep.subr.bf16.mxu1 %v17060_v0 }
0x3031   :  { %14912 = vmatmul.mubr.f32.vlgmr.msra.gmra.mrb[18].mxu1 %v9511_v62 }
0x3032   :  { %16345 = vmatpush3.bf16.msra.mxu1 %v17509_v5  ;;  %14930 = vmatprep.mubr.msk.f32.mxu1 %vm17061_vm0, %v18866_v1 }
0x3033   :  { %16346 = vmatprep.subr.bf16.mxu1 %v17060_v0 }
0x3036   :  { %16348 = vmatpush3.bf16.msra.mxu1 %v17514_v36 }
0x3037   :  { %16349 = vmatprep.subr.bf16.mxu1 %v17060_v0 }
0x303a   :  { %16351 = vmatpush3.bf16.msra.mxu1 %v17518_v20 }
0x303b   :  { %16352 = vmatprep.subr.bf16.mxu1 %v17060_v0 }
0x303e   :  { %16354 = vmatpush3.bf16.msra.mxu1 %v17522_v21 }
0x303f   :  { %16391 = vmatprep.subr.bf16.mxu1 %v17060_v0 }
0x3041   :  { %14931 = vmatmul.mubr.f32.vlgmr.msra.gmra.mrb[18].mxu1 %v9511_v62 }
0x3042   :  { %16393 = vmatpush3.bf16.msra.mxu1 %v17396_v24  ;;  %15015 = vmatprep.mubr.msk.f32.mxu1 %vm17061_vm0, %v18866_v1 }
0x3043   :  { %16394 = vmatprep.subr.bf16.mxu1 %v17060_v0 }
0x3046   :  { %16396 = vmatpush3.bf16.msra.mxu1 %v17404_v16 }
0x3047   :  { %16397 = vmatprep.subr.bf16.mxu1 %v17060_v0 }
0x304a   :  { %16399 = vmatpush3.bf16.msra.mxu1 %v17419_v8 }
0x304b   :  { %16400 = vmatprep.subr.bf16.mxu1 %v17060_v0 }
0x304e   :  { %16402 = vmatpush3.bf16.msra.mxu1 %v17429_v10 }
0x304f   :  { %16403 = vmatprep.subr.bf16.mxu1 %v17060_v0 }
0x3114   :  { %v9971_v50 = vpop.f32.mrb[18].mxu1 }
0x3115   :  { %v16590_v32 = vadd.f32 %v18620_v57, %v9971_v50  ;;  %v14932_v51 = vpop.f32.mrb[19].mxu1 }
0x3117   :  { %9982 = vrot.lane.b32.xlu1 %v16590_v32, %s17063_s16  ;;  %v12205_v43 = vmul.f32 -1.442695, %v16590_v32 }
0x3119   :  { %16891 = vpow2.f32 %v12205_v43 }
0x3123   :  { %v16892_v35 = vpop.eup %16891 }
0x3124   :  { %v9978_v55 = vadd.f32 1.0, %v16892_v35 }
0x3126   :  { %16893 = vrcp.f32 %v9978_v55 }
0x3130   :  { %v16894_v58 = vpop.eup %16893 }
0x3131   :  { %v9992_v29 = vsub.f32 1.0, %v16894_v58  ;;  %v9998_v6 = vmul.f32 %v16894_v58, %v18431_v42 }
0x3189   :  { %v9983_v46 = vpop.permute.xlu1 %9982 }
0x318a   :  { %v9985_v33 = vmul.f32 %v16894_v58, %v9983_v46 }
0x318c   :  { %9987 = vrot.lane.b32.xlu0 %v9985_v33, %s17064_s3 }
0x31fe   :  { %v9988_v45 = vpop.permute.xlu0 %9987 }
0x31ff   :  { %v9990_v62 = vadd.f32 %v16590_v32, %v9988_v45 }
0x3201   :  { %16895 = vtanh.f32 %v9990_v62 }
0x320b   :  { %v16896_v7 = vpop.eup %16895 }
0x320c   :  { %9994 = vrot.lane.b32.xlu1 %v16896_v7, %s17065_s21 }
0x327e   :  { %v9995_v44 = vpop.permute.xlu1 %9994 }
0x327f   :  { %v9997_v50 = vmul.f32 %v9995_v44, %v9992_v29 }
0x3281   :  { %v18627_v51 = vadd.f32 %v9998_v6, %v9997_v50 }
0x3283   :  { %10001 = vrot.lane.b32.xlu0 %v18627_v51, %s17065_s21 }
0x32f5   :  { %v10002_v43 = vpop.permute.xlu0 %10001 }
0x32f6   :  { %v10003_v35 = vsel %vm608_vm3, %v10002_v43, 0 }
0x32f7   :  { %v10074_v55 = vand.u32 4294901760, %v10003_v35 }
0x32f9   :  { %v10075_v46 = vsub.f32 %v10003_v35, %v10074_v55 }
0x32fb   :  { %v10076_v32 = vand.u32 4294901760, %v10075_v46 }
0x32fd   :  { %v10077_v33 = vsub.f32 %v10075_v46, %v10076_v32 }
0x32ff   :  { %v10078_v45 = vand.u32 4294901760, %v10077_v33 }
0x3301   :  { %14942 = vmatmul.mubr.f32.vlgmr.msra.gmra.mrb[20].mxu0 %v10078_v45 }
0x3302   :  { %16363 = vmatpush3.bf16.msra.mxu0 %v17639_v26  ;;  %14952 = vmatprep.mubr.msk.f32.mxu0 %vm17061_vm0, %v18866_v1 }
0x3303   :  { %16364 = vmatprep.subr.bf16.mxu0 %v17060_v0 }
0x3306   :  { %16366 = vmatpush3.bf16.msra.mxu0 %v17645_v52 }
0x3307   :  { %16367 = vmatprep.subr.bf16.mxu0 %v17060_v0 }
0x3309   :  { %14953 = vmatmul.mubr.f32.vlgmr.msra.gmra.mrb[20].mxu0 %v10074_v55 }
0x330a   :  { %16369 = vmatpush3.bf16.msra.mxu0 %v17647_v54  ;;  %14963 = vmatprep.mubr.msk.f32.mxu0 %vm17061_vm0, %v18866_v1 }
0x330b   :  { %16370 = vmatprep.subr.bf16.mxu0 %v17060_v0 }
0x330e   :  { %16372 = vmatpush3.bf16.msra.mxu0 %v17649_v34 }
0x330f   :  { %16373 = vmatprep.subr.bf16.mxu0 %v17060_v0 }
0x3311   :  { %14964 = vmatmul.mubr.f32.vlgmr.msra.gmra.mrb[20].mxu0 %v10075_v46 }
0x3312   :  { %16375 = vmatpush3.bf16.msra.mxu0 %v17631_v30  ;;  %14974 = vmatprep.mubr.msk.f32.mxu0 %vm17061_vm0, %v18866_v1 }
0x3313   :  { %16376 = vmatprep.subr.bf16.mxu0 %v17060_v0 }
0x3316   :  { %16378 = vmatpush3.bf16.msra.mxu0 %v17635_v3 }
0x3317   :  { %16379 = vmatprep.subr.bf16.mxu0 %v17060_v0 }
0x3319   :  { %14975 = vmatmul.mubr.f32.vlgmr.msra.gmra.mrb[20].mxu0 %v10076_v32 }
0x331a   :  { %16381 = vmatpush3.bf16.msra.mxu0 %v17651_v59  ;;  %14985 = vmatprep.mubr.msk.f32.mxu0 %vm17061_vm0, %v18866_v1 }
0x331b   :  { %16382 = vmatprep.subr.bf16.mxu0 %v17060_v0 }
0x331e   :  { %16384 = vmatpush3.bf16.msra.mxu0 %v17653_v60 }
0x331f   :  { %16385 = vmatprep.subr.bf16.mxu0 %v17060_v0 }
0x3321   :  { %14986 = vmatmul.mubr.f32.vlgmr.msra.gmra.mrb[20].mxu0 %v10074_v55 }
0x3322   :  { %16387 = vmatpush3.bf16.msra.mxu0 %v17631_v30  ;;  %14996 = vmatprep.mubr.msk.f32.mxu0 %vm17061_vm0, %v18866_v1 }
0x3323   :  { %16388 = vmatprep.subr.bf16.mxu0 %v17060_v0 }
0x3326   :  { %16390 = vmatpush3.bf16.msra.mxu0 %v17635_v3 }
0x3327   :  { %16463 = vmatprep.subr.bf16.mxu0 %v17060_v0 }
0x3329   :  { %14997 = vmatmul.mubr.f32.vlgmr.msra.gmra.mrb[20].mxu0 %v10074_v55 }
0x332a   :  { %16465 = vmatpush3.bf16.msra.mxu0 %v17509_v5  ;;  %15129 = vmatprep.mubr.msk.f32.mxu0 %vm17061_vm0, %v18866_v1 }
0x332b   :  { %16466 = vmatprep.subr.bf16.mxu0 %v17060_v0 }
0x332e   :  { %16468 = vmatpush3.bf16.msra.mxu0 %v17514_v36 }
0x332f   :  { %16469 = vmatprep.subr.bf16.mxu0 %v17060_v0 }
0x3332   :  { %16471 = vmatpush3.bf16.msra.mxu0 %v17518_v20 }
0x3333   :  { %16472 = vmatprep.subr.bf16.mxu0 %v17060_v0 }
0x3336   :  { %16474 = vmatpush3.bf16.msra.mxu0 %v17522_v21 }
0x3337   :  { %16475 = vmatprep.subr.bf16.mxu0 %v17060_v0 }
0x33fc   :  { %v10486_v42 = vpop.f32.mrb[20].mxu0 }
0x33fd   :  { %v16591_v58 = vadd.f32 %v18283_v25, %v10486_v42  ;;  %v14998_v62 = vpop.f32.mrb[21].mxu0 }
0x33ff   :  { %v10490_v7 = vsel %vm608_vm3, %v16591_v58, -inf }
0x3400   :  { %10491 = vmax.xlane.f32.xlu1 %v10490_v7 }
0x348d   :  { %v10492_v29 = vpop.xlane.xlu1 %10491 }
0x348e   :  { %vm10493_vm11 = vcmp.eq.f32.partialorder %v16591_v58, %v10492_v29 }
0x348f   :  { %v10494_v44 = vsel %vm10493_vm11, %v17319_v31, 32 }
0x3490   :  { %v10495_v6 = vsel %vm608_vm3, %v10494_v44, 2147483647 }
0x3491   :  { %v10497_v50 = vshra.s32 %v10495_v6, 16  ;;  %v10496_v35 = vand.u32 65535, %v10495_v6 }
0x3493   :  { %v10499_v43 = vcvt.s32.f32 %v10497_v50  ;;  %v10498_v46 = vcvt.s32.f32 %v10496_v35 }
0x3495   :  { %10500 = vmin.xlane.f32.xlu0 %v10499_v43 }
0x3522   :  { %v10501_v55 = vpop.xlane.xlu0 %10500 }
0x3523   :  { %vm10502_vm12 = vcmp.eq.f32.partialorder %v10499_v43, %v10501_v55  ;;  %v10507_v25 = vcvt.f32.s32 %v10501_v55 }
0x3524   :  { %v10503_v32 = vsel %vm10502_vm12, %v10498_v46, inf }
0x3525   :  { %10504 = vmin.xlane.f32.xlu0 %v10503_v32  ;;  %v10508_v45 = vshll.u32 %v10507_v25, 16 }
0x35b2   :  { %v10505_v33 = vpop.xlane.xlu0 %10504 }
0x35b3   :  { %v10506_v42 = vcvt.f32.s32 %v10505_v33 }
0x35b5   :  { %v10509_v58 = vadd.s32 %v10508_v45, %v10506_v42 }
0x35b7   :  { %vm10512_vm14 = vcmp.eq.s32.totalorder %v17319_v31, %v10509_v58  ;;  %v18679_v62 = vsel %vm10510_vm13, %v10509_v58, %v18482_v38 }
0x35b8   :  { %v12206_v7 = vsel %vm10512_vm14, 1.0, %v18866_v1 }
0x35b9   :  { %v10515_v29 = vsel %vm608_vm3, %v12206_v7, %v18550_v13 }
0x35ba   :  { %v10517_v44 = vsel %vm610_vm4, %v10515_v29, 0 }
0x35bb   :  { %v10592_v6 = vand.u32 4294901760, %v10517_v44 }
0x35bd   :  { %v10593_v50 = vsub.f32 %v10517_v44, %v10592_v6 }
0x35bf   :  { %v10594_v43 = vand.u32 4294901760, %v10593_v50 }
0x35c1   :  { %v10595_v35 = vsub.f32 %v10593_v50, %v10594_v43 }
0x35c3   :  { %v10596_v55 = vand.u32 4294901760, %v10595_v35 }
0x35c5   :  { %15016 = vmatmul.mubr.f32.vlgmr.msra.gmra.mrb[20].mxu1 %v10596_v55 }
0x35c6   :  { %16405 = vmatpush3.bf16.msra.mxu1 %v17278_v53  ;;  %15034 = vmatprep.mubr.msk.f32.mxu1 %vm17061_vm0, %v18866_v1 }
0x35c7   :  { %16406 = vmatprep.subr.bf16.mxu1 %v17060_v0 }
0x35ca   :  { %16408 = vmatpush3.bf16.msra.mxu1 %v17293_v61 }
0x35cb   :  { %16409 = vmatprep.subr.bf16.mxu1 %v17060_v0 }
0x35ce   :  { %16411 = vmatpush3.bf16.msra.mxu1 %v17330_v39 }
0x35cf   :  { %16412 = vmatprep.subr.bf16.mxu1 %v17060_v0 }
0x35d2   :  { %16414 = vmatpush3.bf16.msra.mxu1 %v17334_v41 }
0x35d3   :  { %16415 = vmatprep.subr.bf16.mxu1 %v17060_v0 }
0x35d5   :  { %15035 = vmatmul.mubr.f32.vlgmr.msra.gmra.mrb[20].mxu1 %v10592_v6 }
0x35d6   :  { %16417 = vmatpush3.bf16.msra.mxu1 %v17351_v47  ;;  %15053 = vmatprep.mubr.msk.f32.mxu1 %vm17061_vm0, %v18866_v1 }
0x35d7   :  { %16418 = vmatprep.subr.bf16.mxu1 %v17060_v0 }
0x35da   :  { %16420 = vmatpush3.bf16.msra.mxu1 %v17363_v49 }
0x35db   :  { %16421 = vmatprep.subr.bf16.mxu1 %v17060_v0 }
0x35de   :  { %16423 = vmatpush3.bf16.msra.mxu1 %v17376_v17 }
0x35df   :  { %16424 = vmatprep.subr.bf16.mxu1 %v17060_v0 }
0x35e2   :  { %16426 = vmatpush3.bf16.msra.mxu1 %v17382_v18 }
0x35e3   :  { %16427 = vmatprep.subr.bf16.mxu1 %v17060_v0 }
0x35e5   :  { %15054 = vmatmul.mubr.f32.vlgmr.msra.gmra.mrb[20].mxu1 %v10593_v50 }
0x35e6   :  { %16429 = vmatpush3.bf16.msra.mxu1 %v17396_v24  ;;  %15072 = vmatprep.mubr.msk.f32.mxu1 %vm17061_vm0, %v18866_v1 }
0x35e7   :  { %16430 = vmatprep.subr.bf16.mxu1 %v17060_v0 }
0x35ea   :  { %16432 = vmatpush3.bf16.msra.mxu1 %v17404_v16 }
0x35eb   :  { %16433 = vmatprep.subr.bf16.mxu1 %v17060_v0 }
0x35ee   :  { %16435 = vmatpush3.bf16.msra.mxu1 %v17419_v8 }
0x35ef   :  { %16436 = vmatprep.subr.bf16.mxu1 %v17060_v0 }
0x35f2   :  { %16438 = vmatpush3.bf16.msra.mxu1 %v17429_v10 }
0x35f3   :  { %16439 = vmatprep.subr.bf16.mxu1 %v17060_v0 }
0x35f5   :  { %15073 = vmatmul.mubr.f32.vlgmr.msra.gmra.mrb[20].mxu1 %v10594_v43 }
0x35f6   :  { %16441 = vmatpush3.bf16.msra.mxu1 %v17440_v12  ;;  %15091 = vmatprep.mubr.msk.f32.mxu1 %vm17061_vm0, %v18866_v1 }
0x35f7   :  { %16442 = vmatprep.subr.bf16.mxu1 %v17060_v0 }
0x35fa   :  { %16444 = vmatpush3.bf16.msra.mxu1 %v17450_v14 }
0x35fb   :  { %16445 = vmatprep.subr.bf16.mxu1 %v17060_v0 }
0x35fe   :  { %16447 = vmatpush3.bf16.msra.mxu1 %v17462_v15 }
0x35ff   :  { %16448 = vmatprep.subr.bf16.mxu1 %v17060_v0 }
0x3602   :  { %16450 = vmatpush3.bf16.msra.mxu1 %v17470_v19 }
0x3603   :  { %16451 = vmatprep.subr.bf16.mxu1 %v17060_v0 }
0x3605   :  { %15092 = vmatmul.mubr.f32.vlgmr.msra.gmra.mrb[20].mxu1 %v10592_v6 }
0x3606   :  { %16453 = vmatpush3.bf16.msra.mxu1 %v17396_v24  ;;  %15110 = vmatprep.mubr.msk.f32.mxu1 %vm17061_vm0, %v18866_v1 }
0x3607   :  { %16454 = vmatprep.subr.bf16.mxu1 %v17060_v0 }
0x360a   :  { %16456 = vmatpush3.bf16.msra.mxu1 %v17404_v16 }
0x360b   :  { %16457 = vmatprep.subr.bf16.mxu1 %v17060_v0 }
0x360e   :  { %16459 = vmatpush3.bf16.msra.mxu1 %v17419_v8 }
0x360f   :  { %16460 = vmatprep.subr.bf16.mxu1 %v17060_v0 }
0x3612   :  { %16462 = vmatpush3.bf16.msra.mxu1 %v17429_v10 }
0x3613   :  { %16535 = vmatprep.subr.bf16.mxu1 %v17060_v0 }
0x3615   :  { %15111 = vmatmul.mubr.f32.vlgmr.msra.gmra.mrb[20].mxu1 %v10592_v6 }
0x3616   :  { %16537 = vmatpush3.bf16.msra.mxu1 %v17631_v30  ;;  %15235 = vmatprep.mubr.msk.f32.mxu1 %vm17061_vm0, %v18866_v1 }
0x3617   :  { %16538 = vmatprep.subr.bf16.mxu1 %v17060_v0 }
0x361a   :  { %16540 = vmatpush3.bf16.msra.mxu1 %v17635_v3 }
0x361b   :  { %16541 = vmatprep.subr.bf16.mxu1 %v17060_v0 }
0x36e8   :  { %v11052_v53 = vpop.f32.mrb[20].mxu1 }
0x36e9   :  { %v16592_v61 = vadd.f32 %v11052_v53, %v17494_v37  ;;  %v15112_v39 = vpop.f32.mrb[21].mxu1 }
0x36eb   :  { %11063 = vrot.lane.b32.xlu1 %v16592_v61, %s17063_s16  ;;  %v12207_v41 = vmul.f32 -1.442695, %v16592_v61 }
0x36ed   :  { %16897 = vpow2.f32 %v12207_v41 }
0x36f7   :  { %v16898_v47 = vpop.eup %16897 }
0x36f8   :  { %v11059_v49 = vadd.f32 1.0, %v16898_v47 }
0x36fa   :  { %16899 = vrcp.f32 %v11059_v49 }
0x3704   :  { %v16900_v17 = vpop.eup %16899 }
0x3705   :  { %v11073_v12 = vsub.f32 1.0, %v16900_v17  ;;  %v11079_v15 = vmul.f32 %v16900_v17, %v18550_v13 }
0x375d   :  { %v11064_v18 = vpop.permute.xlu1 %11063 }
0x375e   :  { %v11066_v24 = vmul.f32 %v16900_v17, %v11064_v18 }
0x3760   :  { %11068 = vrot.lane.b32.xlu0 %v11066_v24, %s17064_s3 }
0x37d2   :  { %v11069_v16 = vpop.permute.xlu0 %11068 }
0x37d3   :  { %v11071_v8 = vadd.f32 %v16592_v61, %v11069_v16 }
0x37d5   :  { %16901 = vtanh.f32 %v11071_v8 }
0x37df   :  { %v16902_v10 = vpop.eup %16901 }
0x37e0   :  { %11075 = vrot.lane.b32.xlu1 %v16902_v10, %s17065_s21 }
0x3852   :  { %v11076_v14 = vpop.permute.xlu1 %11075 }
0x3853   :  { %v11078_v19 = vmul.f32 %v11076_v14, %v11073_v12 }
0x3855   :  { %v11080_v37 = vadd.f32 %v11079_v15, %v11078_v19 }
0x3857   :  { %11082 = vrot.lane.b32.xlu1 %v11080_v37, %s17065_s21 }
0x38c9   :  { %v11083_v38 = vpop.permute.xlu1 %11082 }
0x38ca   :  { %v11085_v46 = vsel %vm608_vm3, %v11083_v38, %v18627_v51 }
0x38cb   :  { %v11087_v32 = vsel %vm610_vm4, %v11085_v46, 0 }
0x38cc   :  { %v11162_v25 = vand.u32 4294901760, %v11087_v32 }
0x38ce   :  { %v11163_v33 = vsub.f32 %v11087_v32, %v11162_v25 }
0x38d0   :  { %v11164_v45 = vand.u32 4294901760, %v11163_v33 }
0x38d2   :  { %v11165_v42 = vsub.f32 %v11163_v33, %v11164_v45 }
0x38d4   :  { %v11166_v58 = vand.u32 4294901760, %v11165_v42 }
0x38d6   :  { %15130 = vmatmul.mubr.f32.vlgmr.msra.gmra.mrb[22].mxu0 %v11166_v58 }
0x38d7   :  { %16477 = vmatpush3.bf16.msra.mxu0 %v17556_v63  ;;  %15148 = vmatprep.mubr.msk.f32.mxu0 %vm17061_vm0, %v18866_v1 }
0x38d8   :  { %16478 = vmatprep.subr.bf16.mxu0 %v17060_v0 }
0x38db   :  { %16480 = vmatpush3.bf16.msra.mxu0 %v17530_v56 }
0x38dc   :  { %16481 = vmatprep.subr.bf16.mxu0 %v17060_v0 }
0x38df   :  { %16483 = vmatpush3.bf16.msra.mxu0 %v17532_v40 }
0x38e0   :  { %16484 = vmatprep.subr.bf16.mxu0 %v17060_v0 }
0x38e3   :  { %16486 = vmatpush3.bf16.msra.mxu0 %v17534_v48 }
0x38e4   :  { %16487 = vmatprep.subr.bf16.mxu0 %v17060_v0 }
0x38e6   :  { %15149 = vmatmul.mubr.f32.vlgmr.msra.gmra.mrb[22].mxu0 %v11162_v25 }
0x38e7   :  { %16489 = vmatpush3.bf16.msra.mxu0 %v17567_v2  ;;  %15167 = vmatprep.mubr.msk.f32.mxu0 %vm17061_vm0, %v18866_v1 }
0x38e8   :  { %16490 = vmatprep.subr.bf16.mxu0 %v17060_v0 }
0x38eb   :  { %16492 = vmatpush3.bf16.msra.mxu0 %v17536_v22 }
0x38ec   :  { %16493 = vmatprep.subr.bf16.mxu0 %v17060_v0 }
0x38ef   :  { %16495 = vmatpush3.bf16.msra.mxu0 %v17538_v27 }
0x38f0   :  { %16496 = vmatprep.subr.bf16.mxu0 %v17060_v0 }
0x38f3   :  { %16498 = vmatpush3.bf16.msra.mxu0 %v17540_v28 }
0x38f4   :  { %16499 = vmatprep.subr.bf16.mxu0 %v17060_v0 }
0x38f6   :  { %15168 = vmatmul.mubr.f32.vlgmr.msra.gmra.mrb[22].mxu0 %v11163_v33 }
0x38f7   :  { %16501 = vmatpush3.bf16.msra.mxu0 %v17509_v5  ;;  %15186 = vmatprep.mubr.msk.f32.mxu0 %vm17061_vm0, %v18866_v1 }
0x38f8   :  { %16502 = vmatprep.subr.bf16.mxu0 %v17060_v0 }
0x38fb   :  { %16504 = vmatpush3.bf16.msra.mxu0 %v17514_v36 }
0x38fc   :  { %16505 = vmatprep.subr.bf16.mxu0 %v17060_v0 }
0x38ff   :  { %16507 = vmatpush3.bf16.msra.mxu0 %v17518_v20 }
0x3900   :  { %16508 = vmatprep.subr.bf16.mxu0 %v17060_v0 }
0x3903   :  { %16510 = vmatpush3.bf16.msra.mxu0 %v17522_v21 }
0x3904   :  { %16511 = vmatprep.subr.bf16.mxu0 %v17060_v0 }
0x3906   :  { %15187 = vmatmul.mubr.f32.vlgmr.msra.gmra.mrb[22].mxu0 %v11164_v45 }
0x3907   :  { %16513 = vmatpush3.bf16.msra.mxu0 %v17589_v4  ;;  %15205 = vmatprep.mubr.msk.f32.mxu0 %vm17061_vm0, %v18866_v1 }
0x3908   :  { %16514 = vmatprep.subr.bf16.mxu0 %v17060_v0 }
0x390b   :  { %16516 = vmatpush3.bf16.msra.mxu0 %v17542_v23 }
0x390c   :  { %16517 = vmatprep.subr.bf16.mxu0 %v17060_v0 }
0x390f   :  { %16519 = vmatpush3.bf16.msra.mxu0 %v17544_v9 }
0x3910   :  { %16520 = vmatprep.subr.bf16.mxu0 %v17060_v0 }
0x3913   :  { %16522 = vmatpush3.bf16.msra.mxu0 %v17546_v11 }
0x3914   :  { %16523 = vmatprep.subr.bf16.mxu0 %v17060_v0 }
0x3916   :  { %15206 = vmatmul.mubr.f32.vlgmr.msra.gmra.mrb[22].mxu0 %v11162_v25 }
0x3917   :  { %16525 = vmatpush3.bf16.msra.mxu0 %v17509_v5  ;;  %15224 = vmatprep.mubr.msk.f32.mxu0 %vm17061_vm0, %v18866_v1 }
0x3918   :  { %16526 = vmatprep.subr.bf16.mxu0 %v17060_v0 }
0x391b   :  { %16528 = vmatpush3.bf16.msra.mxu0 %v17514_v36 }
0x391c   :  { %16529 = vmatprep.subr.bf16.mxu0 %v17060_v0 }
0x391f   :  { %16531 = vmatpush3.bf16.msra.mxu0 %v17518_v20 }
0x3920   :  { %16532 = vmatprep.subr.bf16.mxu0 %v17060_v0 }
0x3923   :  { %16534 = vmatpush3.bf16.msra.mxu0 %v17522_v21 }
0x3926   :  { %15225 = vmatmul.mubr.f32.vlgmr.msra.gmra.mrb[22].mxu0 %v11162_v25 }
0x39f9   :  { %v11622_v56 = vpop.f32.mrb[22].mxu0 }
0x39fa   :  { %v16593_v40 = vadd.f32 %v18620_v57, %v11622_v56  ;;  %v15226_v5 = vpop.f32.mrb[23].mxu0 }
0x39fc   :  { %11633 = vrot.lane.b32.xlu0 %v16593_v40, %s17063_s16  ;;  %v12208_v48 = vmul.f32 -1.442695, %v16593_v40 }
0x39fe   :  { %16903 = vpow2.f32 %v12208_v48 }
0x3a08   :  { %v16904_v22 = vpop.eup %16903 }
0x3a09   :  { %v11629_v27 = vadd.f32 1.0, %v16904_v22 }
0x3a0b   :  { %16905 = vrcp.f32 %v11629_v27 }
0x3a15   :  { %v16906_v36 = vpop.eup %16905 }
0x3a16   :  { %v11643_v11 = vsub.f32 1.0, %v16906_v36  ;;  %v11649_v2 = vmul.f32 %v16906_v36, %v18627_v51 }
0x3a6e   :  { %v11634_v28 = vpop.permute.xlu0 %11633 }
0x3a6f   :  { %v11636_v23 = vmul.f32 %v16906_v36, %v11634_v28 }
0x3a71   :  { %11638 = vrot.lane.b32.xlu1 %v11636_v23, %s17064_s3 }
0x3ae3   :  { %v11639_v20 = vpop.permute.xlu1 %11638 }
0x3ae4   :  { %v11641_v9 = vadd.f32 %v16593_v40, %v11639_v20 }
0x3ae6   :  { %16907 = vtanh.f32 %v11641_v9 }
0x3af0   :  { %v16908_v21 = vpop.eup %16907 }
0x3af1   :  { %11645 = vrot.lane.b32.xlu0 %v16908_v21, %s17065_s21 }
0x3b63   :  { %v11646_v63 = vpop.permute.xlu0 %11645 }
0x3b64   :  { %v11648_v4 = vmul.f32 %v11646_v63, %v11643_v11 }
0x3b66   :  { %v11650_v13 = vadd.f32 %v11649_v2, %v11648_v4 }
0x3b68   :  { %11652 = vrot.lane.b32.xlu1 %v11650_v13, %s17065_s21 }
0x3bda   :  { %v11653_v57 = vpop.permute.xlu1 %11652 }
0x3bdb   :  { %v11654_v7 = vsel %vm608_vm3, %v11653_v57, 0 }
0x3bdc   :  { %v11725_v29 = vand.u32 4294901760, %v11654_v7 }
0x3bde   :  { %v11726_v44 = vsub.f32 %v11654_v7, %v11725_v29 }
0x3be0   :  { %v11727_v6 = vand.u32 4294901760, %v11726_v44 }
0x3be2   :  { %v11728_v50 = vsub.f32 %v11726_v44, %v11727_v6 }
0x3be4   :  { %v11729_v43 = vand.u32 4294901760, %v11728_v50 }
0x3be6   :  { %15236 = vmatmul.mubr.f32.vlgmr.msra.gmra.mrb[22].mxu1 %v11729_v43 }
0x3be7   :  { %16543 = vmatpush3.bf16.msra.mxu1 %v17639_v26  ;;  %15246 = vmatprep.mubr.msk.f32.mxu1 %vm17061_vm0, %v18866_v1 }
0x3be8   :  { %16544 = vmatprep.subr.bf16.mxu1 %v17060_v0 }
0x3beb   :  { %16546 = vmatpush3.bf16.msra.mxu1 %v17645_v52  ;;  %v16912_v52 = vld [vmem:[%s18862_s7] ss:$0 sm:$0xff]  ;;  %s17066_s7 = smov [#allocation11]  }
0x3bec   :  { %16547 = vmatprep.subr.bf16.mxu1 %v17060_v0  ;;  %s12171_s22 = sshll.u32 %s17066_s7, 4  ;;  %s12172_s22 = int_to_ptr.vmem [resolvable:$true] %s12171_s22 }
0x3bed   :  { %s17023_s10 = scalar_lea.vmem %s12172_s22, 128  ;;  %p17028_p13 = scmp.lt.s32.totalorder %s12172_s22, %s12172_s22 }
0x3bee   :  { %15247 = vmatmul.mubr.f32.vlgmr.msra.gmra.mrb[22].mxu1 %v11725_v29  ;;  %p17024_p12 = scmp.ne.s32.totalorder %s12172_s22, %s17023_s10  ;;  %p17029_p0 = scmp.lt.s32.totalorder %s17023_s10, %s17023_s10 }
0x3bef   :  { %16549 = vmatpush3.bf16.msra.mxu1 %v17647_v54  ;;  %15257 = vmatprep.mubr.msk.f32.mxu1 %vm17061_vm0, %v18866_v1 }
0x3bf0   :  { %16550 = vmatprep.subr.bf16.mxu1 %v17060_v0  ;;  %p17030_p1 = por %p17029_p0, %p17028_p13 }
0x3bf2   :  { %p17031_p2 = pnand %p17030_p1, %p17024_p12 }
0x3bf3   :  { %16552 = vmatpush3.bf16.msra.mxu1 %v17649_v34 }
0x3bf4   :  { %16553 = vmatprep.subr.bf16.mxu1 %v17060_v0 }
0x3bf6   :  { %15258 = vmatmul.mubr.f32.vlgmr.msra.gmra.mrb[22].mxu1 %v11726_v44 }
0x3bf7   :  { %16555 = vmatpush3.bf16.msra.mxu1 %v17631_v30  ;;  %15268 = vmatprep.mubr.msk.f32.mxu1 %vm17061_vm0, %v18866_v1 }
0x3bf8   :  { %16556 = vmatprep.subr.bf16.mxu1 %v17060_v0 }
0x3bfb   :  { %16558 = vmatpush3.bf16.msra.mxu1 %v17635_v3 }
0x3bfc   :  { %16559 = vmatprep.subr.bf16.mxu1 %v17060_v0 }
0x3bfe   :  { %15269 = vmatmul.mubr.f32.vlgmr.msra.gmra.mrb[22].mxu1 %v11727_v6 }
0x3bff   :  { %16561 = vmatpush3.bf16.msra.mxu1 %v17651_v59  ;;  %15279 = vmatprep.mubr.msk.f32.mxu1 %vm17061_vm0, %v18866_v1 }
0x3c00   :  { %16562 = vmatprep.subr.bf16.mxu1 %v17060_v0 }
0x3c03   :  { %16564 = vmatpush3.bf16.msra.mxu1 %v17653_v60 }
0x3c04   :  { %16565 = vmatprep.subr.bf16.mxu1 %v17060_v0 }
0x3c06   :  { %15280 = vmatmul.mubr.f32.vlgmr.msra.gmra.mrb[22].mxu1 %v11725_v29 }
0x3c07   :  { %16567 = vmatpush3.bf16.msra.mxu1 %v17631_v30  ;;  %15290 = vmatprep.mubr.msk.f32.mxu1 %vm17061_vm0, %v18866_v1 }
0x3c08   :  { %16568 = vmatprep.subr.bf16.mxu1 %v17060_v0 }
0x3c0b   :  { %16570 = vmatpush3.bf16.msra.mxu1 %v17635_v3 }
0x3c0e   :  { %15291 = vmatmul.mubr.f32.vlgmr.msra.gmra.mrb[22].mxu1 %v11725_v29 }
0x3ce1   :  { %v12137_v26 = vpop.f32.mrb[22].mxu1 }
0x3ce2   :  { %v16594_v54 = vadd.f32 %v16912_v52, %v12137_v26  ;;  %v15292_v34 = vpop.f32.mrb[23].mxu1 }
0x3ce4   :  { %v12141_v59 = vsel %vm608_vm3, %v16594_v54, -inf }
0x3ce5   :  { %12142 = vmax.xlane.f32.xlu0 %v12141_v59 }
0x3d72   :  { %v12143_v60 = vpop.xlane.xlu0 %12142 }
0x3d73   :  { %vm12144_vm4 = vcmp.eq.f32.partialorder %v16594_v54, %v12143_v60 }
0x3d74   :  { %v12145_v30 = vsel %vm12144_vm4, %v17319_v31, 32 }
0x3d75   :  { %v12146_v1 = vsel %vm608_vm3, %v12145_v30, 2147483647 }
0x3d76   :  { %v12148_v0 = vshra.s32 %v12146_v1, 16  ;;  %v12147_v3 = vand.u32 65535, %v12146_v1 }
0x3d78   :  { %v12150_v51 = vcvt.s32.f32 %v12148_v0  ;;  %v12149_v55 = vcvt.s32.f32 %v12147_v3 }
0x3d7a   :  { %12151 = vmin.xlane.f32.xlu1 %v12150_v51 }
0x3e07   :  { %v12152_v35 = vpop.xlane.xlu1 %12151 }
0x3e08   :  { %vm12153_vm0 = vcmp.eq.f32.partialorder %v12150_v51, %v12152_v35  ;;  %v12158_v61 = vcvt.f32.s32 %v12152_v35 }
0x3e09   :  { %v12154_v53 = vsel %vm12153_vm0, %v12149_v55, inf }
0x3e0a   :  { %12155 = vmin.xlane.f32.xlu0 %v12154_v53  ;;  %v12159_v41 = vshll.u32 %v12158_v61, 16 }
0x3e97   :  { %v12156_v39 = vpop.xlane.xlu0 %12155 }
0x3e98   :  { %v12157_v47 = vcvt.f32.s32 %v12156_v39 }
0x3e9a   :  { %v12160_v49 = vadd.s32 %v12159_v41, %v12157_v47 }
0x3e9c   :  { %v12162_v17 = vsel %vm12161_vm15, %v12160_v49, %v18679_v62 }
0x3e9d   :  { %12164 = vst.msk [vmem:[#allocation11] sm:$0xff] %vm12163_vm1, %v12162_v17 }
0x3e9e   :  { %17034 = shalt.err (!%p17031_p2)
}
0x3e9f   :  { %s17035_s13 = scalar_lea.hbm %s18863_s8, 128 }
0x3ea0   :  { %p17036_p3 = scmp.ne.s32.totalorder %s18863_s8, %s17035_s13  ;;  %p17039_p4 = scmp.lt.u32.totalorder %s17035_s13, %s18863_s8 }
0x3ea2   :  { %p17041_p5 = pnand %p17039_p4, %p17036_p3 }
0x3ea4   :  { %17044 = shalt.err (!%p17041_p5)
}
0x3ea5   :  { %12174 = dma.vmem_to_hbm [thread:$0]  %s12172_s22, 128, %s18863_s8, [#allocation4]  }
0x3ea6   :  { %17051 = dma.done.wait [#allocation4], 128  }
0x3ea7   :  { %17052 = vsyncadd [#allocation4], 4294967168 }
0x3ea8   :  { %12178 = vsyncpa [#allocation3], 1 }
0x3ea9   :  { %12179 = vsyncpa [#allocation6], 1 }
0x3eaa   :  { %12180 = vsyncpa [#allocation9], 1 }
0x3eab   :  { %12181 = vsyncpa [#allocation4], 1 }

</bundles_post_ra>
